<compile_context>
chip_gen: v7x
topology: tpu7x:2x2x1
jax: 0.10.0
libtpu: 0.0.40
codegen_flags: <defaults>
</compile_context>

<pallas_src>
import jax
import jax.numpy as jnp
import numpy as np
from jax.experimental import pallas as pl
from jax.experimental.pallas import tpu as pltpu


def _round_up(x, m):
    return ((x + m - 1) // m) * m


def aspp_module_forward_nhwc(x_nhwc, weight_oihw, bn_gamma, bn_beta,
                             bn_mean, bn_var, *, padding, dilation,
                             eps=1e-5, row_tile=16, max_cin_tile=1024):
    """_ASPPModule forward, NHWC in -> NHWC bf16 out (no layout transposes)."""
    N, H, W, Cin = x_nhwc.shape
    Cout, Cin_w, KH, KW = weight_oihw.shape
    assert Cin_w == Cin

    # Output spatial size for stride=1 dilated conv.
    Ho = H + 2 * padding - dilation * (KH - 1)
    Wo = W + 2 * padding - dilation * (KW - 1)

    LANE, SUBL = 128, 8
    Cin_p = _round_up(Cin, LANE)        # lane-dense contraction (cheap insurance
    Cout_p = _round_up(Cout, LANE)      # for tiny Cin; no-op at production sizes)

    # ---- Cin (contraction) tiling -----------------------------------------
    hi = max(LANE, min(Cin_p, max_cin_tile))
    TCin = LANE
    for cand in range(LANE, hi + 1, LANE):
        if Cin_p % cand == 0:
            TCin = cand
    n_cin = Cin_p // TCin

    # ---- row tiling + halo -------------------------------------------------
    Dh = dilation * (KH - 1)            # extra rows needed below each row tile
    if Dh > 0:
        TH = _round_up(max(row_tile, 1), Dh)
        TH = min(TH, _round_up(Ho, Dh))
        Dh_eff = Dh
    else:                               # 1xKW kernel: dummy (unused) halo block
        TH = min(max(row_tile, 1), Ho)
        Dh_eff = TH
    Ho_pad = _round_up(Ho, TH)
    n_row = Ho_pad // TH
    halo_stride = TH // Dh_eff

    # ---- column windows (8-aligned -> no sublane relayout in the hot loop) -
    Wq = _round_up(Wo, SUBL)            # output columns computed per tile
    WT = Wq + SUBL                      # per-tap LHS width
    col_start = [(kw * dilation) // SUBL * SUBL for kw in range(KW)]
    sub_off = [kw * dilation - col_start[kw] for kw in range(KW)]
    Wpp = max(cs + WT for cs in col_start)      # padded input width (>= W + 2p)
    Hpp = Ho_pad + Dh_eff                       # padded input height

    # ---- wrapper-side prep: bf16, zero padding, BN fold --------------------
    xb = x_nhwc.astype(jnp.bfloat16)
    pad_h_hi = Hpp - (H + padding)
    pad_w_hi = Wpp - (W + padding)
    xp = jnp.pad(xb, ((0, 0), (padding, pad_h_hi), (padding, pad_w_hi),
                      (0, Cin_p - Cin)))

    scale = bn_gamma / jnp.sqrt(bn_var + eps)            # (Cout,)
    shift = bn_beta - bn_mean * scale                    # (Cout,)
    w = jnp.transpose(weight_oihw, (2, 3, 1, 0)).reshape(KH * KW, Cin, Cout)
    w = w * scale[None, None, :]
    w = jnp.pad(w, ((0, 0), (0, Cin_p - Cin),
                    (0, Cout_p - Cout))).astype(jnp.bfloat16)
    shift_p = jnp.pad(shift, (0, Cout_p - Cout)).reshape(1, Cout_p)
    shift_p = shift_p.astype(jnp.float32)

    # ---- kernel -------------------------------------------------------------
    def kernel(xm_ref, xh_ref, w_ref, shift_ref, o_ref, acc_ref):
        # xm_ref:    (1, TH, Wpp, TCin)       bf16 row-tile of padded input
        # xh_ref:    (1, Dh_eff, Wpp, TCin)   bf16 halo rows just below it
        # w_ref:     (KH*KW, TCin, Cout_p)    bf16 weights (BN scale folded)
        # shift_ref: (1, Cout_p)              f32  BN shift
        # o_ref:     (1, TH, Wq, Cout_p)      bf16 output tile
        # acc_ref:   (KW, TH, WT, Cout_p)     f32  per-kw accumulators
        c = pl.program_id(2)

        @pl.when(c == 0)
        def _init():
            # kw==0 accumulator starts from the BN shift (its epilogue column
            # offset is 0), the others start from zero -> epilogue = sum+ReLU.
            sh = jnp.broadcast_to(shift_ref[...].reshape(1, 1, Cout_p),
                                  (TH, WT, Cout_p))
            acc_ref[0] = sh
            for kw in range(1, KW):
                acc_ref[kw] = jnp.zeros((TH, WT, Cout_p), jnp.float32)

        # One MXU matmul per (kh, kw, source-block) over this Cin tile.
        for kh in range(KH):
            r0 = kh * dilation          # halo-coordinate row feeding output row 0
            n_main = TH - r0            # output rows served by the main block
            for kw in range(KW):
                w_tap = w_ref[kh * KW + kw]                    # (TCin, Cout_p)
                cs = col_start[kw]
                if n_main > 0:
                    lhs = xm_ref[0, r0:TH, cs:cs + WT, :]
                    lhs = lhs.reshape(n_main * WT, TCin)
                    y = jnp.dot(lhs, w_tap,
                                preferred_element_type=jnp.float32)
                    acc_ref[kw, 0:n_main] += y.reshape(n_main, WT, Cout_p)
                if r0 > 0:              # rows that spill into the halo block
                    lhs = xh_ref[0, 0:r0, cs:cs + WT, :]
                    lhs = lhs.reshape(r0 * WT, TCin)
                    y = jnp.dot(lhs, w_tap,
                                preferred_element_type=jnp.float32)
                    acc_ref[kw, n_main:TH] += y.reshape(r0, WT, Cout_p)

        @pl.when(c == pl.num_programs(2) - 1)
        def _finalize():
            total = acc_ref[0, :, 0:Wq, :]
            for kw in range(1, KW):
                s = sub_off[kw]
                total = total + acc_ref[kw, :, s:s + Wq, :]
            o_ref[0] = jnp.maximum(total, 0.0).astype(o_ref.dtype)

    # ---- specs / grid -------------------------------------------------------
    x_main_spec = pl.BlockSpec((1, TH, Wpp, TCin),
                               lambda mt, n, c: (n, mt, 0, c))
    x_halo_spec = pl.BlockSpec((1, Dh_eff, Wpp, TCin),
                               lambda mt, n, c: (n, (mt + 1) * halo_stride, 0, c))
    w_spec = pl.BlockSpec((KH * KW, TCin, Cout_p), lambda mt, n, c: (0, c, 0))
    s_spec = pl.BlockSpec((1, Cout_p), lambda mt, n, c: (0, 0))
    o_spec = pl.BlockSpec((1, TH, Wq, Cout_p), lambda mt, n, c: (n, mt, 0, 0))

    grid = (n_row, N, n_cin)
    flops = 2 * N * Ho * Wo * KH * KW * Cin * Cout
    bytes_accessed = (N * n_row * n_cin * (TH + Dh_eff) * Wpp * TCin * 2
                      + N * n_row * KH * KW * Cin_p * Cout_p * 2
                      + N * Ho_pad * Wq * Cout_p * 2)

    out = pl.pallas_call(
        kernel,
        out_shape=jax.ShapeDtypeStruct((N, Ho_pad, Wq, Cout_p), jnp.bfloat16),
        grid_spec=pltpu.PrefetchScalarGridSpec(
            num_scalar_prefetch=0,
            grid=grid,
            in_specs=[x_main_spec, x_halo_spec, w_spec, s_spec],
            out_specs=o_spec,
            scratch_shapes=[pltpu.VMEM((KW, TH, WT, Cout_p), jnp.float32)],
        ),
        compiler_params=pltpu.CompilerParams(
            dimension_semantics=("parallel", "parallel", "arbitrary"),
            vmem_limit_bytes=48 * 1024 * 1024,   # safe on v5e/v6e (128 MiB) and v7x (64 MiB)
        ),
        cost_estimate=pl.CostEstimate(flops=flops, transcendentals=0,
                                      bytes_accessed=bytes_accessed),
    )(xp, xp, w, shift_p)

    return out[:, :Ho, :Wo, :Cout]               # NHWC bf16


def aspp_module_forward(x_nchw, weight_oihw, bn_gamma, bn_beta, bn_mean, bn_var,
                        *, padding, dilation, eps=1e-5, row_tile=16,
                        max_cin_tile=1024, out_dtype=jnp.float32):
    """Drop-in NCHW wrapper matching the PyTorch module's layout."""
    x_nhwc = jnp.transpose(x_nchw, (0, 2, 3, 1))
    y = aspp_module_forward_nhwc(x_nhwc, weight_oihw, bn_gamma, bn_beta,
                                 bn_mean, bn_var, padding=padding,
                                 dilation=dilation, eps=eps, row_tile=row_tile,
                                 max_cin_tile=max_cin_tile)
    return jnp.transpose(y, (0, 3, 1, 2)).astype(out_dtype)


def _reference(x_nchw, weight_oihw, bn_gamma, bn_beta, bn_mean, bn_var,
               *, padding, dilation, eps=1e-5):
    """Pure-JAX f32 reference using lax.conv_general_dilated."""
    y = jax.lax.conv_general_dilated(
        x_nchw, weight_oihw,
        window_strides=(1, 1),
        padding=((padding, padding), (padding, padding)),
        rhs_dilation=(dilation, dilation),
        dimension_numbers=("NCHW", "OIHW", "NCHW"),
    )
    scale = bn_gamma / jnp.sqrt(bn_var + eps)
    shift = bn_beta - bn_mean * scale
    return jnp.maximum(y * scale.reshape(1, -1, 1, 1)
                       + shift.reshape(1, -1, 1, 1), 0.0)


if __name__ == "__main__":
    def run_case(key, *, N, Cin, Cout, H, W, k, pad, dil, row_tile,
                 max_cin_tile, nontrivial_bn, atol):
        kx, kw, kg, kb, km, kv = jax.random.split(key, 6)
        x = jax.random.normal(kx, (N, Cin, H, W), dtype=jnp.float32)
        # kaiming_normal_ (fan_in, relu gain): std = sqrt(2 / fan_in)
        fan_in = Cin * k * k
        weight = jax.random.normal(kw, (Cout, Cin, k, k), dtype=jnp.float32)
        weight = weight * jnp.sqrt(2.0 / fan_in)
        if nontrivial_bn:
            bn_gamma = 0.8 + 0.4 * jax.random.uniform(kg, (Cout,), jnp.float32)
            bn_beta = 0.3 * jax.random.normal(kb, (Cout,), jnp.float32)
            bn_mean = 0.2 * jax.random.normal(km, (Cout,), jnp.float32)
            bn_var = 0.8 + 0.4 * jax.random.uniform(kv, (Cout,), jnp.float32)
        else:
            # BatchNorm2d per _init_weight: gamma=1, beta=0; running stats at init.
            bn_gamma = jnp.ones((Cout,), jnp.float32)
            bn_beta = jnp.zeros((Cout,), jnp.float32)
            bn_mean = jnp.zeros((Cout,), jnp.float32)
            bn_var = jnp.ones((Cout,), jnp.float32)

        out = aspp_module_forward(
            x, weight, bn_gamma, bn_beta, bn_mean, bn_var,
            padding=pad, dilation=dil, row_tile=row_tile,
            max_cin_tile=max_cin_tile)
        out = jax.block_until_ready(out)

        ref = _reference(x, weight, bn_gamma, bn_beta, bn_mean, bn_var,
                         padding=pad, dilation=dil)
        ref = jax.block_until_ready(ref)

        Ho = H + 2 * pad - dil * (k - 1)
        Wo = W + 2 * pad - dil * (k - 1)
        assert out.shape == (N, Cout, Ho, Wo), out.shape
        # bf16 activations/weights with f32 accumulation -> widened tolerance.
        assert np.allclose(np.asarray(out), np.asarray(ref),
                           atol=atol, rtol=5e-2)

    key = jax.random.PRNGKey(0)
    k1, k2 = jax.random.split(key)

    # Primary: the module's toy config (row_tile=8 -> 2 row tiles, so the
    # halo path across row tiles is exercised).
    run_case(k1, N=2, Cin=4, Cout=8, H=16, W=16, k=3, pad=2, dil=2,
             row_tile=8, max_cin_tile=1024, nontrivial_bn=False, atol=5e-2)

    # Secondary: multiple Cin tiles (accumulator init/finalize across the
    # "arbitrary" grid axis), nonzero sub-8 column offsets, odd H/W padding,
    # nontrivial BatchNorm folding, batch=1.
    run_case(k2, N=1, Cin=160, Cout=8, H=9, W=9, k=3, pad=3, dil=3,
             row_tile=8, max_cin_tile=128, nontrivial_bn=True, atol=1e-1)

    print("KERNEL_OK")
</pallas_src>

<mosaic_0001>
module attributes {stable_mosaic.version = 11 : i64} {
  func.func @kernel(%arg0: i32, %arg1: i32, %arg2: i32, %arg3: memref<1x8x24x128xbf16, #tpu.memory_space<vmem>>, %arg4: memref<1x4x24x128xbf16, #tpu.memory_space<vmem>>, %arg5: memref<9x128x128xbf16, #tpu.memory_space<vmem>>, %arg6: memref<1x128xf32, #tpu.memory_space<vmem>>, %arg7: memref<1x8x16x128xbf16, #tpu.memory_space<vmem>>, %arg8: memref<3x8x24x128xf32, #tpu.memory_space<vmem>>) attributes {dimension_semantics = [#tpu.dimension_semantics<parallel>, #tpu.dimension_semantics<parallel>, #tpu.dimension_semantics<arbitrary>], iteration_bounds = array<i64: 2, 2, 1>, scalar_prefetch = 0 : i64, scratch_operands = 1 : i64, tpu.core_type = #tpu.core_type<tc>, window_params = [{transform_indices = @transform_0, window_bounds = array<i64: 1, 8, 24, 128>}, {transform_indices = @transform_1, window_bounds = array<i64: 1, 4, 24, 128>}, {transform_indices = @transform_2, window_bounds = array<i64: 9, 128, 128>}, {pipeline_mode = #tpu.pipeline_mode<synchronous>, transform_indices = @transform_3, window_bounds = array<i64: 1, 128>}, {transform_indices = @transform_4, window_bounds = array<i64: 1, 8, 16, 128>}]} {
    %c0_i32 = arith.constant 0 : i32
    %0 = arith.cmpi eq, %arg2, %c0_i32 : i32
    %1 = arith.extui %0 : i1 to i32
    %c0_i32_0 = arith.constant 0 : i32
    %2 = arith.cmpi ne, %1, %c0_i32_0 : i32
    scf.if %2 {
      %c0_215 = arith.constant 0 : index
      %c0_216 = arith.constant 0 : index
      %189 = vector.load %arg6[%c0_215, %c0_216] : memref<1x128xf32, #tpu.memory_space<vmem>>, vector<1x128xf32>
      %190 = vector.shape_cast %189 : vector<1x128xf32> to vector<1x1x128xf32>
      %191 = vector.shape_cast %190 : vector<1x1x128xf32> to vector<1x1x128xf32>
      %192 = vector.broadcast %191 : vector<1x1x128xf32> to vector<8x24x128xf32>
      %c0_217 = arith.constant 0 : index
      %c0_218 = arith.constant 0 : index
      %c0_219 = arith.constant 0 : index
      %c0_220 = arith.constant 0 : index
      %193 = vector.load %arg8[%c0_217, %c0_218, %c0_219, %c0_220] : memref<3x8x24x128xf32, #tpu.memory_space<vmem>>, vector<1x8x24x128xf32>
      %194 = vector.shape_cast %193 : vector<1x8x24x128xf32> to vector<8x24x128xf32>
      %195 = vector.shape_cast %192 : vector<8x24x128xf32> to vector<1x8x24x128xf32>
      tpu.vector_store %arg8[%c0_217, %c0_218, %c0_219, %c0_220], %195 {strides = array<i32>} : memref<3x8x24x128xf32, #tpu.memory_space<vmem>>, vector<1x8x24x128xf32>,
      %cst_221 = arith.constant 0.000000e+00 : f32
      %196 = vector.broadcast %cst_221 : f32 to vector<8x24x128xf32>
      %c1_222 = arith.constant 1 : index
      %c0_223 = arith.constant 0 : index
      %c0_224 = arith.constant 0 : index
      %c0_225 = arith.constant 0 : index
      %197 = vector.load %arg8[%c1_222, %c0_223, %c0_224, %c0_225] : memref<3x8x24x128xf32, #tpu.memory_space<vmem>>, vector<1x8x24x128xf32>
      %198 = vector.shape_cast %197 : vector<1x8x24x128xf32> to vector<8x24x128xf32>
      %199 = vector.shape_cast %196 : vector<8x24x128xf32> to vector<1x8x24x128xf32>
      tpu.vector_store %arg8[%c1_222, %c0_223, %c0_224, %c0_225], %199 {strides = array<i32>} : memref<3x8x24x128xf32, #tpu.memory_space<vmem>>, vector<1x8x24x128xf32>,
      %cst_226 = arith.constant 0.000000e+00 : f32
      %200 = vector.broadcast %cst_226 : f32 to vector<8x24x128xf32>
      %c2_227 = arith.constant 2 : index
      %c0_228 = arith.constant 0 : index
      %c0_229 = arith.constant 0 : index
      %c0_230 = arith.constant 0 : index
      %201 = vector.load %arg8[%c2_227, %c0_228, %c0_229, %c0_230] : memref<3x8x24x128xf32, #tpu.memory_space<vmem>>, vector<1x8x24x128xf32>
      %202 = vector.shape_cast %201 : vector<1x8x24x128xf32> to vector<8x24x128xf32>
      %203 = vector.shape_cast %200 : vector<8x24x128xf32> to vector<1x8x24x128xf32>
      tpu.vector_store %arg8[%c2_227, %c0_228, %c0_229, %c0_230], %203 {strides = array<i32>} : memref<3x8x24x128xf32, #tpu.memory_space<vmem>>, vector<1x8x24x128xf32>,
    } else {
    }
    %c0 = arith.constant 0 : index
    %c0_1 = arith.constant 0 : index
    %c0_2 = arith.constant 0 : index
    %3 = vector.load %arg5[%c0, %c0_1, %c0_2] : memref<9x128x128xbf16, #tpu.memory_space<vmem>>, vector<1x128x128xbf16>
    %4 = vector.shape_cast %3 : vector<1x128x128xbf16> to vector<128x128xbf16>
    %c0_3 = arith.constant 0 : index
    %c0_4 = arith.constant 0 : index
    %c0_5 = arith.constant 0 : index
    %c0_6 = arith.constant 0 : index
    %5 = vector.load %arg3[%c0_3, %c0_4, %c0_5, %c0_6] : memref<1x8x24x128xbf16, #tpu.memory_space<vmem>>, vector<1x8x24x128xbf16>
    %6 = vector.shape_cast %5 : vector<1x8x24x128xbf16> to vector<8x24x128xbf16>
    %7 = vector.shape_cast %6 : vector<8x24x128xbf16> to vector<192x128xbf16>
    %cst = arith.constant dense<0.000000e+00> : vector<192x128xf32>
    %8 = tpu.matmul %7, %4, %cst {dimension_numbers = #tpu.dot_dimension_numbers<[1], [0], [0], [1], [0, 0, 1, 1], [], []>} : vector<192x128xbf16>, vector<128x128xbf16>, vector<192x128xf32> -> vector<192x128xf32>
    %c0_7 = arith.constant 0 : index
    %c0_8 = arith.constant 0 : index
    %c0_9 = arith.constant 0 : index
    %c0_10 = arith.constant 0 : index
    %9 = vector.load %arg8[%c0_7, %c0_8, %c0_9, %c0_10] : memref<3x8x24x128xf32, #tpu.memory_space<vmem>>, vector<1x8x24x128xf32>
    %10 = vector.shape_cast %9 : vector<1x8x24x128xf32> to vector<8x24x128xf32>
    %11 = vector.shape_cast %8 : vector<192x128xf32> to vector<8x24x128xf32>
    %12 = arith.addf %10, %11 : vector<8x24x128xf32>
    %c0_11 = arith.constant 0 : index
    %c0_12 = arith.constant 0 : index
    %c0_13 = arith.constant 0 : index
    %c0_14 = arith.constant 0 : index
    %13 = vector.load %arg8[%c0_11, %c0_12, %c0_13, %c0_14] : memref<3x8x24x128xf32, #tpu.memory_space<vmem>>, vector<1x8x24x128xf32>
    %14 = vector.shape_cast %13 : vector<1x8x24x128xf32> to vector<8x24x128xf32>
    %15 = vector.shape_cast %12 : vector<8x24x128xf32> to vector<1x8x24x128xf32>
    tpu.vector_store %arg8[%c0_11, %c0_12, %c0_13, %c0_14], %15 {strides = array<i32>} : memref<3x8x24x128xf32, #tpu.memory_space<vmem>>, vector<1x8x24x128xf32>,
    %c1 = arith.constant 1 : index
    %c0_15 = arith.constant 0 : index
    %c0_16 = arith.constant 0 : index
    %16 = vector.load %arg5[%c1, %c0_15, %c0_16] : memref<9x128x128xbf16, #tpu.memory_space<vmem>>, vector<1x128x128xbf16>
    %17 = vector.shape_cast %16 : vector<1x128x128xbf16> to vector<128x128xbf16>
    %c0_17 = arith.constant 0 : index
    %c0_18 = arith.constant 0 : index
    %c0_19 = arith.constant 0 : index
    %c0_20 = arith.constant 0 : index
    %18 = vector.load %arg3[%c0_17, %c0_18, %c0_19, %c0_20] : memref<1x8x24x128xbf16, #tpu.memory_space<vmem>>, vector<1x8x24x128xbf16>
    %19 = vector.shape_cast %18 : vector<1x8x24x128xbf16> to vector<8x24x128xbf16>
    %20 = vector.shape_cast %19 : vector<8x24x128xbf16> to vector<192x128xbf16>
    %cst_21 = arith.constant dense<0.000000e+00> : vector<192x128xf32>
    %21 = tpu.matmul %20, %17, %cst_21 {dimension_numbers = #tpu.dot_dimension_numbers<[1], [0], [0], [1], [0, 0, 1, 1], [], []>} : vector<192x128xbf16>, vector<128x128xbf16>, vector<192x128xf32> -> vector<192x128xf32>
    %c1_22 = arith.constant 1 : index
    %c0_23 = arith.constant 0 : index
    %c0_24 = arith.constant 0 : index
    %c0_25 = arith.constant 0 : index
    %22 = vector.load %arg8[%c1_22, %c0_23, %c0_24, %c0_25] : memref<3x8x24x128xf32, #tpu.memory_space<vmem>>, vector<1x8x24x128xf32>
    %23 = vector.shape_cast %22 : vector<1x8x24x128xf32> to vector<8x24x128xf32>
    %24 = vector.shape_cast %21 : vector<192x128xf32> to vector<8x24x128xf32>
    %25 = arith.addf %23, %24 : vector<8x24x128xf32>
    %c1_26 = arith.constant 1 : index
    %c0_27 = arith.constant 0 : index
    %c0_28 = arith.constant 0 : index
    %c0_29 = arith.constant 0 : index
    %26 = vector.load %arg8[%c1_26, %c0_27, %c0_28, %c0_29] : memref<3x8x24x128xf32, #tpu.memory_space<vmem>>, vector<1x8x24x128xf32>
    %27 = vector.shape_cast %26 : vector<1x8x24x128xf32> to vector<8x24x128xf32>
    %28 = vector.shape_cast %25 : vector<8x24x128xf32> to vector<1x8x24x128xf32>
    tpu.vector_store %arg8[%c1_26, %c0_27, %c0_28, %c0_29], %28 {strides = array<i32>} : memref<3x8x24x128xf32, #tpu.memory_space<vmem>>, vector<1x8x24x128xf32>,
    %c2 = arith.constant 2 : index
    %c0_30 = arith.constant 0 : index
    %c0_31 = arith.constant 0 : index
    %29 = vector.load %arg5[%c2, %c0_30, %c0_31] : memref<9x128x128xbf16, #tpu.memory_space<vmem>>, vector<1x128x128xbf16>
    %30 = vector.shape_cast %29 : vector<1x128x128xbf16> to vector<128x128xbf16>
    %c0_32 = arith.constant 0 : index
    %c0_33 = arith.constant 0 : index
    %c0_34 = arith.constant 0 : index
    %c0_35 = arith.constant 0 : index
    %31 = vector.load %arg3[%c0_32, %c0_33, %c0_34, %c0_35] : memref<1x8x24x128xbf16, #tpu.memory_space<vmem>>, vector<1x8x24x128xbf16>
    %32 = vector.shape_cast %31 : vector<1x8x24x128xbf16> to vector<8x24x128xbf16>
    %33 = vector.shape_cast %32 : vector<8x24x128xbf16> to vector<192x128xbf16>
    %cst_36 = arith.constant dense<0.000000e+00> : vector<192x128xf32>
    %34 = tpu.matmul %33, %30, %cst_36 {dimension_numbers = #tpu.dot_dimension_numbers<[1], [0], [0], [1], [0, 0, 1, 1], [], []>} : vector<192x128xbf16>, vector<128x128xbf16>, vector<192x128xf32> -> vector<192x128xf32>
    %c2_37 = arith.constant 2 : index
    %c0_38 = arith.constant 0 : index
    %c0_39 = arith.constant 0 : index
    %c0_40 = arith.constant 0 : index
    %35 = vector.load %arg8[%c2_37, %c0_38, %c0_39, %c0_40] : memref<3x8x24x128xf32, #tpu.memory_space<vmem>>, vector<1x8x24x128xf32>
    %36 = vector.shape_cast %35 : vector<1x8x24x128xf32> to vector<8x24x128xf32>
    %37 = vector.shape_cast %34 : vector<192x128xf32> to vector<8x24x128xf32>
    %38 = arith.addf %36, %37 : vector<8x24x128xf32>
    %c2_41 = arith.constant 2 : index
    %c0_42 = arith.constant 0 : index
    %c0_43 = arith.constant 0 : index
    %c0_44 = arith.constant 0 : index
    %39 = vector.load %arg8[%c2_41, %c0_42, %c0_43, %c0_44] : memref<3x8x24x128xf32, #tpu.memory_space<vmem>>, vector<1x8x24x128xf32>
    %40 = vector.shape_cast %39 : vector<1x8x24x128xf32> to vector<8x24x128xf32>
    %41 = vector.shape_cast %38 : vector<8x24x128xf32> to vector<1x8x24x128xf32>
    tpu.vector_store %arg8[%c2_41, %c0_42, %c0_43, %c0_44], %41 {strides = array<i32>} : memref<3x8x24x128xf32, #tpu.memory_space<vmem>>, vector<1x8x24x128xf32>,
    %c3 = arith.constant 3 : index
    %c0_45 = arith.constant 0 : index
    %c0_46 = arith.constant 0 : index
    %42 = vector.load %arg5[%c3, %c0_45, %c0_46] : memref<9x128x128xbf16, #tpu.memory_space<vmem>>, vector<1x128x128xbf16>
    %43 = vector.shape_cast %42 : vector<1x128x128xbf16> to vector<128x128xbf16>
    %c0_47 = arith.constant 0 : index
    %c2_48 = arith.constant 2 : index
    %c0_49 = arith.constant 0 : index
    %c0_50 = arith.constant 0 : index
    %44 = vector.load %arg3[%c0_47, %c2_48, %c0_49, %c0_50] : memref<1x8x24x128xbf16, #tpu.memory_space<vmem>>, vector<1x6x24x128xbf16>
    %45 = vector.shape_cast %44 : vector<1x6x24x128xbf16> to vector<6x24x128xbf16>
    %46 = vector.shape_cast %45 : vector<6x24x128xbf16> to vector<144x128xbf16>
    %cst_51 = arith.constant dense<0.000000e+00> : vector<144x128xf32>
    %47 = tpu.matmul %46, %43, %cst_51 {dimension_numbers = #tpu.dot_dimension_numbers<[1], [0], [0], [1], [0, 0, 1, 1], [], []>} : vector<144x128xbf16>, vector<128x128xbf16>, vector<144x128xf32> -> vector<144x128xf32>
    %c0_52 = arith.constant 0 : index
    %c0_53 = arith.constant 0 : index
    %c0_54 = arith.constant 0 : index
    %c0_55 = arith.constant 0 : index
    %48 = vector.load %arg8[%c0_52, %c0_53, %c0_54, %c0_55] : memref<3x8x24x128xf32, #tpu.memory_space<vmem>>, vector<1x6x24x128xf32>
    %49 = vector.shape_cast %48 : vector<1x6x24x128xf32> to vector<6x24x128xf32>
    %50 = vector.shape_cast %47 : vector<144x128xf32> to vector<6x24x128xf32>
    %51 = arith.addf %49, %50 : vector<6x24x128xf32>
    %c0_56 = arith.constant 0 : index
    %c0_57 = arith.constant 0 : index
    %c0_58 = arith.constant 0 : index
    %c0_59 = arith.constant 0 : index
    %52 = vector.load %arg8[%c0_56, %c0_57, %c0_58, %c0_59] : memref<3x8x24x128xf32, #tpu.memory_space<vmem>>, vector<1x6x24x128xf32>
    %53 = vector.shape_cast %52 : vector<1x6x24x128xf32> to vector<6x24x128xf32>
    %54 = vector.shape_cast %51 : vector<6x24x128xf32> to vector<1x6x24x128xf32>
    tpu.vector_store %arg8[%c0_56, %c0_57, %c0_58, %c0_59], %54 {strides = array<i32>} : memref<3x8x24x128xf32, #tpu.memory_space<vmem>>, vector<1x6x24x128xf32>,
    %c0_60 = arith.constant 0 : index
    %c0_61 = arith.constant 0 : index
    %c0_62 = arith.constant 0 : index
    %c0_63 = arith.constant 0 : index
    %55 = vector.load %arg4[%c0_60, %c0_61, %c0_62, %c0_63] : memref<1x4x24x128xbf16, #tpu.memory_space<vmem>>, vector<1x2x24x128xbf16>
    %56 = vector.shape_cast %55 : vector<1x2x24x128xbf16> to vector<2x24x128xbf16>
    %57 = vector.shape_cast %56 : vector<2x24x128xbf16> to vector<48x128xbf16>
    %cst_64 = arith.constant dense<0.000000e+00> : vector<48x128xf32>
    %58 = tpu.matmul %57, %43, %cst_64 {dimension_numbers = #tpu.dot_dimension_numbers<[1], [0], [0], [1], [0, 0, 1, 1], [], []>} : vector<48x128xbf16>, vector<128x128xbf16>, vector<48x128xf32> -> vector<48x128xf32>
    %c0_65 = arith.constant 0 : index
    %c6 = arith.constant 6 : index
    %c0_66 = arith.constant 0 : index
    %c0_67 = arith.constant 0 : index
    %59 = vector.load %arg8[%c0_65, %c6, %c0_66, %c0_67] : memref<3x8x24x128xf32, #tpu.memory_space<vmem>>, vector<1x2x24x128xf32>
    %60 = vector.shape_cast %59 : vector<1x2x24x128xf32> to vector<2x24x128xf32>
    %61 = vector.shape_cast %58 : vector<48x128xf32> to vector<2x24x128xf32>
    %62 = arith.addf %60, %61 : vector<2x24x128xf32>
    %c0_68 = arith.constant 0 : index
    %c6_69 = arith.constant 6 : index
    %c0_70 = arith.constant 0 : index
    %c0_71 = arith.constant 0 : index
    %63 = vector.load %arg8[%c0_68, %c6_69, %c0_70, %c0_71] : memref<3x8x24x128xf32, #tpu.memory_space<vmem>>, vector<1x2x24x128xf32>
    %64 = vector.shape_cast %63 : vector<1x2x24x128xf32> to vector<2x24x128xf32>
    %65 = vector.shape_cast %62 : vector<2x24x128xf32> to vector<1x2x24x128xf32>
    tpu.vector_store %arg8[%c0_68, %c6_69, %c0_70, %c0_71], %65 {strides = array<i32>} : memref<3x8x24x128xf32, #tpu.memory_space<vmem>>, vector<1x2x24x128xf32>,
    %c4 = arith.constant 4 : index
    %c0_72 = arith.constant 0 : index
    %c0_73 = arith.constant 0 : index
    %66 = vector.load %arg5[%c4, %c0_72, %c0_73] : memref<9x128x128xbf16, #tpu.memory_space<vmem>>, vector<1x128x128xbf16>
    %67 = vector.shape_cast %66 : vector<1x128x128xbf16> to vector<128x128xbf16>
    %c0_74 = arith.constant 0 : index
    %c2_75 = arith.constant 2 : index
    %c0_76 = arith.constant 0 : index
    %c0_77 = arith.constant 0 : index
    %68 = vector.load %arg3[%c0_74, %c2_75, %c0_76, %c0_77] : memref<1x8x24x128xbf16, #tpu.memory_space<vmem>>, vector<1x6x24x128xbf16>
    %69 = vector.shape_cast %68 : vector<1x6x24x128xbf16> to vector<6x24x128xbf16>
    %70 = vector.shape_cast %69 : vector<6x24x128xbf16> to vector<144x128xbf16>
    %cst_78 = arith.constant dense<0.000000e+00> : vector<144x128xf32>
    %71 = tpu.matmul %70, %67, %cst_78 {dimension_numbers = #tpu.dot_dimension_numbers<[1], [0], [0], [1], [0, 0, 1, 1], [], []>} : vector<144x128xbf16>, vector<128x128xbf16>, vector<144x128xf32> -> vector<144x128xf32>
    %c1_79 = arith.constant 1 : index
    %c0_80 = arith.constant 0 : index
    %c0_81 = arith.constant 0 : index
    %c0_82 = arith.constant 0 : index
    %72 = vector.load %arg8[%c1_79, %c0_80, %c0_81, %c0_82] : memref<3x8x24x128xf32, #tpu.memory_space<vmem>>, vector<1x6x24x128xf32>
    %73 = vector.shape_cast %72 : vector<1x6x24x128xf32> to vector<6x24x128xf32>
    %74 = vector.shape_cast %71 : vector<144x128xf32> to vector<6x24x128xf32>
    %75 = arith.addf %73, %74 : vector<6x24x128xf32>
    %c1_83 = arith.constant 1 : index
    %c0_84 = arith.constant 0 : index
    %c0_85 = arith.constant 0 : index
    %c0_86 = arith.constant 0 : index
    %76 = vector.load %arg8[%c1_83, %c0_84, %c0_85, %c0_86] : memref<3x8x24x128xf32, #tpu.memory_space<vmem>>, vector<1x6x24x128xf32>
    %77 = vector.shape_cast %76 : vector<1x6x24x128xf32> to vector<6x24x128xf32>
    %78 = vector.shape_cast %75 : vector<6x24x128xf32> to vector<1x6x24x128xf32>
    tpu.vector_store %arg8[%c1_83, %c0_84, %c0_85, %c0_86], %78 {strides = array<i32>} : memref<3x8x24x128xf32, #tpu.memory_space<vmem>>, vector<1x6x24x128xf32>,
    %c0_87 = arith.constant 0 : index
    %c0_88 = arith.constant 0 : index
    %c0_89 = arith.constant 0 : index
    %c0_90 = arith.constant 0 : index
    %79 = vector.load %arg4[%c0_87, %c0_88, %c0_89, %c0_90] : memref<1x4x24x128xbf16, #tpu.memory_space<vmem>>, vector<1x2x24x128xbf16>
    %80 = vector.shape_cast %79 : vector<1x2x24x128xbf16> to vector<2x24x128xbf16>
    %81 = vector.shape_cast %80 : vector<2x24x128xbf16> to vector<48x128xbf16>
    %cst_91 = arith.constant dense<0.000000e+00> : vector<48x128xf32>
    %82 = tpu.matmul %81, %67, %cst_91 {dimension_numbers = #tpu.dot_dimension_numbers<[1], [0], [0], [1], [0, 0, 1, 1], [], []>} : vector<48x128xbf16>, vector<128x128xbf16>, vector<48x128xf32> -> vector<48x128xf32>
    %c1_92 = arith.constant 1 : index
    %c6_93 = arith.constant 6 : index
    %c0_94 = arith.constant 0 : index
    %c0_95 = arith.constant 0 : index
    %83 = vector.load %arg8[%c1_92, %c6_93, %c0_94, %c0_95] : memref<3x8x24x128xf32, #tpu.memory_space<vmem>>, vector<1x2x24x128xf32>
    %84 = vector.shape_cast %83 : vector<1x2x24x128xf32> to vector<2x24x128xf32>
    %85 = vector.shape_cast %82 : vector<48x128xf32> to vector<2x24x128xf32>
    %86 = arith.addf %84, %85 : vector<2x24x128xf32>
    %c1_96 = arith.constant 1 : index
    %c6_97 = arith.constant 6 : index
    %c0_98 = arith.constant 0 : index
    %c0_99 = arith.constant 0 : index
    %87 = vector.load %arg8[%c1_96, %c6_97, %c0_98, %c0_99] : memref<3x8x24x128xf32, #tpu.memory_space<vmem>>, vector<1x2x24x128xf32>
    %88 = vector.shape_cast %87 : vector<1x2x24x128xf32> to vector<2x24x128xf32>
    %89 = vector.shape_cast %86 : vector<2x24x128xf32> to vector<1x2x24x128xf32>
    tpu.vector_store %arg8[%c1_96, %c6_97, %c0_98, %c0_99], %89 {strides = array<i32>} : memref<3x8x24x128xf32, #tpu.memory_space<vmem>>, vector<1x2x24x128xf32>,
    %c5 = arith.constant 5 : index
    %c0_100 = arith.constant 0 : index
    %c0_101 = arith.constant 0 : index
    %90 = vector.load %arg5[%c5, %c0_100, %c0_101] : memref<9x128x128xbf16, #tpu.memory_space<vmem>>, vector<1x128x128xbf16>
    %91 = vector.shape_cast %90 : vector<1x128x128xbf16> to vector<128x128xbf16>
    %c0_102 = arith.constant 0 : index
    %c2_103 = arith.constant 2 : index
    %c0_104 = arith.constant 0 : index
    %c0_105 = arith.constant 0 : index
    %92 = vector.load %arg3[%c0_102, %c2_103, %c0_104, %c0_105] : memref<1x8x24x128xbf16, #tpu.memory_space<vmem>>, vector<1x6x24x128xbf16>
    %93 = vector.shape_cast %92 : vector<1x6x24x128xbf16> to vector<6x24x128xbf16>
    %94 = vector.shape_cast %93 : vector<6x24x128xbf16> to vector<144x128xbf16>
    %cst_106 = arith.constant dense<0.000000e+00> : vector<144x128xf32>
    %95 = tpu.matmul %94, %91, %cst_106 {dimension_numbers = #tpu.dot_dimension_numbers<[1], [0], [0], [1], [0, 0, 1, 1], [], []>} : vector<144x128xbf16>, vector<128x128xbf16>, vector<144x128xf32> -> vector<144x128xf32>
    %c2_107 = arith.constant 2 : index
    %c0_108 = arith.constant 0 : index
    %c0_109 = arith.constant 0 : index
    %c0_110 = arith.constant 0 : index
    %96 = vector.load %arg8[%c2_107, %c0_108, %c0_109, %c0_110] : memref<3x8x24x128xf32, #tpu.memory_space<vmem>>, vector<1x6x24x128xf32>
    %97 = vector.shape_cast %96 : vector<1x6x24x128xf32> to vector<6x24x128xf32>
    %98 = vector.shape_cast %95 : vector<144x128xf32> to vector<6x24x128xf32>
    %99 = arith.addf %97, %98 : vector<6x24x128xf32>
    %c2_111 = arith.constant 2 : index
    %c0_112 = arith.constant 0 : index
    %c0_113 = arith.constant 0 : index
    %c0_114 = arith.constant 0 : index
    %100 = vector.load %arg8[%c2_111, %c0_112, %c0_113, %c0_114] : memref<3x8x24x128xf32, #tpu.memory_space<vmem>>, vector<1x6x24x128xf32>
    %101 = vector.shape_cast %100 : vector<1x6x24x128xf32> to vector<6x24x128xf32>
    %102 = vector.shape_cast %99 : vector<6x24x128xf32> to vector<1x6x24x128xf32>
    tpu.vector_store %arg8[%c2_111, %c0_112, %c0_113, %c0_114], %102 {strides = array<i32>} : memref<3x8x24x128xf32, #tpu.memory_space<vmem>>, vector<1x6x24x128xf32>,
    %c0_115 = arith.constant 0 : index
    %c0_116 = arith.constant 0 : index
    %c0_117 = arith.constant 0 : index
    %c0_118 = arith.constant 0 : index
    %103 = vector.load %arg4[%c0_115, %c0_116, %c0_117, %c0_118] : memref<1x4x24x128xbf16, #tpu.memory_space<vmem>>, vector<1x2x24x128xbf16>
    %104 = vector.shape_cast %103 : vector<1x2x24x128xbf16> to vector<2x24x128xbf16>
    %105 = vector.shape_cast %104 : vector<2x24x128xbf16> to vector<48x128xbf16>
    %cst_119 = arith.constant dense<0.000000e+00> : vector<48x128xf32>
    %106 = tpu.matmul %105, %91, %cst_119 {dimension_numbers = #tpu.dot_dimension_numbers<[1], [0], [0], [1], [0, 0, 1, 1], [], []>} : vector<48x128xbf16>, vector<128x128xbf16>, vector<48x128xf32> -> vector<48x128xf32>
    %c2_120 = arith.constant 2 : index
    %c6_121 = arith.constant 6 : index
    %c0_122 = arith.constant 0 : index
    %c0_123 = arith.constant 0 : index
    %107 = vector.load %arg8[%c2_120, %c6_121, %c0_122, %c0_123] : memref<3x8x24x128xf32, #tpu.memory_space<vmem>>, vector<1x2x24x128xf32>
    %108 = vector.shape_cast %107 : vector<1x2x24x128xf32> to vector<2x24x128xf32>
    %109 = vector.shape_cast %106 : vector<48x128xf32> to vector<2x24x128xf32>
    %110 = arith.addf %108, %109 : vector<2x24x128xf32>
    %c2_124 = arith.constant 2 : index
    %c6_125 = arith.constant 6 : index
    %c0_126 = arith.constant 0 : index
    %c0_127 = arith.constant 0 : index
    %111 = vector.load %arg8[%c2_124, %c6_125, %c0_126, %c0_127] : memref<3x8x24x128xf32, #tpu.memory_space<vmem>>, vector<1x2x24x128xf32>
    %112 = vector.shape_cast %111 : vector<1x2x24x128xf32> to vector<2x24x128xf32>
    %113 = vector.shape_cast %110 : vector<2x24x128xf32> to vector<1x2x24x128xf32>
    tpu.vector_store %arg8[%c2_124, %c6_125, %c0_126, %c0_127], %113 {strides = array<i32>} : memref<3x8x24x128xf32, #tpu.memory_space<vmem>>, vector<1x2x24x128xf32>,
    %c6_128 = arith.constant 6 : index
    %c0_129 = arith.constant 0 : index
    %c0_130 = arith.constant 0 : index
    %114 = vector.load %arg5[%c6_128, %c0_129, %c0_130] : memref<9x128x128xbf16, #tpu.memory_space<vmem>>, vector<1x128x128xbf16>
    %115 = vector.shape_cast %114 : vector<1x128x128xbf16> to vector<128x128xbf16>
    %c0_131 = arith.constant 0 : index
    %c4_132 = arith.constant 4 : index
    %c0_133 = arith.constant 0 : index
    %c0_134 = arith.constant 0 : index
    %116 = vector.load %arg3[%c0_131, %c4_132, %c0_133, %c0_134] : memref<1x8x24x128xbf16, #tpu.memory_space<vmem>>, vector<1x4x24x128xbf16>
    %117 = vector.shape_cast %116 : vector<1x4x24x128xbf16> to vector<4x24x128xbf16>
    %118 = vector.shape_cast %117 : vector<4x24x128xbf16> to vector<96x128xbf16>
    %cst_135 = arith.constant dense<0.000000e+00> : vector<96x128xf32>
    %119 = tpu.matmul %118, %115, %cst_135 {dimension_numbers = #tpu.dot_dimension_numbers<[1], [0], [0], [1], [0, 0, 1, 1], [], []>} : vector<96x128xbf16>, vector<128x128xbf16>, vector<96x128xf32> -> vector<96x128xf32>
    %c0_136 = arith.constant 0 : index
    %c0_137 = arith.constant 0 : index
    %c0_138 = arith.constant 0 : index
    %c0_139 = arith.constant 0 : index
    %120 = vector.load %arg8[%c0_136, %c0_137, %c0_138, %c0_139] : memref<3x8x24x128xf32, #tpu.memory_space<vmem>>, vector<1x4x24x128xf32>
    %121 = vector.shape_cast %120 : vector<1x4x24x128xf32> to vector<4x24x128xf32>
    %122 = vector.shape_cast %119 : vector<96x128xf32> to vector<4x24x128xf32>
    %123 = arith.addf %121, %122 : vector<4x24x128xf32>
    %c0_140 = arith.constant 0 : index
    %c0_141 = arith.constant 0 : index
    %c0_142 = arith.constant 0 : index
    %c0_143 = arith.constant 0 : index
    %124 = vector.load %arg8[%c0_140, %c0_141, %c0_142, %c0_143] : memref<3x8x24x128xf32, #tpu.memory_space<vmem>>, vector<1x4x24x128xf32>
    %125 = vector.shape_cast %124 : vector<1x4x24x128xf32> to vector<4x24x128xf32>
    %126 = vector.shape_cast %123 : vector<4x24x128xf32> to vector<1x4x24x128xf32>
    tpu.vector_store %arg8[%c0_140, %c0_141, %c0_142, %c0_143], %126 {strides = array<i32>} : memref<3x8x24x128xf32, #tpu.memory_space<vmem>>, vector<1x4x24x128xf32>,
    %c0_144 = arith.constant 0 : index
    %c0_145 = arith.constant 0 : index
    %c0_146 = arith.constant 0 : index
    %c0_147 = arith.constant 0 : index
    %127 = vector.load %arg4[%c0_144, %c0_145, %c0_146, %c0_147] : memref<1x4x24x128xbf16, #tpu.memory_space<vmem>>, vector<1x4x24x128xbf16>
    %128 = vector.shape_cast %127 : vector<1x4x24x128xbf16> to vector<4x24x128xbf16>
    %129 = vector.shape_cast %128 : vector<4x24x128xbf16> to vector<96x128xbf16>
    %cst_148 = arith.constant dense<0.000000e+00> : vector<96x128xf32>
    %130 = tpu.matmul %129, %115, %cst_148 {dimension_numbers = #tpu.dot_dimension_numbers<[1], [0], [0], [1], [0, 0, 1, 1], [], []>} : vector<96x128xbf16>, vector<128x128xbf16>, vector<96x128xf32> -> vector<96x128xf32>
    %c0_149 = arith.constant 0 : index
    %c4_150 = arith.constant 4 : index
    %c0_151 = arith.constant 0 : index
    %c0_152 = arith.constant 0 : index
    %131 = vector.load %arg8[%c0_149, %c4_150, %c0_151, %c0_152] : memref<3x8x24x128xf32, #tpu.memory_space<vmem>>, vector<1x4x24x128xf32>
    %132 = vector.shape_cast %131 : vector<1x4x24x128xf32> to vector<4x24x128xf32>
    %133 = vector.shape_cast %130 : vector<96x128xf32> to vector<4x24x128xf32>
    %134 = arith.addf %132, %133 : vector<4x24x128xf32>
    %c0_153 = arith.constant 0 : index
    %c4_154 = arith.constant 4 : index
    %c0_155 = arith.constant 0 : index
    %c0_156 = arith.constant 0 : index
    %135 = vector.load %arg8[%c0_153, %c4_154, %c0_155, %c0_156] : memref<3x8x24x128xf32, #tpu.memory_space<vmem>>, vector<1x4x24x128xf32>
    %136 = vector.shape_cast %135 : vector<1x4x24x128xf32> to vector<4x24x128xf32>
    %137 = vector.shape_cast %134 : vector<4x24x128xf32> to vector<1x4x24x128xf32>
    tpu.vector_store %arg8[%c0_153, %c4_154, %c0_155, %c0_156], %137 {strides = array<i32>} : memref<3x8x24x128xf32, #tpu.memory_space<vmem>>, vector<1x4x24x128xf32>,
    %c7 = arith.constant 7 : index
    %c0_157 = arith.constant 0 : index
    %c0_158 = arith.constant 0 : index
    %138 = vector.load %arg5[%c7, %c0_157, %c0_158] : memref<9x128x128xbf16, #tpu.memory_space<vmem>>, vector<1x128x128xbf16>
    %139 = vector.shape_cast %138 : vector<1x128x128xbf16> to vector<128x128xbf16>
    %c0_159 = arith.constant 0 : index
    %c4_160 = arith.constant 4 : index
    %c0_161 = arith.constant 0 : index
    %c0_162 = arith.constant 0 : index
    %140 = vector.load %arg3[%c0_159, %c4_160, %c0_161, %c0_162] : memref<1x8x24x128xbf16, #tpu.memory_space<vmem>>, vector<1x4x24x128xbf16>
    %141 = vector.shape_cast %140 : vector<1x4x24x128xbf16> to vector<4x24x128xbf16>
    %142 = vector.shape_cast %141 : vector<4x24x128xbf16> to vector<96x128xbf16>
    %cst_163 = arith.constant dense<0.000000e+00> : vector<96x128xf32>
    %143 = tpu.matmul %142, %139, %cst_163 {dimension_numbers = #tpu.dot_dimension_numbers<[1], [0], [0], [1], [0, 0, 1, 1], [], []>} : vector<96x128xbf16>, vector<128x128xbf16>, vector<96x128xf32> -> vector<96x128xf32>
    %c1_164 = arith.constant 1 : index
    %c0_165 = arith.constant 0 : index
    %c0_166 = arith.constant 0 : index
    %c0_167 = arith.constant 0 : index
    %144 = vector.load %arg8[%c1_164, %c0_165, %c0_166, %c0_167] : memref<3x8x24x128xf32, #tpu.memory_space<vmem>>, vector<1x4x24x128xf32>
    %145 = vector.shape_cast %144 : vector<1x4x24x128xf32> to vector<4x24x128xf32>
    %146 = vector.shape_cast %143 : vector<96x128xf32> to vector<4x24x128xf32>
    %147 = arith.addf %145, %146 : vector<4x24x128xf32>
    %c1_168 = arith.constant 1 : index
    %c0_169 = arith.constant 0 : index
    %c0_170 = arith.constant 0 : index
    %c0_171 = arith.constant 0 : index
    %148 = vector.load %arg8[%c1_168, %c0_169, %c0_170, %c0_171] : memref<3x8x24x128xf32, #tpu.memory_space<vmem>>, vector<1x4x24x128xf32>
    %149 = vector.shape_cast %148 : vector<1x4x24x128xf32> to vector<4x24x128xf32>
    %150 = vector.shape_cast %147 : vector<4x24x128xf32> to vector<1x4x24x128xf32>
    tpu.vector_store %arg8[%c1_168, %c0_169, %c0_170, %c0_171], %150 {strides = array<i32>} : memref<3x8x24x128xf32, #tpu.memory_space<vmem>>, vector<1x4x24x128xf32>,
    %c0_172 = arith.constant 0 : index
    %c0_173 = arith.constant 0 : index
    %c0_174 = arith.constant 0 : index
    %c0_175 = arith.constant 0 : index
    %151 = vector.load %arg4[%c0_172, %c0_173, %c0_174, %c0_175] : memref<1x4x24x128xbf16, #tpu.memory_space<vmem>>, vector<1x4x24x128xbf16>
    %152 = vector.shape_cast %151 : vector<1x4x24x128xbf16> to vector<4x24x128xbf16>
    %153 = vector.shape_cast %152 : vector<4x24x128xbf16> to vector<96x128xbf16>
    %cst_176 = arith.constant dense<0.000000e+00> : vector<96x128xf32>
    %154 = tpu.matmul %153, %139, %cst_176 {dimension_numbers = #tpu.dot_dimension_numbers<[1], [0], [0], [1], [0, 0, 1, 1], [], []>} : vector<96x128xbf16>, vector<128x128xbf16>, vector<96x128xf32> -> vector<96x128xf32>
    %c1_177 = arith.constant 1 : index
    %c4_178 = arith.constant 4 : index
    %c0_179 = arith.constant 0 : index
    %c0_180 = arith.constant 0 : index
    %155 = vector.load %arg8[%c1_177, %c4_178, %c0_179, %c0_180] : memref<3x8x24x128xf32, #tpu.memory_space<vmem>>, vector<1x4x24x128xf32>
    %156 = vector.shape_cast %155 : vector<1x4x24x128xf32> to vector<4x24x128xf32>
    %157 = vector.shape_cast %154 : vector<96x128xf32> to vector<4x24x128xf32>
    %158 = arith.addf %156, %157 : vector<4x24x128xf32>
    %c1_181 = arith.constant 1 : index
    %c4_182 = arith.constant 4 : index
    %c0_183 = arith.constant 0 : index
    %c0_184 = arith.constant 0 : index
    %159 = vector.load %arg8[%c1_181, %c4_182, %c0_183, %c0_184] : memref<3x8x24x128xf32, #tpu.memory_space<vmem>>, vector<1x4x24x128xf32>
    %160 = vector.shape_cast %159 : vector<1x4x24x128xf32> to vector<4x24x128xf32>
    %161 = vector.shape_cast %158 : vector<4x24x128xf32> to vector<1x4x24x128xf32>
    tpu.vector_store %arg8[%c1_181, %c4_182, %c0_183, %c0_184], %161 {strides = array<i32>} : memref<3x8x24x128xf32, #tpu.memory_space<vmem>>, vector<1x4x24x128xf32>,
    %c8 = arith.constant 8 : index
    %c0_185 = arith.constant 0 : index
    %c0_186 = arith.constant 0 : index
    %162 = vector.load %arg5[%c8, %c0_185, %c0_186] : memref<9x128x128xbf16, #tpu.memory_space<vmem>>, vector<1x128x128xbf16>
    %163 = vector.shape_cast %162 : vector<1x128x128xbf16> to vector<128x128xbf16>
    %c0_187 = arith.constant 0 : index
    %c4_188 = arith.constant 4 : index
    %c0_189 = arith.constant 0 : index
    %c0_190 = arith.constant 0 : index
    %164 = vector.load %arg3[%c0_187, %c4_188, %c0_189, %c0_190] : memref<1x8x24x128xbf16, #tpu.memory_space<vmem>>, vector<1x4x24x128xbf16>
    %165 = vector.shape_cast %164 : vector<1x4x24x128xbf16> to vector<4x24x128xbf16>
    %166 = vector.shape_cast %165 : vector<4x24x128xbf16> to vector<96x128xbf16>
    %cst_191 = arith.constant dense<0.000000e+00> : vector<96x128xf32>
    %167 = tpu.matmul %166, %163, %cst_191 {dimension_numbers = #tpu.dot_dimension_numbers<[1], [0], [0], [1], [0, 0, 1, 1], [], []>} : vector<96x128xbf16>, vector<128x128xbf16>, vector<96x128xf32> -> vector<96x128xf32>
    %c2_192 = arith.constant 2 : index
    %c0_193 = arith.constant 0 : index
    %c0_194 = arith.constant 0 : index
    %c0_195 = arith.constant 0 : index
    %168 = vector.load %arg8[%c2_192, %c0_193, %c0_194, %c0_195] : memref<3x8x24x128xf32, #tpu.memory_space<vmem>>, vector<1x4x24x128xf32>
    %169 = vector.shape_cast %168 : vector<1x4x24x128xf32> to vector<4x24x128xf32>
    %170 = vector.shape_cast %167 : vector<96x128xf32> to vector<4x24x128xf32>
    %171 = arith.addf %169, %170 : vector<4x24x128xf32>
    %c2_196 = arith.constant 2 : index
    %c0_197 = arith.constant 0 : index
    %c0_198 = arith.constant 0 : index
    %c0_199 = arith.constant 0 : index
    %172 = vector.load %arg8[%c2_196, %c0_197, %c0_198, %c0_199] : memref<3x8x24x128xf32, #tpu.memory_space<vmem>>, vector<1x4x24x128xf32>
    %173 = vector.shape_cast %172 : vector<1x4x24x128xf32> to vector<4x24x128xf32>
    %174 = vector.shape_cast %171 : vector<4x24x128xf32> to vector<1x4x24x128xf32>
    tpu.vector_store %arg8[%c2_196, %c0_197, %c0_198, %c0_199], %174 {strides = array<i32>} : memref<3x8x24x128xf32, #tpu.memory_space<vmem>>, vector<1x4x24x128xf32>,
    %c0_200 = arith.constant 0 : index
    %c0_201 = arith.constant 0 : index
    %c0_202 = arith.constant 0 : index
    %c0_203 = arith.constant 0 : index
    %175 = vector.load %arg4[%c0_200, %c0_201, %c0_202, %c0_203] : memref<1x4x24x128xbf16, #tpu.memory_space<vmem>>, vector<1x4x24x128xbf16>
    %176 = vector.shape_cast %175 : vector<1x4x24x128xbf16> to vector<4x24x128xbf16>
    %177 = vector.shape_cast %176 : vector<4x24x128xbf16> to vector<96x128xbf16>
    %cst_204 = arith.constant dense<0.000000e+00> : vector<96x128xf32>
    %178 = tpu.matmul %177, %163, %cst_204 {dimension_numbers = #tpu.dot_dimension_numbers<[1], [0], [0], [1], [0, 0, 1, 1], [], []>} : vector<96x128xbf16>, vector<128x128xbf16>, vector<96x128xf32> -> vector<96x128xf32>
    %c2_205 = arith.constant 2 : index
    %c4_206 = arith.constant 4 : index
    %c0_207 = arith.constant 0 : index
    %c0_208 = arith.constant 0 : index
    %179 = vector.load %arg8[%c2_205, %c4_206, %c0_207, %c0_208] : memref<3x8x24x128xf32, #tpu.memory_space<vmem>>, vector<1x4x24x128xf32>
    %180 = vector.shape_cast %179 : vector<1x4x24x128xf32> to vector<4x24x128xf32>
    %181 = vector.shape_cast %178 : vector<96x128xf32> to vector<4x24x128xf32>
    %182 = arith.addf %180, %181 : vector<4x24x128xf32>
    %c2_209 = arith.constant 2 : index
    %c4_210 = arith.constant 4 : index
    %c0_211 = arith.constant 0 : index
    %c0_212 = arith.constant 0 : index
    %183 = vector.load %arg8[%c2_209, %c4_210, %c0_211, %c0_212] : memref<3x8x24x128xf32, #tpu.memory_space<vmem>>, vector<1x4x24x128xf32>
    %184 = vector.shape_cast %183 : vector<1x4x24x128xf32> to vector<4x24x128xf32>
    %185 = vector.shape_cast %182 : vector<4x24x128xf32> to vector<1x4x24x128xf32>
    tpu.vector_store %arg8[%c2_209, %c4_210, %c0_211, %c0_212], %185 {strides = array<i32>} : memref<3x8x24x128xf32, #tpu.memory_space<vmem>>, vector<1x4x24x128xf32>,
    %c0_i32_213 = arith.constant 0 : i32
    %186 = arith.cmpi eq, %arg2, %c0_i32_213 : i32
    %187 = arith.extui %186 : i1 to i32
    %c0_i32_214 = arith.constant 0 : i32
    %188 = arith.cmpi ne, %187, %c0_i32_214 : i32
    scf.if %188 {
      %c0_215 = arith.constant 0 : index
      %c0_216 = arith.constant 0 : index
      %c0_217 = arith.constant 0 : index
      %c0_218 = arith.constant 0 : index
      %189 = vector.load %arg8[%c0_215, %c0_216, %c0_217, %c0_218] : memref<3x8x24x128xf32, #tpu.memory_space<vmem>>, vector<1x8x16x128xf32>
      %190 = vector.shape_cast %189 : vector<1x8x16x128xf32> to vector<8x16x128xf32>
      %c1_219 = arith.constant 1 : index
      %c0_220 = arith.constant 0 : index
      %c2_221 = arith.constant 2 : index
      %c0_222 = arith.constant 0 : index
      %191 = vector.load %arg8[%c1_219, %c0_220, %c2_221, %c0_222] : memref<3x8x24x128xf32, #tpu.memory_space<vmem>>, vector<1x8x16x128xf32>
      %192 = vector.shape_cast %191 : vector<1x8x16x128xf32> to vector<8x16x128xf32>
      %193 = arith.addf %190, %192 : vector<8x16x128xf32>
      %c2_223 = arith.constant 2 : index
      %c0_224 = arith.constant 0 : index
      %c4_225 = arith.constant 4 : index
      %c0_226 = arith.constant 0 : index
      %194 = vector.load %arg8[%c2_223, %c0_224, %c4_225, %c0_226] : memref<3x8x24x128xf32, #tpu.memory_space<vmem>>, vector<1x8x16x128xf32>
      %195 = vector.shape_cast %194 : vector<1x8x16x128xf32> to vector<8x16x128xf32>
      %196 = arith.addf %193, %195 : vector<8x16x128xf32>
      %cst_227 = arith.constant 0.000000e+00 : f32
      %197 = vector.broadcast %cst_227 : f32 to vector<8x16x128xf32>
      %198 = arith.maximumf %196, %197 : vector<8x16x128xf32>
      %199 = arith.truncf %198 : vector<8x16x128xf32> to vector<8x16x128xbf16>
      %c0_228 = arith.constant 0 : index
      %c0_229 = arith.constant 0 : index
      %c0_230 = arith.constant 0 : index
      %c0_231 = arith.constant 0 : index
      %200 = vector.load %arg7[%c0_228, %c0_229, %c0_230, %c0_231] : memref<1x8x16x128xbf16, #tpu.memory_space<vmem>>, vector<1x8x16x128xbf16>
      %201 = vector.shape_cast %200 : vector<1x8x16x128xbf16> to vector<8x16x128xbf16>
      %202 = vector.shape_cast %199 : vector<8x16x128xbf16> to vector<1x8x16x128xbf16>
      tpu.vector_store %arg7[%c0_228, %c0_229, %c0_230, %c0_231], %202 {strides = array<i32>} : memref<1x8x16x128xbf16, #tpu.memory_space<vmem>>, vector<1x8x16x128xbf16>,
    } else {
    }
    return
  }
  func.func @transform_0(%arg0: i32, %arg1: i32, %arg2: i32) -> (i32, i32, i32, i32) {
    %c0_i32 = arith.constant 0 : i32
    %c0_i32_0 = arith.constant 0 : i32
    return %arg1, %arg0, %c0_i32, %arg2 : i32, i32, i32, i32
  }
  func.func @transform_1(%arg0: i32, %arg1: i32, %arg2: i32) -> (i32, i32, i32, i32) {
    %c1_i32 = arith.constant 1 : i32
    %0 = arith.addi %arg0, %c1_i32 : i32
    %c2_i32 = arith.constant 2 : i32
    %1 = arith.muli %0, %c2_i32 : i32
    %c0_i32 = arith.constant 0 : i32
    %c0_i32_0 = arith.constant 0 : i32
    return %arg1, %1, %c0_i32, %arg2 : i32, i32, i32, i32
  }
  func.func @transform_2(%arg0: i32, %arg1: i32, %arg2: i32) -> (i32, i32, i32) {
    %c0_i32 = arith.constant 0 : i32
    %c0_i32_0 = arith.constant 0 : i32
    %c0_i32_1 = arith.constant 0 : i32
    return %c0_i32, %arg2, %c0_i32_0 : i32, i32, i32
  }
  func.func @transform_3(%arg0: i32, %arg1: i32, %arg2: i32) -> (i32, i32) {
    %c0_i32 = arith.constant 0 : i32
    %c0_i32_0 = arith.constant 0 : i32
    %c0_i32_1 = arith.constant 0 : i32
    return %c0_i32, %c0_i32_0 : i32, i32
  }
  func.func @transform_4(%arg0: i32, %arg1: i32, %arg2: i32) -> (i32, i32, i32, i32) {
    %c0_i32 = arith.constant 0 : i32
    %c0_i32_0 = arith.constant 0 : i32
    %c0_i32_1 = arith.constant 0 : i32
    return %arg1, %arg0, %c0_i32, %c0_i32_0 : i32, i32, i32, i32
  }
}

</mosaic_0001>

<bundles_post_ra>
// kernel: tpu_custom_call.1
= control target key start
LH: loop header
LB: loop body
LE: loop exit
PB: predicated region body
PF: predicated region fallthrough
CT: control target
= control target key end

     0   :  { %s6953_s0 = inlined_call_operand.hbm [shape: bf16[2,20,24,128], index: 0, kind: input, shape index: {}]   ;;  %s6954_s1 = inlined_call_operand.hbm [shape: bf16[2,20,24,128], index: 1, kind: input, shape index: {}]   ;;  %s6955_s2 = inlined_call_operand.hbm [shape: bf16[9,128,128], index: 2, kind: input, shape index: {}]   ;;  %s6956_s3 = inlined_call_operand.vmem [shape: f32[1,128], index: 3, kind: input, shape index: {}]   ;;  %s6957_s4 = inlined_call_operand.hbm [shape: bf16[2,16,16,128], index: 4, kind: output, shape index: {}]  }
   0x1   :  { %6973 = sst [smem:[#allocation41_spill]] %s6955_s2 }
   0x2   :  { %6974 = sst [smem:[#allocation42_spill]] %s6957_s4 }
   0x3   :  { %9 = vsyncpa [#allocation4], 0 }
   0x4   :  { %11 = vsyncpa [#allocation4 + $0x1], 0 }
   0x5   :  { %12 = vsyncpa [#allocation7], 0 }
   0x6   :  { %14 = vsyncpa [#allocation7 + $0x1], 0 }
   0x7   :  { %15 = vsyncpa [#allocation5], 0 }
   0x8   :  { %17 = vsyncpa [#allocation5 + $0x1], 0  ;;  %s5920_s15 = smov 0   ;;  %s5922_s16 = smov 0  }
   0x9   :  { %s5924_s17 = smov 0   ;;  %s5926_s18 = smov 0  }
   0xa   :  { %s5928_s19 = smov 0   ;;  %s5930_s20 = smov 0  }
   0xb   :  { %s5932_s21 = smov 0   ;;  %s5934_s22 = smov 0  }
   0xc   :  { %s5936_s23 = smov 0   ;;  %s5938_s24 = smov 0  }
   0xd   :  { %s5940_s25 = smov 0  }
   0xe LB: > { %6975 = sst [smem:[#allocation14_spill]] %s5851_s18  ;;  %s5976_s26 = sadd.s32 4294967295, %s5879_s25   ;;  %s5879_s25 = sphi %s5940_s25, %s23_s25   ;;  %s5875_s24 = sphi %s5938_s24, %s7058_s24   ;;  %s5871_s23 = sphi %s5936_s23, %s7057_s23   ;;  %s5867_s22 = sphi %s5934_s22, %s7056_s22   ;;  %s5863_s21 = sphi %s5932_s21, %s7055_s21   ;;  %s5859_s20 = sphi %s5930_s20, %s7047_s20   ;;  %s5855_s19 = sphi %s5928_s19, %s7054_s19   ;;  %s5851_s18 = sphi %s5926_s18, %s7053_s18   ;;  %s5847_s17 = sphi %s5924_s17, %s7052_s17   ;;  %s5843_s16 = sphi %s5922_s16, %s7051_s16   ;;  %s5839_s15 = sphi %s5920_s15, %s7050_s15  }
   0xf   : > { %6976 = sst [smem:[#allocation15_spill]] %s5859_s20  ;;  %s38_s28 = sadd.s32 1, %s5871_s23 }
  0x10   : > { %6977 = sst [smem:[#allocation16_spill]] %s5863_s21  ;;  %s42_s29 = sadd.s32 1, %s5875_s24 }
  0x11   : > { %6978 = sst [smem:[#allocation17_spill]] %s5867_s22  ;;  %p40_p0 = scmp.ge.s32.totalorder %s38_s28, 2 }
  0x12   : > { %s53_s30 = sadd.s32 1, %s5859_s20  ;;  %p60_p1 = scmp.ne.s32.totalorder %s5859_s20, %s5855_s19 }
  0x13   : > { %p61_p2 = scmp.eq.s32.totalorder %s5879_s25, 0  ;;  %s7060_s28 = smov (%p40_p0, %s38_s28), 0 }
  0x14   : > { %6979 = sst [smem:[#allocation18_spill]] %s7060_s28  ;;  %s7062_s29 = smov (!%p40_p0, %s42_s29), %s5875_s24 }
  0x15   : > { %s46_s5 = ssub.s32 %s5871_s23, %s7060_s28  ;;  %p5995_p3 = por %p61_p2, %p60_p1 }
  0x16   : > { %p44_p4 = scmp.ge.s32.totalorder %s7062_s29, 2  ;;  %p6960_p5 = scmp.ne.s32.totalorder %s5855_s19, %s5851_s18 }
  0x17   : > { %s6980_s6 = scalar_select %p5995_p3, 1, 0 }
  0x18   : > { %p6964_p6 = scmp.eq.s32.totalorder %s5976_s26, 0  ;;  %s4533_s7 = sshll.u32 %s5875_s24, 1 }
  0x19   : > { %s7064_s29 = smov (%p44_p4, %s7062_s29), 0  ;;  %s4534_s9 = sadd.s32 2, %s4533_s7 }
  0x1a   : > { %6981 = sst [smem:[#allocation19_spill]] %s7064_s29  ;;  %p6010_p7 = por %p6964_p6, %p6960_p5 }
  0x1b   : > { %s47_s10 = ssub.s32 %s5875_s24, %s7064_s29  ;;  %s4535_s11 = sshll.u32 %s7064_s29, 1 }
  0x1c   : > { %s6982_s8 = scalar_select %p6010_p7, 1, 0 }
  0x1d   : > { %s48_s12 = sor.u32 %s47_s10, %s46_s5  ;;  %s4536_s13 = sadd.s32 2, %s4535_s11 }
  0x1e   : > { %p51_p8 = scmp.eq.s32.totalorder %s48_s12, 0  ;;  %s81_s14 = ssub.s32 %s4534_s9, %s4536_s13 }
  0x1f   : > { %s82_s27 = sor.u32 %s81_s14, %s46_s5  ;;  %s87_s28 = sadd.s32 1, %s5847_s17 }
  0x20   : > { %s6019_s4 = scalar_select %p51_p8, %s5859_s20, %s53_s30  }
  0x21   : > { %p85_p9 = scmp.eq.s32.totalorder %s82_s27, 0  ;;  %p94_p10 = scmp.ne.s32.totalorder %s5847_s17, %s5843_s16 }
  0x22   : > { %6983 = sst [smem:[#allocation20_spill]] %s6019_s4  ;;  %p100_p11 = scmp.ne.s32.totalorder %s5843_s16, %s5839_s15 }
  0x23   : > { %p173_p12 = scmp.eq.s32.totalorder %s5976_s26, 3  ;;  %p6031_p13 = por %p94_p10, %p61_p2 }
  0x24   : > { %s6027_s7 = scalar_select %p85_p9, %s5847_s17, %s87_s28  }
  0x25   : > { %s6985_s10 = scalar_select %p6031_p13, 1, 0 }
  0x26   : > { %6984 = sst [smem:[#allocation21_spill]] %s6027_s7  ;;  %p6037_p0 = por %p100_p11, %p6964_p6 }
  0x27   : > { %p6044_p4 = por %p173_p12, %p60_p1  ;;  %s6989_s27 = sadd.s32 4294967294, %s5879_s25  }
  0x28   : > { %s6986_s11 = scalar_select %p6037_p0, 1, 0 }
  0x29   : > { %s6987_s30 = scalar_select %p6044_p4, 1, 0 }
  0x2a   : > { %p179_p8 = scmp.eq.s32.totalorder %s6989_s27, 3  ;;  %p4224_p5 = scmp.ge.s32.totalorder %s5879_s25, 1 }
  0x2b   : > { %6988 = sst [smem:[#allocation22_spill]] %s6987_s30  ;;  %p186_p9 = scmp.lt.s32.totalorder %s5879_s25, 5 }
  0x2c   : > { %p6990_p7 = scmp.ne.s32.totalorder %s5855_s19, %s5851_s18  ;;  %s5881_s5 = smov [#allocation8]  }
  0x2d   : > { %p6059_p2 = pnand %p4224_p5, %p186_p9  ;;  %s201_s9 = sshll.u32 %s5881_s5, 4  ;;  %s202_s9 = int_to_ptr.vmem [resolvable:$true] %s201_s9 }
  0x2e   : > { %p6055_p3 = por %p179_p8, %p6990_p7  ;;  %s6995_s2 = sld [smem:[#allocation41_spill]] }
  0x2f   : > { %s6993_s28 = scalar_select %p6059_p2, 1, 0 }
  0x30   : > { %s6991_s15 = scalar_select %p6055_p3, 1, 0 }
  0x31   : > { %p5372_p1 = pneg %p6059_p2 }
  0x32   : > { %6992 = sst [smem:[#allocation23_spill]] %s6991_s15 }
  0x33   : > { %p6067_p10 = pnand %p5372_p1, %p6964_p6 }
  0x34   : > { %s5662_s27 = scalar_lea.hbm %s6995_s2, 9216 }
  0x35   : > { %p5663_p5 = scmp.ne.s32.totalorder %s6995_s2, %s5662_s27  ;;  %p5664_p7 = pneg %p6067_p10 }
  0x36   : > { %p5669_p8 = scmp.lt.u32.totalorder %s5662_s27, %s6995_s2 }
  0x37   : > { %p5665_p11 = pnand %p5664_p7, %p5663_p5 }
  0x39   : > { %p5666_p12 = pneg %p5665_p11 }
  0x3b   : > { %p5671_p9 = pnand %p5669_p8, %p5666_p12 }
  0x3d   : > { %5674 = shalt.err (!%p5671_p9)
}
  0x3e   : > { %s5675_s15 = scalar_lea.vmem %s202_s9, 9216  ;;  %p5683_p4 = scmp.lt.s32.totalorder %s202_s9, %s202_s9 }
  0x3f   : > { %p5676_p1 = scmp.ne.s32.totalorder %s202_s9, %s5675_s15  ;;  %p5684_p0 = scmp.lt.s32.totalorder %s5675_s15, %s5675_s15 }
  0x41   : > { %p5678_p6 = pnand %p5676_p1, %p5664_p7  ;;  %p5685_p2 = por %p5684_p0, %p5683_p4 }
  0x43   : > { %p5679_p3 = pneg %p5678_p6 }
  0x45   : > { %p5686_p13 = pnand %p5685_p2, %p5679_p3 }
  0x47   : > { %5689 = shalt.err (!%p5686_p13)
}
  0x48   : > { %s5882_s4 = smov 64   ;;  %s5883_s29 = smov 4  }
  0x49   : > { %5375 = dma.hbm_to_vmem [thread:$0]  (!%p6067_p10), %s6995_s2, 9216, %s202_s9, [#allocation7], %s5882_s4, %s5882_s4, %s5883_s29  }
  0x4a   : > { %p4226_p5 = scmp.ge.s32.totalorder %s5879_s25, 4 }
  0x4b   : > { %p6996_p11 = scmp.ne.s32.totalorder (!%p4226_p5), %s6980_s6, 0 }
  0x4c   : > { %214 = sbr.rel (%p4226_p5) target bundleno = 144 (0x90), region = 24 }
  0x53   : > { %217 = sbr.rel (!%p6996_p11) target bundleno = 113 (0x71), region = 28  ;;  %s218_s7 = sand.u32 (%p6996_p11), 1, %s5859_s20  }
  0x54   : > { %s5357_s15 = smul.u32 (%p6996_p11), 96, %s218_s7  ;;  %s6091_s27 = scalar_lea.sflag (%p6996_p11), [#allocation4], %s218_s7 }
  0x55   : > { %s5358_s18 = smul.u32 (%p6996_p11), 24, %s5875_s24  ;;  %s5694_s20 = scalar_lea.hbm (%p6996_p11), %s6953_s0, 7680 }
  0x56   : > { %s222_s5 = scalar_lea.vmem (%p6996_p11), [#allocation3], %s5357_s15  ;;  %s5359_s12 = smul.u32 (%p6996_p11), 60, %s5871_s23 }
  0x57   : > { %s241_s30 = sshll.u32 (%p6996_p11), %s222_s5, 4  ;;  %s6095_s30 = int_to_ptr.vmem [resolvable:$true] %s241_s30 }
  0x58   : > { %s236_s9 = sadd.s32 (%p6996_p11), %s5359_s12, %s5358_s18 }
  0x59   : > { %s4232_s4 = sshll.u32 (%p6996_p11), %s236_s9, 6 }
  0x5a   : > { %s238_s6 = scalar_lea.hbm %s6953_s0, %s4232_s4 }
  0x5b   : > { %s5690_s14 = scalar_lea.hbm %s238_s6, 1536  ;;  %p5695_p6 = scmp.lt.u32.totalorder %s238_s6, %s6953_s0 }
  0x5c   : > { %p5691_p3 = scmp.ne.s32.totalorder %s238_s6, %s5690_s14  ;;  %p5696_p13 = scmp.lt.u32.totalorder %s5694_s20, %s5690_s14 }
  0x5d   : > { %p5698_p4 = scmp.lt.u32.totalorder %s5690_s14, %s238_s6 }
  0x5e   : > { %p5697_p0 = por %p5696_p13, %p5695_p6 }
  0x60   : > { %p5699_p2 = por %p5698_p4, %p5697_p0 }
  0x62   : > { %p5700_p10 = pnand %p5699_p2, %p5691_p3 }
  0x64   : > { %5703 = shalt.err (!%p5700_p10)
}
  0x65   : > { %s5704_s18 = scalar_lea.vmem %s6095_s30, 1536  ;;  %s5884_s15 = smov [#allocation3]  }
  0x66   : > { %p5705_p7 = scmp.ne.s32.totalorder %s6095_s30, %s5704_s18  ;;  %s5708_s5 = sshll.u32 %s5884_s15, 4  ;;  %s5709_s5 = int_to_ptr.vmem [resolvable:$false] %s5708_s5 }
  0x67   : > { %s5710_s2 = scalar_lea.vmem %s5709_s5, 3072  ;;  %p5711_p12 = scmp.lt.s32.totalorder %s6095_s30, %s5709_s5 }
  0x68   : > { %p5712_p8 = scmp.lt.s32.totalorder %s5710_s2, %s5704_s18 }
  0x6a   : > { %p5713_p9 = por %p5712_p8, %p5711_p12 }
  0x6c   : > { %p5714_p1 = pnand %p5713_p9, %p5705_p7 }
  0x6e   : > { %5717 = shalt.err (!%p5714_p1)
}
  0x6f   : > { %s5885_s20 = smov 64   ;;  %s5886_s21 = smov 4  }
  0x70   : > { %247 = dma.hbm_to_vmem [thread:$0]  %s238_s6, 1536, %s6095_s30, %s6091_s27, %s5885_s20, %s5885_s20, %s5886_s21  }
  0x71 PF: > { %s251_s22 = sand.u32 1, %s5879_s25   ;;  %s253_s12 = sand.u32 1, %s5847_s17  }
  0x72   : > { %s5360_s9 = smul.u32 48, %s253_s12  ;;  %s6122_s6 = scalar_lea.sflag [#allocation7], %s251_s22 }
  0x73   : > { %s4131_s4 = smul.u32 24, %s5875_s24  ;;  %p6997_p11 = scmp.ne.s32.totalorder %s6985_s10, 0 }
  0x74   : > { %s4133_s29 = smul.u32 60, %s5871_s23  ;;  %s255_s13 = scalar_lea.vmem [#allocation6], %s5360_s9 }
  0x75   : > { %s268_s14 = sshll.u32 %s255_s13, 4  ;;  %s5722_s12 = scalar_lea.hbm %s6954_s1, 7680  ;;  %s6115_s14 = int_to_ptr.vmem [resolvable:$true] %s268_s14 }
  0x76   : > { %s4134_s7 = sadd.s32 %s4133_s29, %s4131_s4 }
  0x77   : > { %s4235_s18 = sshll.u32 %s4134_s7, 6 }
  0x78   : > { %s4136_s30 = scalar_lea.hbm %s6954_s1, %s4235_s18 }
  0x79   : > { %s6120_s27 = scalar_lea.hbm %s4136_s30, 1536  ;;  %s5746_s2 = scalar_lea.hbm %s4136_s30, 2304 }
  0x7a   : > { %p5719_p5 = scmp.ne.s32.totalorder %s6120_s27, %s5746_s2  ;;  %p5723_p13 = scmp.lt.u32.totalorder %s6120_s27, %s6954_s1 }
  0x7b   : > { %p5724_p0 = scmp.lt.u32.totalorder %s5722_s12, %s5746_s2  ;;  %p5726_p2 = scmp.lt.u32.totalorder %s5746_s2, %s6120_s27 }
  0x7c   : > { %p5720_p3 = pnand %p5719_p5, %p6997_p11 }
  0x7d   : > { %p5725_p4 = por %p5724_p0, %p5723_p13 }
  0x7e   : > { %p5721_p6 = pneg %p5720_p3 }
  0x7f   : > { %p5727_p10 = por %p5726_p2, %p5725_p4 }
  0x81   : > { %p5728_p7 = pnand %p5727_p10, %p5721_p6 }
  0x83   : > { %5731 = shalt.err (!%p5728_p7)
}
  0x84   : > { %s5732_s22 = scalar_lea.vmem %s6115_s14, 768  ;;  %s5887_s29 = smov [#allocation6]  }
  0x85   : > { %p5733_p12 = scmp.ne.s32.totalorder %s6115_s14, %s5732_s22  ;;  %s5736_s13 = sshll.u32 %s5887_s29, 4  ;;  %s5737_s13 = int_to_ptr.vmem [resolvable:$false] %s5736_s13 }
  0x86   : > { %s5738_s7 = scalar_lea.vmem %s5737_s13, 1536  ;;  %p5739_p1 = scmp.lt.s32.totalorder %s6115_s14, %s5737_s13 }
  0x87   : > { %p5734_p8 = pnand %p5733_p12, %p6997_p11  ;;  %p5740_p5 = scmp.lt.s32.totalorder %s5738_s7, %s5732_s22 }
  0x89   : > { %p5735_p9 = pneg %p5734_p8  ;;  %p5741_p3 = por %p5740_p5, %p5739_p1 }
  0x8b   : > { %p5742_p13 = pnand %p5741_p3, %p5735_p9 }
  0x8d   : > { %5745 = shalt.err (!%p5742_p13)
}
  0x8e   : > { %s5888_s18 = smov 64   ;;  %s5889_s15 = smov 4  }
  0x8f   : > { %5365 = dma.hbm_to_vmem [thread:$0]  (%p6997_p11), %s6120_s27, 768, %s6115_s14, %s6122_s6, %s5888_s18, %s5888_s18, %s5889_s15  }
  0x90 PF: > { %p6998_p6 = scmp.ne.s32.totalorder %s6993_s28, 0 }
  0x92   : > { %280 = sbr.rel (%p6998_p6) target bundleno = 757 (0x2f5), region = 36 }
  0x99   : > { %s6148_s5 = sand.u32 1, %s5855_s19   ;;  %p6999_p0 = scmp.ne.s32.totalorder %s6982_s8, 0 }
  0x9a   : > { %s5361_s30 = smul.u32 96, %s6148_s5  ;;  %s283_s2 = scalar_lea.sflag [#allocation4], %s6148_s5 }
  0x9c   : > { %s6152_s20 = scalar_lea.vmem [#allocation3], %s5361_s30 }
  0x9d   : > { %5820 = dma.done.wait (%p6999_p0), %s283_s2, 1536  }
  0x9e   : > { %5822 = vsyncadd (%p6999_p0), %s283_s2, 4294965760  ;;  %s291_s10 = sand.u32 1, %s5976_s26   ;;  %s293_s28 = sand.u32 1, %s5843_s16  }
  0x9f   : > { %s5362_s14 = smul.u32 48, %s293_s28  ;;  %s292_s27 = scalar_lea.sflag [#allocation7], %s291_s10 }
  0xa0   : > { %p7000_p11 = scmp.ne.s32.totalorder %s6986_s11, 0 }
  0xa1   : > { %s6160_s6 = scalar_lea.vmem [#allocation6], %s5362_s14 }
  0xa2   : > { %5824 = dma.done.wait (%p7000_p11), %s292_s27, 768  }
  0xa3   : > { %5826 = vsyncadd (%p7000_p11), %s292_s27, 4294966528  ;;  %p7001_p4 = scmp.eq.s32.totalorder %s5976_s26, 0 }
  0xa5   : > { %5828 = dma.done.wait (%p7001_p4), [#allocation7], 9216   ;;  %p7002_p2 = pmov %p7001_p4 }
  0xa6   : > { %v5482_v0 = vld [vmem:[#allocation8] sm:$0xff]   ;;  %v5484_v2 = vld [vmem:[#allocation8 + $0x8] sm:$0xff]   ;;  %v5486_v4 = vld [vmem:[#allocation8 + $0x10] sm:$0xff]   ;;  %v5890_v24 = vmov 0.0   ;;  %vm5891_vm0 = vmmov 0   ;;  %s4238_s11 = sshll.u32 %s6148_s5, 6 }
  0xa7   : > { %5830 = vsyncadd (%p7002_p2), [#allocation7], 4294958080  ;;  %v5483_v1 = vld [vmem:[#allocation8 + $0x40] sm:$0xff]   ;;  %4829 = vmatprep.subr.bf16.mxu0 %v5482_v0  ;;  %v5485_v3 = vld [vmem:[#allocation8 + $0x48] sm:$0xff]   ;;  %s6857_s21 = scalar_lea.vmem [#allocation9], %s4238_s11  ;;  %s7033_s12 = sld [smem:[#allocation17_spill]] }
  0xa8   : > { %4869 = vmatprep.subr.bf16.mxu1 %v5483_v1  ;;  %4830 = vmatpush3.bf16.msra.mxu0 %v5482_v0  ;;  %v5487_v5 = vld [vmem:[#allocation8 + $0x50] sm:$0xff]   ;;  %v5488_v6 = vld [vmem:[#allocation8 + $0x18] sm:$0xff]   ;;  %v5490_v8 = vld [vmem:[#allocation8 + $0x20] sm:$0xff]   ;;  %s7034_s9 = sld [smem:[#allocation16_spill]]  ;;  %s7039_s13 = sld [smem:[#allocation22_spill]] }
  0xa9   : > { %4870 = vmatpush3.bf16.msra.mxu1 %v5483_v1  ;;  %4831 = vmatprep.subr.bf16.mxu0 %v5484_v2  ;;  %v5489_v7 = vld [vmem:[#allocation8 + $0x58] sm:$0xff]   ;;  %v5491_v9 = vld [vmem:[#allocation8 + $0x60] sm:$0xff]   ;;  %v5492_v10 = vld [vmem:[#allocation8 + $0x28] sm:$0xff]   ;;  %s4087_s18 = sshll.u32 %s6857_s21, 4  ;;  %s7040_s2 = sld [smem:[#allocation42_spill]]  ;;  %s6888_s18 = int_to_ptr.vmem [resolvable:$true] %s4087_s18 }
  0xaa   : > { %4871 = vmatprep.subr.bf16.mxu1 %v5485_v3  ;;  %v5493_v11 = vld [vmem:[#allocation8 + $0x68] sm:$0xff]   ;;  %v5498_v12 = vld [vmem:[%s6152_s20] sm:$0xff]   ;;  %v5494_v14 = vld [vmem:[#allocation8 + $0x30] sm:$0xff]   ;;  %s4071_s10 = scalar_lea.sflag [#allocation5], %s6148_s5  ;;  %s5747_s28 = scalar_lea.vmem %s6888_s18, 1024 }
  0xab   : > { %v5499_v13 = vld [vmem:[%s6152_s20] sm:$0xff]   ;;  %4845 = vmatprep.mubr.bf16.mxu0 %v5498_v12  ;;  %v5495_v15 = vld [vmem:[#allocation8 + $0x70] sm:$0xff]   ;;  %v5496_v16 = vld [vmem:[#allocation8 + $0x38] sm:$0xff]   ;;  %p5748_p10 = scmp.ne.s32.totalorder %s6888_s18, %s5747_s28  ;;  %s5892_s14 = smov [#allocation9]  }
  0xac   : > { %4832 = vmatpush3.bf16.msra.mxu0 %v5484_v2  ;;  %4885 = vmatprep.mubr.bf16.mxu1 %v5499_v13  ;;  %v5497_v17 = vld [vmem:[#allocation8 + $0x78] sm:$0xff]   ;;  %v5500_v18 = vld [vmem:[%s6152_s20 + $0x8] sm:$0xff]   ;;  %v5502_v19 = vld [vmem:[#allocation8 + $0x80] sm:$0xff]   ;;  %s5751_s27 = sshll.u32 %s5892_s14, 4  ;;  %s5752_s27 = int_to_ptr.vmem [resolvable:$false] %s5751_s27 }
  0xad   : > { %4872 = vmatpush3.bf16.msra.mxu1 %v5485_v3  ;;  %4833 = vmatprep.subr.bf16.mxu0 %v5486_v4  ;;  %v5501_v20 = vld [vmem:[%s6152_s20 + $0x8] sm:$0xff]   ;;  %v5504_v22 = vld [vmem:[%s6152_s20 + $0x10] sm:$0xff]   ;;  %v6177_v25 = vld [vmem:[#allocation8 + $0xc0] sm:$0xff]   ;;  %s4553_s4 = sshll.u32 %s7033_s12, 4  ;;  %p5754_p9 = scmp.lt.s32.totalorder %s6888_s18, %s5752_s27 }
  0xae   : > { %4873 = vmatprep.subr.bf16.mxu1 %v5487_v5  ;;  %v5503_v21 = vld [vmem:[#allocation8 + $0x88] sm:$0xff]   ;;  %v5505_v23 = vld [vmem:[%s6152_s20 + $0x10] sm:$0xff]   ;;  %v5506_v26 = vld [vmem:[%s6152_s20 + $0x18] sm:$0xff]   ;;  %s4529_s22 = sshll.u32 %s7034_s9, 5  ;;  %p7041_p7 = scmp.ne.s32.totalorder %s7039_s13, 0 }
  0xaf   : > { %v5509_v27 = vld [vmem:[#allocation8 + $0x90] sm:$0xff]   ;;  %v5507_v28 = vld [vmem:[%s6152_s20 + $0x18] sm:$0xff]   ;;  %v6182_v29 = vld [vmem:[#allocation8 + $0xc8] sm:$0xff]   ;;  %s4084_s29 = sadd.s32 %s4553_s4, %s4529_s22 }
  0xb0   : > { %4834 = vmatpush3.bf16.msra.mxu0 %v5486_v4  ;;  %v5511_v30 = vld [vmem:[%s6152_s20 + $0x20] sm:$0xff]   ;;  %v5515_v32 = vld [vmem:[#allocation8 + $0x98] sm:$0xff]   ;;  %v6188_v33 = vld [vmem:[#allocation8 + $0xd0] sm:$0xff]   ;;  %s4530_s7 = sshll.u32 %s4084_s29, 6  ;;  %p5749_p12 = pnand %p5748_p10, %p7041_p7 }
  0xb1   : > { %4874 = vmatpush3.bf16.msra.mxu1 %v5487_v5  ;;  %4835 = vmatprep.subr.bf16.mxu0 %v5488_v6  ;;  %v5512_v31 = vld [vmem:[%s6152_s20 + $0x20] sm:$0xff]   ;;  %v5513_v34 = vld [vmem:[%s6152_s20 + $0x28] sm:$0xff]   ;;  %v6194_v37 = vld [vmem:[#allocation8 + $0xd8] sm:$0xff]  }
  0xb2   : > { %4875 = vmatprep.subr.bf16.mxu1 %v5489_v7  ;;  %v5521_v35 = vld [vmem:[#allocation8 + $0xa0] sm:$0xff]   ;;  %v5514_v36 = vld [vmem:[%s6152_s20 + $0x28] sm:$0xff]   ;;  %v5517_v38 = vld [vmem:[%s6152_s20 + $0x30] sm:$0xff]   ;;  %p5750_p8 = pneg %p5749_p12 }
  0xb3   : > { %v5518_v39 = vld [vmem:[%s6152_s20 + $0x30] sm:$0xff]   ;;  %v5523_v40 = vld [vmem:[#allocation8 + $0xa8] sm:$0xff]   ;;  %v6200_v41 = vld [vmem:[#allocation8 + $0xe0] sm:$0xff]  }
  0xb4   : > { %4836 = vmatpush3.bf16.msra.mxu0 %v5488_v6  ;;  %v5519_v42 = vld [vmem:[%s6152_s20 + $0x38] sm:$0xff]   ;;  %v5529_v43 = vld [vmem:[#allocation8 + $0xb0] sm:$0xff]   ;;  %v6206_v45 = vld [vmem:[#allocation8 + $0xe8] sm:$0xff]  }
  0xb5   : > { %4876 = vmatpush3.bf16.msra.mxu1 %v5489_v7  ;;  %4837 = vmatprep.subr.bf16.mxu0 %v5490_v8  ;;  %v5520_v44 = vld [vmem:[%s6152_s20 + $0x38] sm:$0xff]   ;;  %v5524_v46 = vld [vmem:[%s6152_s20 + $0x40] sm:$0xff]   ;;  %v6211_v48 = vld [vmem:[#allocation8 + $0xf0] sm:$0xff]  }
  0xb6   : > { %4877 = vmatprep.subr.bf16.mxu1 %v5491_v9  ;;  %v5525_v47 = vld [vmem:[%s6152_s20 + $0x40] sm:$0xff]   ;;  %v5536_v49 = vld [vmem:[#allocation8 + $0xb8] sm:$0xff]   ;;  %v5526_v50 = vld [vmem:[%s6152_s20 + $0x48] sm:$0xff]  }
  0xb7   : > { %v6217_v51 = vld [vmem:[#allocation8 + $0xf8] sm:$0xff]   ;;  %v5527_v52 = vld [vmem:[%s6152_s20 + $0x48] sm:$0xff]   ;;  %v5531_v53 = vld [vmem:[%s6152_s20 + $0x50] sm:$0xff]  }
  0xb8   : > { %4838 = vmatpush3.bf16.msra.mxu0 %v5490_v8  ;;  %v5532_v54 = vld [vmem:[%s6152_s20 + $0x50] sm:$0xff]   ;;  %v5533_v55 = vld [vmem:[%s6152_s20 + $0x58] sm:$0xff]   ;;  %v5538_v57 = vld [vmem:[%s6152_s20] sm:$0xff]  }
  0xb9   : > { %4878 = vmatpush3.bf16.msra.mxu1 %v5491_v9  ;;  %4839 = vmatprep.subr.bf16.mxu0 %v5492_v10  ;;  %v5534_v56 = vld [vmem:[%s6152_s20 + $0x58] sm:$0xff]   ;;  %v5539_v58 = vld [vmem:[%s6152_s20 + $0x8] sm:$0xff]   ;;  %v5541_v60 = vld [vmem:[%s6152_s20 + $0x10] sm:$0xff]  }
  0xba   : > { %4879 = vmatprep.subr.bf16.mxu1 %v5493_v11  ;;  %v5540_v59 = vld [vmem:[%s6152_s20 + $0x18] sm:$0xff]   ;;  %v6234_v61 = vld [vmem:[#allocation8 + $0x100] sm:$0xff]   ;;  %v6241_v62 = vld [vmem:[#allocation8 + $0x108] sm:$0xff]  }
  0xbb   : > { %v5542_v63 = vld [vmem:[%s6152_s20 + $0x18] sm:$0xff]   ;;  %v5543_v0 = vld [vmem:[%s6152_s20 + $0x20] sm:$0xff]   ;;  %v6250_v2 = vld [vmem:[#allocation8 + $0x110] sm:$0xff]  }
  0xbc   : > { %4840 = vmatpush3.bf16.msra.mxu0 %v5492_v10  ;;  %v5545_v1 = vld [vmem:[%s6152_s20 + $0x20] sm:$0xff]   ;;  %v5546_v3 = vld [vmem:[%s6152_s20 + $0x28] sm:$0xff]   ;;  %v6259_v4 = vld [vmem:[#allocation8 + $0x118] sm:$0xff]  }
  0xbd   : > { %4880 = vmatpush3.bf16.msra.mxu1 %v5493_v11  ;;  %4841 = vmatprep.subr.bf16.mxu0 %v5494_v14  ;;  %v5547_v5 = vld [vmem:[%s6152_s20 + $0x28] sm:$0xff]   ;;  %v5549_v6 = vld [vmem:[%s6152_s20 + $0x30] sm:$0xff]   ;;  %v6267_v7 = vld [vmem:[#allocation8 + $0x120] sm:$0xff]  }
  0xbe   : > { %4881 = vmatprep.subr.bf16.mxu1 %v5495_v15  ;;  %v5550_v8 = vld [vmem:[%s6152_s20 + $0x38] sm:$0xff]   ;;  %v6276_v9 = vld [vmem:[#allocation8 + $0x128] sm:$0xff]   ;;  %v5551_v10 = vld [vmem:[%s6152_s20 + $0x30] sm:$0xff]  }
  0xbf   : > { %v5553_v11 = vld [vmem:[%s6152_s20 + $0x40] sm:$0xff]   ;;  %v5566_v12 = vld [vmem:[#allocation8 + $0x130] sm:$0xff]   ;;  %v5554_v13 = vld [vmem:[%s6152_s20 + $0x48] sm:$0xff]  }
  0xc0   : > { %4842 = vmatpush3.bf16.msra.mxu0 %v5494_v14  ;;  %v5569_v14 = vld [vmem:[#allocation8 + $0x138] sm:$0xff]  }
  0xc1   : > { %4882 = vmatpush3.bf16.msra.mxu1 %v5495_v15  ;;  %4843 = vmatprep.subr.bf16.mxu0 %v5496_v16  ;;  %v5555_v15 = vld [vmem:[%s6152_s20 + $0x38] sm:$0xff]  }
  0xc2   : > { %4883 = vmatprep.subr.bf16.mxu1 %v5497_v17 }
  0xc4   : > { %4844 = vmatpush3.bf16.msra.mxu0 %v5496_v16  ;;  %v5557_v16 = vld [vmem:[%s6152_s20 + $0x50] sm:$0xff]  }
  0xc5   : > { %4884 = vmatpush3.bf16.msra.mxu1 %v5497_v17  ;;  %4909 = vmatprep.subr.bf16.mxu0 %v5502_v19  ;;  %v5558_v17 = vld [vmem:[%s6152_s20 + $0x58] sm:$0xff]  }
  0xc6   : > { %4949 = vmatprep.subr.bf16.mxu1 %v5890_v24 }
  0xc7   : > { %4846 = vmatmul.mubr.bf16.vlgmr.msra.gmra.mrb[0].mxu0 %v5500_v18  ;;  %v5559_v18 = vld [vmem:[%s6152_s20 + $0x40] sm:$0xff]  }
  0xc8   : > { %4886 = vmatmul.mubr.bf16.vlgmr.msra.gmra.mrb[0].mxu1 %v5501_v20  ;;  %4910 = vmatpush3.bf16.msra.mxu0 %v5502_v19  ;;  %v5562_v19 = vld [vmem:[%s6160_s6] sm:$0xff]   ;;  %v5561_v20 = vld [vmem:[%s6152_s20 + $0x48] sm:$0xff]  }
  0xc9   : > { %4911 = vmatprep.subr.bf16.mxu0 %v5503_v21  ;;  %4849 = vmatprep.mubr.bf16.mxu0 %v5504_v22  ;;  %v5565_v22 = vld [vmem:[%s6160_s6 + $0x8] sm:$0xff]  }
  0xca   : > { %4889 = vmatprep.mubr.bf16.mxu1 %v5505_v23  ;;  %4950 = vmatpush3.bf16.msra.mxu1 %v6177_v25  ;;  %v5567_v23 = vld [vmem:[%s6152_s20 + $0x58] sm:$0xff]  }
  0xcb   : > { %4951 = vmatprep.subr.bf16.mxu1 %v5890_v24 }
  0xcc   : > { %4912 = vmatpush3.bf16.msra.mxu0 %v5503_v21  ;;  %v5564_v21 = vld [vmem:[%s6152_s20 + $0x50] sm:$0xff]  }
  0xcd   : > { %4913 = vmatprep.subr.bf16.mxu0 %v5509_v27 }
  0xce   : > { %4952 = vmatpush3.bf16.msra.mxu1 %v6182_v29 }
  0xcf   : > { %4850 = vmatmul.mubr.bf16.gmra.mrb[4].mxu0 %v5506_v26  ;;  %4953 = vmatprep.subr.bf16.mxu1 %v5890_v24  ;;  %v5570_v26 = vld [vmem:[%s6152_s20 + $0x18] sm:$0xff]  }
  0xd0   : > { %4890 = vmatmul.mubr.bf16.gmra.mrb[4].mxu1 %v5507_v28  ;;  %4914 = vmatpush3.bf16.msra.mxu0 %v5509_v27  ;;  %v5573_v27 = vld [vmem:[#allocation8 + $0x140] sm:$0xff]  }
  0xd1   : > { %4853 = vmatprep.mubr.bf16.mxu0 %v5511_v30  ;;  %4893 = vmatprep.mubr.bf16.mxu1 %v5512_v31  ;;  %v5571_v28 = vld [vmem:[%s6160_s6] sm:$0xff]   ;;  %v5574_v30 = vld [vmem:[#allocation8 + $0x148] sm:$0xff]  }
  0xd2   : > { %4915 = vmatprep.subr.bf16.mxu0 %v5515_v32  ;;  %4954 = vmatpush3.bf16.msra.mxu1 %v6188_v33  ;;  %v5577_v31 = vld [vmem:[#allocation8 + $0x150] sm:$0xff]  }
  0xd3   : > { %4955 = vmatprep.subr.bf16.mxu1 %v5890_v24 }
  0xd4   : > { %4916 = vmatpush3.bf16.msra.mxu0 %v5515_v32  ;;  %v5575_v32 = vld [vmem:[%s6160_s6 + $0x8] sm:$0xff]  }
  0xd5   : > { %4917 = vmatprep.subr.bf16.mxu0 %v5521_v35 }
  0xd6   : > { %4956 = vmatpush3.bf16.msra.mxu1 %v6194_v37 }
  0xd7   : > { %4854 = vmatmul.mubr.bf16.gmra.mrb[8].mxu0 %v5513_v34  ;;  %4957 = vmatprep.subr.bf16.mxu1 %v5890_v24  ;;  %v5578_v34 = vld [vmem:[#allocation8 + $0x158] sm:$0xff]  }
  0xd8   : > { %4894 = vmatmul.mubr.bf16.gmra.mrb[8].mxu1 %v5514_v36  ;;  %4857 = vmatprep.mubr.bf16.mxu0 %v5517_v38  ;;  %v5579_v36 = vld [vmem:[%s6160_s6 + $0x10] sm:$0xff]   ;;  %v5582_v38 = vld [vmem:[#allocation8 + $0x168] sm:$0xff]  }
  0xd9   : > { %4897 = vmatprep.mubr.bf16.mxu1 %v5518_v39  ;;  %4918 = vmatpush3.bf16.msra.mxu0 %v5521_v35  ;;  %v5581_v35 = vld [vmem:[#allocation8 + $0x160] sm:$0xff]   ;;  %v5584_v39 = vld [vmem:[#allocation8 + $0x170] sm:$0xff]  }
  0xda   : > { %4919 = vmatprep.subr.bf16.mxu0 %v5523_v40  ;;  %4958 = vmatpush3.bf16.msra.mxu1 %v6200_v41 }
  0xdb   : > { %4959 = vmatprep.subr.bf16.mxu1 %v5890_v24 }
  0xdd   : > { %4920 = vmatpush3.bf16.msra.mxu0 %v5523_v40  ;;  %v6368_v40 = vld [vmem:[#allocation8 + $0x180] sm:$0xff]  }
  0xde   : > { %4921 = vmatprep.subr.bf16.mxu0 %v5529_v43  ;;  %4960 = vmatpush3.bf16.msra.mxu1 %v6206_v45 }
  0xdf   : > { %4858 = vmatmul.mubr.bf16.gmra.mrb[12].mxu0 %v5519_v42  ;;  %4961 = vmatprep.subr.bf16.mxu1 %v5890_v24  ;;  %v5585_v42 = vld [vmem:[#allocation8 + $0x178] sm:$0xff]  }
  0xe0   : > { %4898 = vmatmul.mubr.bf16.gmra.mrb[12].mxu1 %v5520_v44  ;;  %4861 = vmatprep.mubr.bf16.mxu0 %v5524_v46  ;;  %v5588_v44 = vld [vmem:[%s6152_s20 + $0x40] sm:$0xff]  }
  0xe1   : > { %4901 = vmatprep.mubr.bf16.mxu1 %v5525_v47  ;;  %4922 = vmatpush3.bf16.msra.mxu0 %v5529_v43  ;;  %v5586_v43 = vld [vmem:[%s6152_s20 + $0x18] sm:$0xff]   ;;  %v5589_v46 = vld [vmem:[%s6152_s20 + $0x20] sm:$0xff]   ;;  %v5594_v47 = vld [vmem:[#allocation8 + $0x190] sm:$0xff]  }
  0xe2   : > { %4962 = vmatpush3.bf16.msra.mxu1 %v6211_v48  ;;  %4923 = vmatprep.subr.bf16.mxu0 %v5536_v49 }
  0xe3   : > { %4963 = vmatprep.subr.bf16.mxu1 %v5890_v24 }
  0xe5   : > { %4924 = vmatpush3.bf16.msra.mxu0 %v5536_v49  ;;  %v5597_v49 = vld [vmem:[#allocation8 + $0x198] sm:$0xff]  }
  0xe6   : > { %4964 = vmatpush3.bf16.msra.mxu1 %v6217_v51  ;;  %5001 = vmatprep.subr.bf16.mxu0 %v5890_v24 }
  0xe7   : > { %4862 = vmatmul.mubr.bf16.gmra.mrb[16].mxu0 %v5526_v50  ;;  %5029 = vmatprep.subr.bf16.mxu1 %v5890_v24  ;;  %v5592_v50 = vld [vmem:[%s6152_s20 + $0x28] sm:$0xff]  }
  0xe8   : > { %4902 = vmatmul.mubr.bf16.gmra.mrb[16].mxu1 %v5527_v52  ;;  %4865 = vmatprep.mubr.bf16.mxu0 %v5531_v53  ;;  %v5600_v52 = vld [vmem:[#allocation8 + $0x1a0] sm:$0xff]   ;;  %v5603_v53 = vld [vmem:[#allocation8 + $0x1a8] sm:$0xff]  }
  0xe9   : > { %4905 = vmatprep.mubr.bf16.mxu1 %v5532_v54  ;;  %v5595_v54 = vld [vmem:[%s6152_s20 + $0x30] sm:$0xff]  }
  0xef   : > { %4866 = vmatmul.mubr.bf16.gmra.mrb[20].mxu0 %v5533_v55  ;;  %v5596_v55 = vld [vmem:[%s6152_s20 + $0x58] sm:$0xff]  }
  0xf0   : > { %4906 = vmatmul.mubr.bf16.gmra.mrb[20].mxu1 %v5534_v56  ;;  %4925 = vmatprep.mubr.bf16.mxu0 %v5538_v57  ;;  %v5606_v56 = vld [vmem:[#allocation8 + $0x1b0] sm:$0xff]   ;;  %v6401_v57 = vld [vmem:[#allocation8 + $0x1b8] sm:$0xff]  }
  0xf1   : > { %4965 = vmatprep.mubr.msk.bf16.mxu1 %vm5891_vm0, %v5890_v24 }
  0xf7   : > { %4926 = vmatmul.mubr.bf16.vlgmr.msra.gmra.mrb[24].mxu0 %v5539_v58  ;;  %v5598_v58 = vld [vmem:[%s6152_s20 + $0x38] sm:$0xff]  }
  0xf8   : > { %4966 = vmatmul.mubr.bf16.vlgmr.msra.gmra.mrb[24].mxu1 %v5540_v59  ;;  %5002 = vmatpush3.bf16.msra.mxu0 %v6177_v25  ;;  %v5568_v25 = vld [vmem:[%s6160_s6 + $0x10] sm:$0xff]   ;;  %v5599_v59 = vld [vmem:[%s6160_s6] sm:$0xff]  }
  0xf9   : > { %5003 = vmatprep.subr.bf16.mxu0 %v5890_v24  ;;  %4929 = vmatprep.mubr.bf16.mxu0 %v5541_v60  ;;  %v6408_v60 = vld [vmem:[#allocation8 + $0x1c0] sm:$0xff]  }
  0xfa   : > { %4969 = vmatprep.mubr.msk.bf16.mxu1 %vm5891_vm0, %v5890_v24  ;;  %5030 = vmatpush3.bf16.msra.mxu1 %v6234_v61 }
  0xfb   : > { %5031 = vmatprep.subr.bf16.mxu1 %v5890_v24 }
  0xfc   : > { %5004 = vmatpush3.bf16.msra.mxu0 %v6182_v29  ;;  %v5572_v29 = vld [vmem:[%s6152_s20 + $0x20] sm:$0xff]  }
  0xfd   : > { %5005 = vmatprep.subr.bf16.mxu0 %v5890_v24 }
  0xfe   : > { %5032 = vmatpush3.bf16.msra.mxu1 %v6241_v62 }
  0xff   : > { %4930 = vmatmul.mubr.bf16.gmra.mrb[28].mxu0 %v5542_v63  ;;  %5033 = vmatprep.subr.bf16.mxu1 %v5890_v24  ;;  %v5604_v63 = vld [vmem:[%s6152_s20 + $0x48] sm:$0xff]  }
 0x100   : > { %4970 = vmatmul.mubr.bf16.gmra.mrb[28].mxu1 %v5543_v0  ;;  %5006 = vmatpush3.bf16.msra.mxu0 %v6188_v33  ;;  %v5576_v33 = vld [vmem:[%s6152_s20 + $0x28] sm:$0xff]   ;;  %v5605_v0 = vld [vmem:[%s6160_s6 + $0x10] sm:$0xff]  }
 0x101   : > { %4933 = vmatprep.mubr.bf16.mxu0 %v5545_v1  ;;  %4973 = vmatprep.mubr.msk.bf16.mxu1 %vm5891_vm0, %v5890_v24  ;;  %v5609_v1 = vld [vmem:[%s6152_s20 + $0x30] sm:$0xff]  }
 0x102   : > { %5007 = vmatprep.subr.bf16.mxu0 %v5890_v24  ;;  %5034 = vmatpush3.bf16.msra.mxu1 %v6250_v2 }
 0x103   : > { %5035 = vmatprep.subr.bf16.mxu1 %v5890_v24 }
 0x104   : > { %5008 = vmatpush3.bf16.msra.mxu0 %v6194_v37  ;;  %v5580_v37 = vld [vmem:[%s6152_s20 + $0x30] sm:$0xff]  }
 0x105   : > { %5009 = vmatprep.subr.bf16.mxu0 %v5890_v24 }
 0x106   : > { %5036 = vmatpush3.bf16.msra.mxu1 %v6259_v4 }
 0x107   : > { %4934 = vmatmul.mubr.bf16.gmra.mrb[32].mxu0 %v5546_v3  ;;  %5037 = vmatprep.subr.bf16.mxu1 %v5890_v24 }
 0x108   : > { %4974 = vmatmul.mubr.bf16.gmra.mrb[32].mxu1 %v5547_v5  ;;  %4937 = vmatprep.mubr.bf16.mxu0 %v5549_v6 }
 0x109   : > { %4977 = vmatprep.mubr.msk.bf16.mxu1 %vm5891_vm0, %v5890_v24  ;;  %5010 = vmatpush3.bf16.msra.mxu0 %v6200_v41  ;;  %v5583_v41 = vld [vmem:[%s6152_s20 + $0x38] sm:$0xff]  }
 0x10a   : > { %5011 = vmatprep.subr.bf16.mxu0 %v5890_v24  ;;  %5038 = vmatpush3.bf16.msra.mxu1 %v6267_v7 }
 0x10b   : > { %5039 = vmatprep.subr.bf16.mxu1 %v5890_v24 }
 0x10d   : > { %5012 = vmatpush3.bf16.msra.mxu0 %v6206_v45  ;;  %v5591_v45 = vld [vmem:[#allocation8 + $0x188] sm:$0xff]  }
 0x10e   : > { %5013 = vmatprep.subr.bf16.mxu0 %v5890_v24  ;;  %5040 = vmatpush3.bf16.msra.mxu1 %v6276_v9 }
 0x10f   : > { %4938 = vmatmul.mubr.bf16.gmra.mrb[36].mxu0 %v5550_v8  ;;  %5041 = vmatprep.subr.bf16.mxu1 %v5890_v24 }
 0x110   : > { %4978 = vmatmul.mubr.bf16.gmra.mrb[36].mxu1 %v5551_v10  ;;  %4941 = vmatprep.mubr.bf16.mxu0 %v5553_v11  ;;  %v6442_v11 = vld [vmem:[%s6956_s3] ss:$0 sm:$0xff] }
 0x111   : > { %4981 = vmatprep.mubr.msk.bf16.mxu1 %vm5891_vm0, %v5890_v24  ;;  %5014 = vmatpush3.bf16.msra.mxu0 %v6211_v48  ;;  %v5590_v48 = vld [vmem:[%s6152_s20 + $0x48] sm:$0xff]  }
 0x112   : > { %5015 = vmatprep.subr.bf16.mxu0 %v5890_v24  ;;  %5042 = vmatpush3.bf16.msra.mxu1 %v5566_v12 }
 0x113   : > { %5043 = vmatprep.subr.bf16.mxu1 %v5890_v24 }
 0x115   : > { %5016 = vmatpush3.bf16.msra.mxu0 %v6217_v51  ;;  %v5593_v51 = vld [vmem:[%s6152_s20 + $0x50] sm:$0xff]  }
 0x116   : > { %5081 = vmatprep.subr.bf16.mxu0 %v5890_v24  ;;  %5044 = vmatpush3.bf16.msra.mxu1 %v5569_v14 }
 0x117   : > { %4942 = vmatmul.mubr.bf16.gmra.mrb[40].mxu0 %v5554_v13  ;;  %5161 = vmatprep.subr.bf16.mxu1 %v5890_v24 }
 0x118   : > { %4982 = vmatmul.mubr.bf16.gmra.mrb[40].mxu1 %v5555_v15  ;;  %4945 = vmatprep.mubr.bf16.mxu0 %v5557_v16  ;;  %v5610_v15 = vld [vmem:[%s6152_s20 + $0x58] sm:$0xff]  }
 0x119   : > { %4985 = vmatprep.mubr.msk.bf16.mxu1 %vm5891_vm0, %v5890_v24 }
 0x11f   : > { %4946 = vmatmul.mubr.bf16.gmra.mrb[44].mxu0 %v5558_v17 }
 0x120   : > { %4986 = vmatmul.mubr.bf16.gmra.mrb[44].mxu1 %v5559_v18  ;;  %5017 = vmatprep.mubr.msk.bf16.mxu0 %vm5891_vm0, %v5890_v24  ;;  %v5611_v18 = vld [vmem:[%s6152_s20 + $0x38] sm:$0xff]  }
 0x121   : > { %4989 = vmatprep.mubr.msk.bf16.mxu1 %vm5891_vm0, %v5890_v24 }
 0x127   : > { %5018 = vmatmul.mubr.bf16.vlgmr.msra.gmra.mrb[48].mxu0 %v5562_v19 }
 0x128   : > { %4990 = vmatmul.mubr.bf16.gmra.mrb[48].mxu1 %v5561_v20  ;;  %5082 = vmatpush3.bf16.msra.mxu0 %v6234_v61  ;;  %v5601_v61 = vld [vmem:[%s6152_s20 + $0x40] sm:$0xff]  }
 0x129   : > { %5083 = vmatprep.subr.bf16.mxu0 %v5890_v24  ;;  %4993 = vmatprep.mubr.msk.bf16.mxu1 %vm5891_vm0, %v5890_v24  ;;  %v5615_v20 = vld [vmem:[%s6160_s6] sm:$0xff]  }
 0x12a   : > { %5021 = vmatprep.mubr.msk.bf16.mxu0 %vm5891_vm0, %v5890_v24 }
 0x12c   : > { %5084 = vmatpush3.bf16.msra.mxu0 %v6241_v62  ;;  %v5602_v62 = vld [vmem:[%s6160_s6 + $0x8] sm:$0xff]  }
 0x12d   : > { %5085 = vmatprep.subr.bf16.mxu0 %v5890_v24 }
 0x12f   : > { %5022 = vmatmul.mubr.bf16.gmra.mrb[52].mxu0 %v5565_v22 }
 0x130   : > { %4994 = vmatmul.mubr.bf16.gmra.mrb[52].mxu1 %v5564_v21  ;;  %5086 = vmatpush3.bf16.msra.mxu0 %v6250_v2 }
 0x131   : > { %5087 = vmatprep.subr.bf16.mxu0 %v5890_v24  ;;  %4997 = vmatprep.mubr.msk.bf16.mxu1 %vm5891_vm0, %v5890_v24 }
 0x132   : > { %5025 = vmatprep.mubr.msk.bf16.mxu0 %vm5891_vm0, %v5890_v24 }
 0x134   : > { %5088 = vmatpush3.bf16.msra.mxu0 %v6259_v4  ;;  %v5607_v4 = vld [vmem:[%s6152_s20 + $0x50] sm:$0xff]  }
 0x135   : > { %5089 = vmatprep.subr.bf16.mxu0 %v5890_v24 }
 0x137   : > { %5026 = vmatmul.mubr.bf16.gmra.mrb[56].mxu0 %v5568_v25  ;;  %v5614_v25 = vld [vmem:[%s6152_s20 + $0x40] sm:$0xff]  }
 0x138   : > { %4998 = vmatmul.mubr.bf16.gmra.mrb[56].mxu1 %v5567_v23  ;;  %5090 = vmatpush3.bf16.msra.mxu0 %v6267_v7 }
 0x139   : > { %5091 = vmatprep.subr.bf16.mxu0 %v5890_v24  ;;  %5045 = vmatprep.mubr.msk.bf16.mxu1 %vm5891_vm0, %v5890_v24 }
 0x13a   : > { %5097 = vmatprep.mubr.msk.bf16.mxu0 %vm5891_vm0, %v5890_v24 }
 0x13c   : > { %5092 = vmatpush3.bf16.msra.mxu0 %v6276_v9 }
 0x13d   : > { %5093 = vmatprep.subr.bf16.mxu0 %v5890_v24 }
 0x140   : > { %5046 = vmatmul.mubr.bf16.vlgmr.msra.gmra.mrb[60].mxu1 %v5570_v26  ;;  %5094 = vmatpush3.bf16.msra.mxu0 %v5566_v12 }
 0x141   : > { %5095 = vmatprep.subr.bf16.mxu0 %v5890_v24  ;;  %5049 = vmatprep.mubr.msk.bf16.mxu1 %vm5891_vm0, %v5890_v24 }
 0x142   : > { %5162 = vmatpush3.bf16.msra.mxu1 %v5573_v27 }
 0x143   : > { %5163 = vmatprep.subr.bf16.mxu1 %v5890_v24 }
 0x144   : > { %5096 = vmatpush3.bf16.msra.mxu0 %v5569_v14 }
 0x145   : > { %5109 = vmatprep.subr.bf16.mxu0 %v5890_v24 }
 0x146   : > { %5164 = vmatpush3.bf16.msra.mxu1 %v5574_v30 }
 0x147   : > { %5098 = vmatmul.mubr.bf16.vlgmr.msra.gmra.mrb[60].mxu0 %v5571_v28  ;;  %5165 = vmatprep.subr.bf16.mxu1 %v5890_v24 }
 0x148   : > { %5050 = vmatmul.mubr.bf16.gmra.mrb[64].mxu1 %v5572_v29  ;;  %5110 = vmatpush3.bf16.msra.mxu0 %v5573_v27  ;;  %v5613_v27 = vld [vmem:[#allocation8 + $0x1c8] sm:$0xff]   ;;  %v5618_v29 = vld [vmem:[#allocation8 + $0x1d0] sm:$0xff]  }
 0x149   : > { %5111 = vmatprep.subr.bf16.mxu0 %v5890_v24  ;;  %5101 = vmatprep.mubr.msk.bf16.mxu0 %vm5891_vm0, %v5890_v24 }
 0x14a   : > { %5053 = vmatprep.mubr.msk.bf16.mxu1 %vm5891_vm0, %v5890_v24  ;;  %5166 = vmatpush3.bf16.msra.mxu1 %v5577_v31 }
 0x14b   : > { %5167 = vmatprep.subr.bf16.mxu1 %v5890_v24 }
 0x14c   : > { %5112 = vmatpush3.bf16.msra.mxu0 %v5574_v30 }
 0x14d   : > { %5113 = vmatprep.subr.bf16.mxu0 %v5890_v24 }
 0x14e   : > { %5168 = vmatpush3.bf16.msra.mxu1 %v5578_v34 }
 0x14f   : > { %5102 = vmatmul.mubr.bf16.gmra.mrb[64].mxu0 %v5575_v32  ;;  %5169 = vmatprep.subr.bf16.mxu1 %v5890_v24  ;;  %v5617_v32 = vld [vmem:[%s6160_s6 + $0x8] sm:$0xff]  }
 0x150   : > { %5054 = vmatmul.mubr.bf16.gmra.mrb[68].mxu1 %v5576_v33  ;;  %5114 = vmatpush3.bf16.msra.mxu0 %v5577_v31 }
 0x151   : > { %5115 = vmatprep.subr.bf16.mxu0 %v5890_v24  ;;  %5105 = vmatprep.mubr.msk.bf16.mxu0 %vm5891_vm0, %v5890_v24 }
 0x152   : > { %5057 = vmatprep.mubr.msk.bf16.mxu1 %vm5891_vm0, %v5890_v24  ;;  %5170 = vmatpush3.bf16.msra.mxu1 %v5581_v35 }
 0x153   : > { %5171 = vmatprep.subr.bf16.mxu1 %v5890_v24 }
 0x154   : > { %5116 = vmatpush3.bf16.msra.mxu0 %v5578_v34 }
 0x155   : > { %5117 = vmatprep.subr.bf16.mxu0 %v5890_v24 }
 0x156   : > { %5172 = vmatpush3.bf16.msra.mxu1 %v5582_v38 }
 0x157   : > { %5106 = vmatmul.mubr.bf16.gmra.mrb[68].mxu0 %v5579_v36  ;;  %5173 = vmatprep.subr.bf16.mxu1 %v5890_v24 }
 0x158   : > { %5058 = vmatmul.mubr.bf16.gmra.mrb[72].mxu1 %v5580_v37  ;;  %5118 = vmatpush3.bf16.msra.mxu0 %v5581_v35  ;;  %v5616_v35 = vld [vmem:[%s6152_s20 + $0x48] sm:$0xff]  }
 0x159   : > { %5119 = vmatprep.subr.bf16.mxu0 %v5890_v24  ;;  %5061 = vmatprep.mubr.msk.bf16.mxu1 %vm5891_vm0, %v5890_v24 }
 0x15a   : > { %5125 = vmatprep.mubr.msk.bf16.mxu0 %vm5891_vm0, %v5890_v24  ;;  %5174 = vmatpush3.bf16.msra.mxu1 %v5584_v39 }
 0x15b   : > { %5175 = vmatprep.subr.bf16.mxu1 %v5890_v24 }
 0x15c   : > { %5120 = vmatpush3.bf16.msra.mxu0 %v5582_v38 }
 0x15d   : > { %5121 = vmatprep.subr.bf16.mxu0 %v5890_v24 }
 0x15e   : > { %5176 = vmatpush3.bf16.msra.mxu1 %v5585_v42 }
 0x15f   : > { %5189 = vmatprep.subr.bf16.mxu1 %v6368_v40 }
 0x160   : > { %5062 = vmatmul.mubr.bf16.gmra.mrb[76].mxu1 %v5583_v41  ;;  %5122 = vmatpush3.bf16.msra.mxu0 %v5584_v39  ;;  %v5619_v41 = vld [vmem:[#allocation8 + $0x1d8] sm:$0xff]  }
 0x161   : > { %5123 = vmatprep.subr.bf16.mxu0 %v5890_v24  ;;  %5065 = vmatprep.mubr.msk.bf16.mxu1 %vm5891_vm0, %v5890_v24 }
 0x164   : > { %5124 = vmatpush3.bf16.msra.mxu0 %v5585_v42  ;;  %v5620_v42 = vld [vmem:[%s6152_s20 + $0x50] sm:$0xff]  }
 0x165   : > { %5217 = vmatprep.subr.bf16.mxu0 %v6368_v40 }
 0x167   : > { %5126 = vmatmul.mubr.bf16.vlgmr.msra.gmra.mrb[72].mxu0 %v5586_v43  ;;  %v5621_v43 = vld [vmem:[%s6160_s6 + $0x10] sm:$0xff]  }
 0x168   : > { %5066 = vmatmul.mubr.bf16.gmra.mrb[80].mxu1 %v5588_v44  ;;  %5218 = vmatpush3.bf16.msra.mxu0 %v6368_v40 }
 0x169   : > { %5129 = vmatprep.mubr.msk.bf16.mxu0 %vm5891_vm0, %v5890_v24  ;;  %5069 = vmatprep.mubr.msk.bf16.mxu1 %vm5891_vm0, %v5890_v24 }
 0x16a   : > { %5219 = vmatprep.subr.bf16.mxu0 %v5591_v45 }
 0x16c   : > { %5220 = vmatpush3.bf16.msra.mxu0 %v5591_v45 }
 0x16d   : > { %5221 = vmatprep.subr.bf16.mxu0 %v5594_v47 }
 0x16f   : > { %5130 = vmatmul.mubr.bf16.gmra.mrb[76].mxu0 %v5589_v46 }
 0x170   : > { %5070 = vmatmul.mubr.bf16.gmra.mrb[84].mxu1 %v5590_v48  ;;  %5133 = vmatprep.mubr.msk.bf16.mxu0 %vm5891_vm0, %v5890_v24 }
 0x171   : > { %5073 = vmatprep.mubr.msk.bf16.mxu1 %vm5891_vm0, %v5890_v24  ;;  %5222 = vmatpush3.bf16.msra.mxu0 %v5594_v47 }
 0x172   : > { %5223 = vmatprep.subr.bf16.mxu0 %v5597_v49 }
 0x175   : > { %5224 = vmatpush3.bf16.msra.mxu0 %v5597_v49 }
 0x176   : > { %5225 = vmatprep.subr.bf16.mxu0 %v5600_v52 }
 0x177   : > { %5134 = vmatmul.mubr.bf16.gmra.mrb[80].mxu0 %v5592_v50 }
 0x178   : > { %5074 = vmatmul.mubr.bf16.gmra.mrb[88].mxu1 %v5593_v51  ;;  %5137 = vmatprep.mubr.msk.bf16.mxu0 %vm5891_vm0, %v5890_v24  ;;  %v5622_v51 = vld [vmem:[%s6152_s20 + $0x58] sm:$0xff]  }
 0x179   : > { %5077 = vmatprep.mubr.msk.bf16.mxu1 %vm5891_vm0, %v5890_v24  ;;  %5226 = vmatpush3.bf16.msra.mxu0 %v5600_v52 }
 0x17a   : > { %5227 = vmatprep.subr.bf16.mxu0 %v5603_v53 }
 0x17d   : > { %5228 = vmatpush3.bf16.msra.mxu0 %v5603_v53 }
 0x17e   : > { %5229 = vmatprep.subr.bf16.mxu0 %v5606_v56 }
 0x17f   : > { %5138 = vmatmul.mubr.bf16.gmra.mrb[84].mxu0 %v5595_v54 }
 0x180   : > { %5078 = vmatmul.mubr.bf16.gmra.mrb[92].mxu1 %v5596_v55  ;;  %5141 = vmatprep.mubr.msk.bf16.mxu0 %vm5891_vm0, %v5890_v24 }
 0x181   : > { %5177 = vmatprep.mubr.msk.bf16.mxu1 %vm5891_vm0, %v5890_v24  ;;  %5230 = vmatpush3.bf16.msra.mxu0 %v5606_v56 }
 0x182   : > { %5231 = vmatprep.subr.bf16.mxu0 %v6401_v57 }
 0x185   : > { %5232 = vmatpush3.bf16.msra.mxu0 %v6401_v57 }
 0x186   : > { %5273 = vmatprep.subr.bf16.mxu0 %v6408_v60 }
 0x187   : > { %5142 = vmatmul.mubr.bf16.gmra.mrb[88].mxu0 %v5598_v58  ;;  %v5625_v58 = vld [vmem:[#allocation8 + $0x1e8] sm:$0xff]  }
 0x188   : > { %5178 = vmatmul.mubr.bf16.vlgmr.msra.gmra.mrb[96].mxu1 %v5599_v59  ;;  %5145 = vmatprep.mubr.msk.bf16.mxu0 %vm5891_vm0, %v5890_v24  ;;  %v5626_v59 = vld [vmem:[%s6160_s6 + $0x20] sm:$0xff]  }
 0x189   : > { %5190 = vmatpush3.bf16.msra.mxu1 %v6368_v40  ;;  %5181 = vmatprep.mubr.msk.bf16.mxu1 %vm5891_vm0, %v5890_v24 }
 0x18a   : > { %5191 = vmatprep.subr.bf16.mxu1 %v5591_v45 }
 0x18d   : > { %5192 = vmatpush3.bf16.msra.mxu1 %v5591_v45  ;;  %v5624_v45 = vld [vmem:[#allocation8 + $0x1e0] sm:$0xff]  }
 0x18e   : > { %5193 = vmatprep.subr.bf16.mxu1 %v5594_v47 }
 0x18f   : > { %5146 = vmatmul.mubr.bf16.gmra.mrb[92].mxu0 %v5601_v61 }
 0x190   : > { %5182 = vmatmul.mubr.bf16.gmra.mrb[100].mxu1 %v5602_v62  ;;  %5149 = vmatprep.mubr.msk.bf16.mxu0 %vm5891_vm0, %v5890_v24  ;;  %v5628_v62 = vld [vmem:[#allocation8 + $0x1f0] sm:$0xff]  }
 0x191   : > { %5194 = vmatpush3.bf16.msra.mxu1 %v5594_v47  ;;  %5185 = vmatprep.mubr.msk.bf16.mxu1 %vm5891_vm0, %v5890_v24  ;;  %v5623_v47 = vld [vmem:[%s6160_s6 + $0x18] sm:$0xff]  }
 0x192   : > { %5195 = vmatprep.subr.bf16.mxu1 %v5597_v49 }
 0x195   : > { %5196 = vmatpush3.bf16.msra.mxu1 %v5597_v49 }
 0x196   : > { %5197 = vmatprep.subr.bf16.mxu1 %v5600_v52 }
 0x197   : > { %5150 = vmatmul.mubr.bf16.gmra.mrb[96].mxu0 %v5604_v63 }
 0x198   : > { %5186 = vmatmul.mubr.bf16.gmra.mrb[104].mxu1 %v5605_v0  ;;  %5153 = vmatprep.mubr.msk.bf16.mxu0 %vm5891_vm0, %v5890_v24 }
 0x199   : > { %5198 = vmatpush3.bf16.msra.mxu1 %v5600_v52  ;;  %5205 = vmatprep.mubr.bf16.mxu1 %v5609_v1  ;;  %v5627_v1 = vld [vmem:[%s6160_s6 + $0x28] sm:$0xff]  }
 0x19a   : > { %v6428_v2 = vpop.f32.mrb[0].mxu0  ;;  %5199 = vmatprep.subr.bf16.mxu1 %v5603_v53 }
 0x19b   : > { %v6430_v3 = vpop.f32.mrb[1].mxu0  ;;  %v4887_v5 = vpop.f32.mrb[0].mxu1 }
 0x19c   : > { %v6433_v6 = vpop.f32.mrb[2].mxu0  ;;  %v982_v7 = vpop.f32.mrb[1].mxu1  ;;  %1128 = vst [vmem:[#allocation2 + $0xd0] sm:$0xff] %v4887_v5 }
 0x19d   : > { %5200 = vmatpush3.bf16.msra.mxu1 %v5603_v53  ;;  %v6435_v8 = vpop.f32.mrb[3].mxu0  ;;  %v4888_v9 = vpop.f32.mrb[2].mxu1  ;;  %1126 = vst [vmem:[#allocation2 + $0xc0] sm:$0xff] %v982_v7 }
 0x19e   : > { %5201 = vmatprep.subr.bf16.mxu1 %v5606_v56  ;;  %v985_v10 = vpop.f32.mrb[3].mxu1  ;;  %1129 = vst [vmem:[#allocation2 + $0xd8] sm:$0xff] %v4888_v9 }
 0x19f   : > { %5154 = vmatmul.mubr.bf16.gmra.mrb[100].mxu0 %v5607_v4  ;;  %1127 = vst [vmem:[#allocation2 + $0xc8] sm:$0xff] %v985_v10  ;;  %v5634_v10 = vld [vmem:[%s6160_s6] sm:$0xff]  }
 0x1a0   : > { %5157 = vmatprep.mubr.msk.bf16.mxu0 %vm5891_vm0, %v5890_v24 }
 0x1a1   : > { %5202 = vmatpush3.bf16.msra.mxu1 %v5606_v56 }
 0x1a2   : > { %v4851_v12 = vpop.f32.mrb[4].mxu0  ;;  %5203 = vmatprep.subr.bf16.mxu1 %v6401_v57 }
 0x1a3   : > { %v6446_v13 = vadd.f32 %v4851_v12, %v6442_v11  ;;  %v636_v14 = vpop.f32.mrb[5].mxu0  ;;  %v4891_v16 = vpop.f32.mrb[4].mxu1 }
 0x1a4   : > { %v6450_v17 = vadd.f32 %v6442_v11, %v636_v14  ;;  %v4852_v24 = vpop.f32.mrb[6].mxu0  ;;  %v998_v19 = vpop.f32.mrb[5].mxu1  ;;  %1132 = vst [vmem:[#allocation2 + $0xf0] sm:$0xff] %v4891_v16 }
 0x1a5   : > { %5204 = vmatpush3.bf16.msra.mxu1 %v6401_v57  ;;  %v6456_v21 = vadd.f32 %v4852_v24, %v6442_v11  ;;  %v639_v22 = vpop.f32.mrb[7].mxu0  ;;  %v4892_v23 = vpop.f32.mrb[6].mxu1  ;;  %1130 = vst [vmem:[#allocation2 + $0xe0] sm:$0xff] %v998_v19  ;;  %v5629_v24 = vld [vmem:[#allocation8 + $0x1f8] sm:$0xff]   ;;  %v5632_v19 = vld [vmem:[#allocation8 + $0x200] sm:$0xff]  }
 0x1a6   : > { %5245 = vmatprep.subr.bf16.mxu1 %v6408_v60  ;;  %v1001_v26 = vpop.f32.mrb[7].mxu1  ;;  %1133 = vst [vmem:[#allocation2 + $0xf8] sm:$0xff] %v4892_v23 }
 0x1a7   : > { %5158 = vmatmul.mubr.bf16.gmra.mrb[104].mxu0 %v5610_v15  ;;  %1131 = vst [vmem:[#allocation2 + $0xe8] sm:$0xff] %v1001_v26  ;;  %v5631_v26 = vld [vmem:[%s6152_s20 + $0x38] sm:$0xff]  }
 0x1a8   : > { %5206 = vmatmul.mubr.bf16.vlgmr.msra.gmra.mrb[108].mxu1 %v5611_v18  ;;  %5233 = vmatprep.mubr.bf16.mxu0 %v5615_v20 }
 0x1a9   : > { %5246 = vmatpush3.bf16.msra.mxu1 %v6408_v60  ;;  %5209 = vmatprep.mubr.bf16.mxu1 %v5614_v25 }
 0x1aa   : > { %v4855_v28 = vpop.f32.mrb[8].mxu0  ;;  %5247 = vmatprep.subr.bf16.mxu1 %v5613_v27 }
 0x1ab   : > { %v6462_v30 = vadd.f32 %v4855_v28, %v6442_v11  ;;  %v652_v31 = vpop.f32.mrb[9].mxu0  ;;  %v4895_v33 = vpop.f32.mrb[8].mxu1 }
 0x1ac   : > { %v4856_v34 = vpop.f32.mrb[10].mxu0  ;;  %v1014_v36 = vpop.f32.mrb[9].mxu1  ;;  %1136 = vst [vmem:[#allocation2 + $0x110] sm:$0xff] %v4895_v33  ;;  %v5633_v33 = vld [vmem:[#allocation8 + $0x208] sm:$0xff]  }
 0x1ad   : > { %5248 = vmatpush3.bf16.msra.mxu1 %v5613_v27  ;;  %v655_v37 = vpop.f32.mrb[11].mxu0  ;;  %v4896_v38 = vpop.f32.mrb[10].mxu1  ;;  %1134 = vst [vmem:[#allocation2 + $0x100] sm:$0xff] %v1014_v36  ;;  %v5635_v34 = vld [vmem:[%s6152_s20 + $0x40] sm:$0xff]  }
 0x1ae   : > { %v6467_v39 = vadd.f32 %v6442_v11, %v655_v37  ;;  %5249 = vmatprep.subr.bf16.mxu1 %v5618_v29  ;;  %v1017_v40 = vpop.f32.mrb[11].mxu1  ;;  %1137 = vst [vmem:[#allocation2 + $0x118] sm:$0xff] %v4896_v38  ;;  %v5638_v37 = vld [vmem:[#allocation8 + $0x210] sm:$0xff]  }
 0x1af   : > { %5234 = vmatmul.mubr.bf16.vlgmr.msra.gmra.mrb[108].mxu0 %v5617_v32  ;;  %1135 = vst [vmem:[#allocation2 + $0x108] sm:$0xff] %v1017_v40 }
 0x1b0   : > { %5210 = vmatmul.mubr.bf16.gmra.mrb[112].mxu1 %v5616_v35  ;;  %5274 = vmatpush3.bf16.msra.mxu0 %v6408_v60  ;;  %v5630_v60 = vld [vmem:[%s6152_s20 + $0x30] sm:$0xff]   ;;  %v739_v35 = vadd.f32 %v6442_v11, %v6430_v3  ;;  %v5637_v3 = vld [vmem:[%s6152_s20 + $0x48] sm:$0xff]  }
 0x1b1   : > { %5250 = vmatpush3.bf16.msra.mxu1 %v5618_v29  ;;  %5275 = vmatprep.subr.bf16.mxu0 %v5613_v27 }
 0x1b2   : > { %v4859_v44 = vpop.f32.mrb[12].mxu0  ;;  %5251 = vmatprep.subr.bf16.mxu1 %v5619_v41  ;;  %5213 = vmatprep.mubr.bf16.mxu1 %v5620_v42  ;;  %v740_v42 = vadd.f32 %v6442_v11, %v6435_v8  ;;  %v5641_v8 = vld [vmem:[%s6152_s20 + $0x50] sm:$0xff]  }
 0x1b3   : > { %v668_v46 = vpop.f32.mrb[13].mxu0  ;;  %5237 = vmatprep.mubr.bf16.mxu0 %v5621_v43  ;;  %v4899_v48 = vpop.f32.mrb[12].mxu1 }
 0x1b4   : > { %5276 = vmatpush3.bf16.msra.mxu0 %v5613_v27  ;;  %v6474_v49 = vadd.f32 %v6442_v11, %v668_v46  ;;  %v4860_v50 = vpop.f32.mrb[14].mxu0  ;;  %v1030_v52 = vpop.f32.mrb[13].mxu1  ;;  %1140 = vst [vmem:[#allocation2 + $0x130] sm:$0xff] %v4899_v48 }
 0x1b5   : > { %5252 = vmatpush3.bf16.msra.mxu1 %v5619_v41  ;;  %v6478_v53 = vadd.f32 %v4860_v50, %v6442_v11  ;;  %v671_v54 = vpop.f32.mrb[15].mxu0  ;;  %5277 = vmatprep.subr.bf16.mxu0 %v5618_v29  ;;  %v4900_v55 = vpop.f32.mrb[14].mxu1  ;;  %1138 = vst [vmem:[#allocation2 + $0x120] sm:$0xff] %v1030_v52  ;;  %v5640_v52 = vld [vmem:[%s6160_s6 + $0x10] sm:$0xff]  }
 0x1b6   : > { %v6481_v56 = vadd.f32 %v6442_v11, %v671_v54  ;;  %5253 = vmatprep.subr.bf16.mxu1 %v5624_v45  ;;  %v1033_v57 = vpop.f32.mrb[15].mxu1  ;;  %1141 = vst [vmem:[#allocation2 + $0x138] sm:$0xff] %v4900_v55  ;;  %v741_v54 = vadd.f32 %v6428_v2, %v6442_v11  ;;  %v5643_v2 = vld [vmem:[%s6152_s20 + $0x58] sm:$0xff]  }
 0x1b7   : > { %5238 = vmatmul.mubr.bf16.gmra.mrb[112].mxu0 %v5623_v47  ;;  %1139 = vst [vmem:[#allocation2 + $0x128] sm:$0xff] %v1033_v57  ;;  %v5644_v57 = vld [vmem:[#allocation8 + $0x220] sm:$0xff]  }
 0x1b8   : > { %5214 = vmatmul.mubr.bf16.gmra.mrb[116].mxu1 %v5622_v51  ;;  %5278 = vmatpush3.bf16.msra.mxu0 %v5618_v29  ;;  %v5639_v51 = vld [vmem:[#allocation8 + $0x218] sm:$0xff]  }
 0x1b9   : > { %5254 = vmatpush3.bf16.msra.mxu1 %v5624_v45  ;;  %5279 = vmatprep.subr.bf16.mxu0 %v5619_v41 }
 0x1ba   : > { %v4863_v61 = vpop.f32.mrb[16].mxu0  ;;  %5255 = vmatprep.subr.bf16.mxu1 %v5625_v58  ;;  %5241 = vmatprep.mubr.bf16.mxu0 %v5626_v59 }
 0x1bb   : > { %v6486_v63 = vadd.f32 %v4863_v61, %v6442_v11  ;;  %v684_v0 = vpop.f32.mrb[17].mxu0  ;;  %v6489_v4 = vpop.f32.mrb[16].mxu1  ;;  %5261 = vmatprep.mubr.bf16.mxu1 %v5630_v60  ;;  %v5642_v60 = vld [vmem:[%s6160_s6 + $0x18] sm:$0xff]   ;;  %v742_v61 = vadd.f32 %v6433_v6, %v6442_v11  ;;  %v5650_v6 = vld [vmem:[%s6152_s20 + $0x30] sm:$0xff]  }
 0x1bc   : > { %5280 = vmatpush3.bf16.msra.mxu0 %v5619_v41  ;;  %v6492_v5 = vadd.f32 %v6442_v11, %v684_v0  ;;  %v4864_v7 = vpop.f32.mrb[18].mxu0  ;;  %v1046_v9 = vpop.f32.mrb[17].mxu1  ;;  %v5636_v41 = vld [vmem:[%s6160_s6 + $0x8] sm:$0xff]  }
 0x1bd   : > { %5256 = vmatpush3.bf16.msra.mxu1 %v5625_v58  ;;  %v6496_v12 = vadd.f32 %v4864_v7, %v6442_v11  ;;  %v687_v14 = vpop.f32.mrb[19].mxu0  ;;  %5281 = vmatprep.subr.bf16.mxu0 %v5624_v45  ;;  %v6498_v15 = vpop.f32.mrb[18].mxu1  ;;  %1142 = vst [vmem:[#allocation2 + $0x140] sm:$0xff] %v1046_v9 }
 0x1be   : > { %5257 = vmatprep.subr.bf16.mxu1 %v5628_v62  ;;  %v1049_v16 = vpop.f32.mrb[19].mxu1 }
 0x1bf   : > { %5242 = vmatmul.mubr.bf16.gmra.mrb[116].mxu0 %v5627_v1  ;;  %1143 = vst [vmem:[#allocation2 + $0x148] sm:$0xff] %v1049_v16  ;;  %v5645_v16 = vld [vmem:[#allocation8 + $0x228] sm:$0xff]  }
 0x1c0   : > { %5282 = vmatpush3.bf16.msra.mxu0 %v5624_v45  ;;  %5289 = vmatprep.mubr.bf16.mxu0 %v5634_v10 }
 0x1c1   : > { %5258 = vmatpush3.bf16.msra.mxu1 %v5628_v62  ;;  %5283 = vmatprep.subr.bf16.mxu0 %v5625_v58 }
 0x1c2   : > { %v4867_v18 = vpop.f32.mrb[20].mxu0  ;;  %5259 = vmatprep.subr.bf16.mxu1 %v5629_v24 }
 0x1c3   : > { %v6501_v20 = vadd.f32 %v4867_v18, %v6442_v11  ;;  %v700_v22 = vpop.f32.mrb[21].mxu0  ;;  %v6503_v23 = vpop.f32.mrb[20].mxu1  ;;  %v5648_v18 = vld [vmem:[#allocation8 + $0x230] sm:$0xff]  }
 0x1c4   : > { %5284 = vmatpush3.bf16.msra.mxu0 %v5625_v58  ;;  %v4868_v25 = vpop.f32.mrb[22].mxu0  ;;  %v6506_v27 = vpop.f32.mrb[21].mxu1 }
 0x1c5   : > { %5260 = vmatpush3.bf16.msra.mxu1 %v5629_v24  ;;  %v703_v28 = vpop.f32.mrb[23].mxu0  ;;  %5285 = vmatprep.subr.bf16.mxu0 %v5628_v62  ;;  %v6508_v29 = vpop.f32.mrb[22].mxu1  ;;  %v5647_v25 = vld [vmem:[%s6160_s6 + $0x28] sm:$0xff]  }
 0x1c6   : > { %v6511_v31 = vadd.f32 %v6442_v11, %v703_v28  ;;  %5301 = vmatprep.subr.bf16.mxu1 %v5632_v19  ;;  %v6513_v32 = vpop.f32.mrb[23].mxu1 }
 0x1c8   : > { %5262 = vmatmul.mubr.bf16.vlgmr.msra.gmra.mrb[120].mxu1 %v5631_v26  ;;  %5286 = vmatpush3.bf16.msra.mxu0 %v5628_v62 }
 0x1c9   : > { %5302 = vmatpush3.bf16.msra.mxu1 %v5632_v19  ;;  %5287 = vmatprep.subr.bf16.mxu0 %v5629_v24 }
 0x1ca   : > { %v6518_v36 = vpop.f32.mrb[24].mxu0  ;;  %5303 = vmatprep.subr.bf16.mxu1 %v5633_v33  ;;  %5265 = vmatprep.mubr.bf16.mxu1 %v5635_v34  ;;  %v5652_v34 = vld [vmem:[%s6160_s6] sm:$0xff]  }
 0x1cb   : > { %v1685_v38 = vpop.f32.mrb[24].mxu1  ;;  %v6520_v40 = vpop.f32.mrb[25].mxu0 }
 0x1cc   : > { %v1774_v43 = vadd.f32 %v1685_v38, %v739_v35  ;;  %5288 = vmatpush3.bf16.msra.mxu0 %v5629_v24  ;;  %v4967_v44 = vpop.f32.mrb[25].mxu1  ;;  %v6525_v45 = vpop.f32.mrb[26].mxu0  ;;  %v5646_v24 = vld [vmem:[%s6160_s6 + $0x20] sm:$0xff]  }
 0x1cd   : > { %5304 = vmatpush3.bf16.msra.mxu1 %v5633_v33  ;;  %v1688_v46 = vpop.f32.mrb[26].mxu1  ;;  %v6528_v47 = vpop.f32.mrb[27].mxu0  ;;  %5329 = vmatprep.subr.bf16.mxu0 %v5632_v19 }
 0x1ce   : > { %1792 = vst [vmem:[#allocation2] sm:$0xff] %v1774_v43  ;;  %v1775_v48 = vadd.f32 %v1688_v46, %v740_v42  ;;  %5305 = vmatprep.subr.bf16.mxu1 %v5638_v37  ;;  %v4968_v50 = vpop.f32.mrb[27].mxu1 }
 0x1cf   : > { %5290 = vmatmul.mubr.bf16.vlgmr.msra.gmra.mrb[120].mxu0 %v5636_v41  ;;  %v5649_v41 = vld [vmem:[#allocation8 + $0x238] sm:$0xff]  }
 0x1d0   : > { %1793 = vst [vmem:[#allocation2 + $0x8] sm:$0xff] %v1775_v48  ;;  %5266 = vmatmul.mubr.bf16.gmra.mrb[124].mxu1 %v5637_v3  ;;  %5330 = vmatpush3.bf16.msra.mxu0 %v5632_v19  ;;  %v5651_v48 = vld [vmem:[%s6152_s20 + $0x38] sm:$0xff]  }
 0x1d1   : > { %5306 = vmatpush3.bf16.msra.mxu1 %v5638_v37  ;;  %5331 = vmatprep.subr.bf16.mxu0 %v5633_v33 }
 0x1d2   : > { %v6534_v55 = vpop.f32.mrb[28].mxu0  ;;  %5307 = vmatprep.subr.bf16.mxu1 %v5639_v51  ;;  %5293 = vmatprep.mubr.bf16.mxu0 %v5640_v52  ;;  %v5653_v52 = vld [vmem:[%s6152_s20 + $0x40] sm:$0xff]  }
 0x1d3   : > { %v1693_v58 = vpop.f32.mrb[28].mxu1  ;;  %v6536_v59 = vpop.f32.mrb[29].mxu0  ;;  %5269 = vmatprep.mubr.bf16.mxu1 %v5641_v8 }
 0x1d4   : > { %v1776_v62 = vadd.f32 %v1693_v58, %v741_v54  ;;  %5332 = vmatpush3.bf16.msra.mxu0 %v5633_v33  ;;  %v4971_v0 = vpop.f32.mrb[29].mxu1  ;;  %v6541_v1 = vpop.f32.mrb[30].mxu0 }
 0x1d5   : > { %5308 = vmatpush3.bf16.msra.mxu1 %v5639_v51  ;;  %v1696_v7 = vpop.f32.mrb[30].mxu1  ;;  %v6544_v9 = vpop.f32.mrb[31].mxu0  ;;  %5333 = vmatprep.subr.bf16.mxu0 %v5638_v37  ;;  %v5655_v0 = vld [vmem:[%s6152_s20 + $0x48] sm:$0xff]  }
 0x1d6   : > { %1794 = vst [vmem:[#allocation2 + $0x10] sm:$0xff] %v1776_v62  ;;  %v1777_v10 = vadd.f32 %v1696_v7, %v742_v61  ;;  %5309 = vmatprep.subr.bf16.mxu1 %v5644_v57  ;;  %v4972_v14 = vpop.f32.mrb[31].mxu1 }
 0x1d7   : > { %5294 = vmatmul.mubr.bf16.gmra.mrb[124].mxu0 %v5642_v60  ;;  %v5654_v60 = vld [vmem:[%s6160_s6 + $0x8] sm:$0xff]  }
 0x1d8   : > { %1795 = vst [vmem:[#allocation2 + $0x18] sm:$0xff] %v1777_v10  ;;  %5270 = vmatmul.mubr.bf16.gmra.mrb[128].mxu1 %v5643_v2  ;;  %5334 = vmatpush3.bf16.msra.mxu0 %v5638_v37  ;;  %v5657_v10 = vld [vmem:[%s6152_s20 + $0x50] sm:$0xff]  }
 0x1d9   : > { %5310 = vmatpush3.bf16.msra.mxu1 %v5644_v57  ;;  %5335 = vmatprep.subr.bf16.mxu0 %v5639_v51 }
 0x1da   : > { %v6548_v11 = vpop.f32.mrb[32].mxu0  ;;  %5311 = vmatprep.subr.bf16.mxu1 %v5645_v16  ;;  %5297 = vmatprep.mubr.bf16.mxu0 %v5646_v24 }
 0x1db   : > { %v1701_v19 = vpop.f32.mrb[32].mxu1  ;;  %v6550_v22 = vpop.f32.mrb[33].mxu0  ;;  %5317 = vmatprep.mubr.bf16.mxu1 %v5650_v6 }
 0x1dc   : > { %v6554_v26 = vadd.f32 %v1701_v19, %v6450_v17  ;;  %5336 = vmatpush3.bf16.msra.mxu0 %v5639_v51  ;;  %v4975_v28 = vpop.f32.mrb[33].mxu1  ;;  %v6556_v33 = vpop.f32.mrb[34].mxu0  ;;  %v5658_v19 = vld [vmem:[%s6160_s6 + $0x18] sm:$0xff]  }
 0x1dd   : > { %5312 = vmatpush3.bf16.msra.mxu1 %v5645_v16  ;;  %v1704_v35 = vpop.f32.mrb[34].mxu1  ;;  %v6559_v37 = vpop.f32.mrb[35].mxu0  ;;  %5337 = vmatprep.subr.bf16.mxu0 %v5644_v57 }
 0x1de   : > { %5313 = vmatprep.subr.bf16.mxu1 %v5648_v18  ;;  %v4976_v38 = vpop.f32.mrb[35].mxu1  ;;  %v5660_v35 = vld [vmem:[%s6160_s6 + $0x20] sm:$0xff]  }
 0x1df   : > { %5298 = vmatmul.mubr.bf16.gmra.mrb[128].mxu0 %v5647_v25 }
 0x1e0   : > { %5338 = vmatpush3.bf16.msra.mxu0 %v5644_v57  ;;  %5345 = vmatprep.mubr.bf16.mxu0 %v5652_v34 }
 0x1e1   : > { %5314 = vmatpush3.bf16.msra.mxu1 %v5648_v18  ;;  %5339 = vmatprep.subr.bf16.mxu0 %v5645_v16 }
 0x1e2   : > { %v6561_v17 = vpop.f32.mrb[36].mxu0  ;;  %5315 = vmatprep.subr.bf16.mxu1 %v5649_v41 }
 0x1e3   : > { %v1709_v42 = vpop.f32.mrb[36].mxu1  ;;  %v6563_v43 = vpop.f32.mrb[37].mxu0 }
 0x1e4   : > { %v6566_v44 = vadd.f32 %v1709_v42, %v6446_v13  ;;  %5340 = vmatpush3.bf16.msra.mxu0 %v5645_v16  ;;  %v4979_v3 = vpop.f32.mrb[37].mxu1  ;;  %v6568_v46 = vpop.f32.mrb[38].mxu0 }
 0x1e5   : > { %5316 = vmatpush3.bf16.msra.mxu1 %v5649_v41  ;;  %v1712_v50 = vpop.f32.mrb[38].mxu1  ;;  %v6571_v51 = vpop.f32.mrb[39].mxu0  ;;  %5341 = vmatprep.subr.bf16.mxu0 %v5648_v18 }
 0x1e6   : > { %v6575_v8 = vadd.f32 %v1712_v50, %v6456_v21  ;;  %v4980_v54 = vpop.f32.mrb[39].mxu1  ;;  %v5656_v21 = vld [vmem:[%s6160_s6 + $0x10] sm:$0xff]  }
 0x1e8   : > { %5318 = vmatmul.mubr.bf16.vlgmr.msra.gmra.mrb[132].mxu1 %v5651_v48  ;;  %5342 = vmatpush3.bf16.msra.mxu0 %v5648_v18 }
 0x1e9   : > { %5343 = vmatprep.subr.bf16.mxu0 %v5649_v41  ;;  %5321 = vmatprep.mubr.bf16.mxu1 %v5653_v52 }
 0x1ea   : > { %v6577_v13 = vpop.f32.mrb[40].mxu0 }
 0x1eb   : > { %v1717_v57 = vpop.f32.mrb[40].mxu1  ;;  %v6579_v58 = vpop.f32.mrb[41].mxu0 }
 0x1ec   : > { %5344 = vmatpush3.bf16.msra.mxu0 %v5649_v41  ;;  %v4983_v61 = vpop.f32.mrb[41].mxu1  ;;  %v6582_v62 = vpop.f32.mrb[42].mxu0 }
 0x1ed   : > { %v1720_v2 = vpop.f32.mrb[42].mxu1  ;;  %v6586_v7 = vpop.f32.mrb[43].mxu0 }
 0x1ee   : > { %v6590_v14 = vadd.f32 %v1720_v2, %v6467_v39  ;;  %v4984_v16 = vpop.f32.mrb[43].mxu1  ;;  %v5659_v39 = vld [vmem:[%s6152_s20 + $0x58] sm:$0xff]   ;;  %s6886_s20 = scalar_lea.hbm %s7040_s2, %s4530_s7 }
 0x1ef   : > { %5346 = vmatmul.mubr.bf16.vlgmr.msra.gmra.mrb[132].mxu0 %v5654_v60 }
 0x1f0   : > { %5322 = vmatmul.mubr.bf16.gmra.mrb[136].mxu1 %v5655_v0  ;;  %5349 = vmatprep.mubr.bf16.mxu0 %v5656_v21 }
 0x1f1   : > { %5325 = vmatprep.mubr.bf16.mxu1 %v5657_v10 }
 0x1f2   : > { %v6592_v24 = vpop.f32.mrb[44].mxu0 }
 0x1f3   : > { %v1725_v6 = vpop.f32.mrb[44].mxu1  ;;  %v6594_v18 = vpop.f32.mrb[45].mxu0 }
 0x1f4   : > { %v6598_v25 = vadd.f32 %v1725_v6, %v6462_v30  ;;  %v4987_v28 = vpop.f32.mrb[45].mxu1  ;;  %v6600_v34 = vpop.f32.mrb[46].mxu0  ;;  %v5661_v30 = vld [vmem:[%s6160_s6 + $0x28] sm:$0xff]   ;;  %s5753_s6 = scalar_lea.vmem %s5752_s27, 2048 }
 0x1f5   : > { %v1728_v38 = vpop.f32.mrb[46].mxu1  ;;  %v6604_v41 = vpop.f32.mrb[47].mxu0  ;;  %p5755_p1 = scmp.lt.s32.totalorder %s5753_s6, %s5747_s28 }
 0x1f6   : > { %v4988_v42 = vpop.f32.mrb[47].mxu1 }
 0x1f7   : > { %5350 = vmatmul.mubr.bf16.gmra.mrb[136].mxu0 %v5658_v19  ;;  %p5756_p5 = por %p5755_p1, %p5754_p9 }
 0x1f8   : > { %5326 = vmatmul.mubr.bf16.gmra.mrb[140].mxu1 %v5659_v39  ;;  %5353 = vmatprep.mubr.bf16.mxu0 %v5660_v35 }
 0x1f9   : > { %p5757_p3 = pnand %p5756_p5, %p5750_p8 }
 0x1fa   : > { %v1868_v3 = vpop.f32.mrb[48].mxu0 }
 0x1fb   : > { %v1733_v48 = vpop.f32.mrb[48].mxu1  ;;  %v6607_v50 = vadd.f32 %v1868_v3, %v6486_v63  ;;  %v5019_v52 = vpop.f32.mrb[49].mxu0 }
 0x1fc   : > { %v6611_v54 = vadd.f32 %v1733_v48, %v6474_v49  ;;  %v4991_v57 = vpop.f32.mrb[49].mxu1  ;;  %v1871_v60 = vpop.f32.mrb[50].mxu0 }
 0x1fd   : > { %v1736_v61 = vpop.f32.mrb[50].mxu1  ;;  %v6614_v0 = vadd.f32 %v1871_v60, %v6496_v12  ;;  %v5020_v21 = vpop.f32.mrb[51].mxu0 }
 0x1fe   : > { %v6617_v2 = vadd.f32 %v1736_v61, %v6481_v56  ;;  %v4992_v10 = vpop.f32.mrb[51].mxu1 }
 0x1ff   : > { %5354 = vmatmul.mubr.bf16.gmra.mrb[140].mxu0 %v5661_v30 }
 0x202   : > { %v1876_v16 = vpop.f32.mrb[52].mxu0 }
 0x203   : > { %v1741_v63 = vpop.f32.mrb[52].mxu1  ;;  %v5023_v6 = vpop.f32.mrb[53].mxu0 }
 0x204   : > { %v4995_v19 = vpop.f32.mrb[53].mxu1  ;;  %v1879_v28 = vpop.f32.mrb[54].mxu0 }
 0x205   : > { %v1744_v39 = vpop.f32.mrb[54].mxu1  ;;  %v6620_v49 = vadd.f32 %v1879_v28, %v6511_v31  ;;  %v5024_v35 = vpop.f32.mrb[55].mxu0 }
 0x206   : > { %v6623_v38 = vadd.f32 %v1744_v39, %v6478_v53  ;;  %v4996_v12 = vpop.f32.mrb[55].mxu1 }
 0x20a   : > { %v1884_v42 = vpop.f32.mrb[56].mxu0 }
 0x20b   : > { %v1749_v3 = vpop.f32.mrb[56].mxu1  ;;  %v6626_v56 = vadd.f32 %v1884_v42, %v6501_v20  ;;  %v5027_v48 = vpop.f32.mrb[57].mxu0 }
 0x20c   : > { %v6629_v52 = vadd.f32 %v1749_v3, %v6492_v5  ;;  %v4999_v30 = vpop.f32.mrb[57].mxu1  ;;  %v1887_v57 = vpop.f32.mrb[58].mxu0 }
 0x20d   : > { %v1752_v60 = vpop.f32.mrb[58].mxu1  ;;  %v5028_v61 = vpop.f32.mrb[59].mxu0 }
 0x20e   : > { %v5000_v31 = vpop.f32.mrb[59].mxu1 }
 0x213   : > { %v6631_v21 = vpop.f32.mrb[60].mxu1 }
 0x214   : > { %v5047_v10 = vpop.f32.mrb[61].mxu1 }
 0x215   : > { %v6633_v53 = vpop.f32.mrb[62].mxu1 }
 0x216   : > { %v5048_v16 = vpop.f32.mrb[63].mxu1 }
 0x21a   : > { %v2264_v63 = vpop.f32.mrb[60].mxu0 }
 0x21b   : > { %v6636_v6 = vadd.f32 %v6489_v4, %v2264_v63  ;;  %v6638_v20 = vpop.f32.mrb[64].mxu1  ;;  %v5099_v19 = vpop.f32.mrb[61].mxu0 }
 0x21c   : > { %v5051_v5 = vpop.f32.mrb[65].mxu1  ;;  %v2267_v28 = vpop.f32.mrb[62].mxu0 }
 0x21d   : > { %v6641_v39 = vadd.f32 %v6498_v15, %v2267_v28  ;;  %v6643_v35 = vpop.f32.mrb[66].mxu1  ;;  %v5100_v12 = vpop.f32.mrb[63].mxu0 }
 0x21e   : > { %v5052_v42 = vpop.f32.mrb[67].mxu1 }
 0x222   : > { %v2272_v3 = vpop.f32.mrb[64].mxu0 }
 0x223   : > { %v6646_v48 = vadd.f32 %v2272_v3, %v6506_v27  ;;  %v6648_v30 = vpop.f32.mrb[68].mxu1  ;;  %v5103_v4 = vpop.f32.mrb[65].mxu0 }
 0x224   : > { %v5055_v57 = vpop.f32.mrb[69].mxu1  ;;  %v2275_v60 = vpop.f32.mrb[66].mxu0 }
 0x225   : > { %7003 = vst [vmem:[#allocation24_spill] sm:$0xff] %v6646_v48  ;;  %v6651_v61 = vadd.f32 %v2275_v60, %v6513_v32  ;;  %v6653_v31 = vpop.f32.mrb[70].mxu1  ;;  %v5104_v15 = vpop.f32.mrb[67].mxu0 }
 0x226   : > { %v5056_v10 = vpop.f32.mrb[71].mxu1 }
 0x227   : > { %7004 = vst [vmem:[#allocation25_spill] sm:$0xff] %v6651_v61 }
 0x22a   : > { %v2280_v16 = vpop.f32.mrb[68].mxu0 }
 0x22b   : > { %v6656_v63 = vadd.f32 %v6503_v23, %v2280_v16  ;;  %v6658_v19 = vpop.f32.mrb[72].mxu1  ;;  %v5107_v27 = vpop.f32.mrb[69].mxu0 }
 0x22c   : > { %v5059_v5 = vpop.f32.mrb[73].mxu1  ;;  %v2283_v28 = vpop.f32.mrb[70].mxu0 }
 0x22d   : > { %v6661_v12 = vadd.f32 %v6508_v29, %v2283_v28  ;;  %v6663_v42 = vpop.f32.mrb[74].mxu1  ;;  %v5108_v32 = vpop.f32.mrb[71].mxu0 }
 0x22e   : > { %v5060_v3 = vpop.f32.mrb[75].mxu1 }
 0x22f   : > { %7005 = vst [vmem:[#allocation26_spill] sm:$0xff] %v6661_v12 }
 0x233   : > { %v6665_v4 = vpop.f32.mrb[76].mxu1 }
 0x234   : > { %v5063_v57 = vpop.f32.mrb[77].mxu1 }
 0x235   : > { %v6667_v60 = vpop.f32.mrb[78].mxu1 }
 0x236   : > { %v5064_v15 = vpop.f32.mrb[79].mxu1 }
 0x23a   : > { %v2477_v23 = vpop.f32.mrb[72].mxu0 }
 0x23b   : > { %v6670_v10 = vadd.f32 %v2477_v23, %v6520_v40  ;;  %v6672_v16 = vpop.f32.mrb[80].mxu1  ;;  %v5127_v27 = vpop.f32.mrb[73].mxu0 }
 0x23c   : > { %v5067_v5 = vpop.f32.mrb[81].mxu1  ;;  %v2480_v29 = vpop.f32.mrb[74].mxu0 }
 0x23d   : > { %7006 = vst [vmem:[#allocation27_spill] sm:$0xff] %v6670_v10  ;;  %v6675_v28 = vadd.f32 %v2480_v29, %v6528_v47  ;;  %v6677_v32 = vpop.f32.mrb[82].mxu1  ;;  %v5128_v3 = vpop.f32.mrb[75].mxu0 }
 0x23e   : > { %v5068_v61 = vpop.f32.mrb[83].mxu1 }
 0x23f   : > { %7007 = vst [vmem:[#allocation28_spill] sm:$0xff] %v6675_v28 }
 0x242   : > { %v2485_v57 = vpop.f32.mrb[76].mxu0 }
 0x243   : > { %v6680_v12 = vadd.f32 %v6518_v36, %v2485_v57  ;;  %v6682_v15 = vpop.f32.mrb[84].mxu1  ;;  %v5131_v40 = vpop.f32.mrb[77].mxu0 }
 0x244   : > { %v5071_v23 = vpop.f32.mrb[85].mxu1  ;;  %v2488_v10 = vpop.f32.mrb[78].mxu0 }
 0x245   : > { %7008 = vst [vmem:[#allocation29_spill] sm:$0xff] %v6680_v12  ;;  %v6685_v27 = vadd.f32 %v6525_v45, %v2488_v10  ;;  %v6687_v5 = vpop.f32.mrb[86].mxu1  ;;  %v5132_v47 = vpop.f32.mrb[79].mxu0 }
 0x246   : > { %v5072_v29 = vpop.f32.mrb[87].mxu1 }
 0x247   : > { %7009 = vst [vmem:[#allocation30_spill] sm:$0xff] %v6685_v27 }
 0x24a   : > { %v2493_v28 = vpop.f32.mrb[80].mxu0 }
 0x24b   : > { %v6690_v3 = vadd.f32 %v2493_v28, %v6536_v59  ;;  %v6692_v61 = vpop.f32.mrb[88].mxu1  ;;  %v5135_v36 = vpop.f32.mrb[81].mxu0 }
 0x24c   : > { %v5075_v57 = vpop.f32.mrb[89].mxu1  ;;  %v2496_v12 = vpop.f32.mrb[82].mxu0 }
 0x24d   : > { %7010 = vst [vmem:[#allocation31_spill] sm:$0xff] %v6690_v3  ;;  %v6695_v40 = vadd.f32 %v2496_v12, %v6544_v9  ;;  %v6697_v23 = vpop.f32.mrb[90].mxu1  ;;  %v5136_v45 = vpop.f32.mrb[83].mxu0 }
 0x24e   : > { %v5076_v10 = vpop.f32.mrb[91].mxu1 }
 0x24f   : > { %7011 = vst [vmem:[#allocation32_spill] sm:$0xff] %v6695_v40 }
 0x252   : > { %v2501_v27 = vpop.f32.mrb[84].mxu0 }
 0x253   : > { %v6700_v47 = vadd.f32 %v6534_v55, %v2501_v27  ;;  %v6702_v29 = vpop.f32.mrb[92].mxu1  ;;  %v5139_v59 = vpop.f32.mrb[85].mxu0 }
 0x254   : > { %v5079_v28 = vpop.f32.mrb[93].mxu1  ;;  %v2504_v3 = vpop.f32.mrb[86].mxu0 }
 0x255   : > { %v6705_v36 = vadd.f32 %v6541_v1, %v2504_v3  ;;  %v6707_v57 = vpop.f32.mrb[94].mxu1  ;;  %v5140_v9 = vpop.f32.mrb[87].mxu0 }
 0x256   : > { %v5080_v12 = vpop.f32.mrb[95].mxu1 }
 0x257   : > { %7012 = vst [vmem:[#allocation33_spill] sm:$0xff] %v6705_v36 }
 0x25a   : > { %v2509_v40 = vpop.f32.mrb[88].mxu0 }
 0x25b   : > { %v6710_v45 = vadd.f32 %v2509_v40, %v6550_v22  ;;  %v5143_v10 = vpop.f32.mrb[89].mxu0  ;;  %v2660_v48 = vpop.f32.mrb[96].mxu1 }
 0x25c   : > { %v6713_v55 = vadd.f32 %v6577_v13, %v2660_v48  ;;  %v2512_v27 = vpop.f32.mrb[90].mxu0  ;;  %v5179_v59 = vpop.f32.mrb[97].mxu1 }
 0x25d   : > { %v6716_v28 = vadd.f32 %v2512_v27, %v6559_v37  ;;  %v5144_v1 = vpop.f32.mrb[91].mxu0  ;;  %v2663_v3 = vpop.f32.mrb[98].mxu1 }
 0x25e   : > { %v6719_v36 = vadd.f32 %v6582_v62, %v2663_v3  ;;  %v5180_v9 = vpop.f32.mrb[99].mxu1 }
 0x262   : > { %v2517_v12 = vpop.f32.mrb[92].mxu0 }
 0x263   : > { %v6722_v22 = vadd.f32 %v6548_v11, %v2517_v12  ;;  %v5147_v40 = vpop.f32.mrb[93].mxu0  ;;  %v2668_v10 = vpop.f32.mrb[100].mxu1 }
 0x264   : > { %v6725_v13 = vadd.f32 %v2668_v10, %v6594_v18  ;;  %v2520_v48 = vpop.f32.mrb[94].mxu0  ;;  %v5183_v59 = vpop.f32.mrb[101].mxu1 }
 0x265   : > { %v6728_v37 = vadd.f32 %v6556_v33, %v2520_v48  ;;  %v5148_v27 = vpop.f32.mrb[95].mxu0  ;;  %v2671_v1 = vpop.f32.mrb[102].mxu1 }
 0x266   : > { %7013 = vst [vmem:[#allocation34_spill] sm:$0xff] %v6725_v13  ;;  %v6731_v62 = vadd.f32 %v2671_v1, %v6604_v41  ;;  %v5184_v3 = vpop.f32.mrb[103].mxu1 }
 0x268   : > { %7014 = vst [vmem:[#allocation35_spill] sm:$0xff] %v6731_v62 }
 0x26a   : > { %v2525_v9 = vpop.f32.mrb[96].mxu0 }
 0x26b   : > { %v6734_v11 = vadd.f32 %v2525_v9, %v6563_v43  ;;  %v5151_v12 = vpop.f32.mrb[97].mxu0  ;;  %v2676_v40 = vpop.f32.mrb[104].mxu1 }
 0x26c   : > { %v6737_v18 = vadd.f32 %v6592_v24, %v2676_v40  ;;  %v2528_v10 = vpop.f32.mrb[98].mxu0  ;;  %v5187_v59 = vpop.f32.mrb[105].mxu1 }
 0x26d   : > { %v6740_v33 = vadd.f32 %v2528_v10, %v6571_v51  ;;  %v5152_v48 = vpop.f32.mrb[99].mxu0  ;;  %v2679_v27 = vpop.f32.mrb[106].mxu1 }
 0x26e   : > { %v6743_v41 = vadd.f32 %v6600_v34, %v2679_v27  ;;  %v5188_v1 = vpop.f32.mrb[107].mxu1  ;;  %v2899_v48 = vld [vmem:[#allocation2 + $0x10] sm:$0xff] }
 0x26f   : > { %v2897_v1 = vld [vmem:[#allocation2] sm:$0xff] }
 0x270   : > { %7015 = vst [vmem:[#allocation36_spill] sm:$0xff] %v6743_v41 }
 0x272   : > { %v2533_v3 = vpop.f32.mrb[100].mxu0 }
 0x273   : > { %v6746_v43 = vadd.f32 %v6561_v17, %v2533_v3  ;;  %v5155_v9 = vpop.f32.mrb[101].mxu0 }
 0x274   : > { %v2536_v12 = vpop.f32.mrb[102].mxu0 }
 0x275   : > { %v6749_v24 = vadd.f32 %v6568_v46, %v2536_v12  ;;  %v5156_v40 = vpop.f32.mrb[103].mxu0  ;;  %v2900_v46 = vld [vmem:[#allocation2 + $0x18] sm:$0xff] }
 0x276   : > { %v2898_v40 = vld [vmem:[#allocation2 + $0x8] sm:$0xff] }
 0x27a   : > { %v2541_v59 = vpop.f32.mrb[104].mxu0 }
 0x27b   : > { %v6752_v51 = vadd.f32 %v2541_v59, %v6579_v58  ;;  %v5207_v10 = vpop.f32.mrb[108].mxu1  ;;  %v5159_v62 = vpop.f32.mrb[105].mxu0 }
 0x27c   : > { %v2911_v34 = vadd.f32 %v5207_v10, %v2899_v48  ;;  %v2850_v27 = vpop.f32.mrb[109].mxu1  ;;  %v2544_v41 = vpop.f32.mrb[106].mxu0 }
 0x27d   : > { %v6754_v13 = vadd.f32 %v2897_v1, %v2850_v27  ;;  %v6757_v17 = vadd.f32 %v2544_v41, %v6586_v7  ;;  %v5208_v3 = vpop.f32.mrb[110].mxu1  ;;  %v5160_v9 = vpop.f32.mrb[107].mxu0 }
 0x27e   : > { %2923 = vst [vmem:[#allocation2 + $0x10] sm:$0xff] %v2911_v34  ;;  %v6759_v12 = vadd.f32 %v5208_v3, %v2900_v46  ;;  %v2853_v58 = vpop.f32.mrb[111].mxu1 }
 0x27f   : > { %2921 = vst [vmem:[#allocation2] sm:$0xff] %v6754_v13  ;;  %v6762_v62 = vadd.f32 %v2898_v40, %v2853_v58 }
 0x280   : > { %2924 = vst [vmem:[#allocation2 + $0x18] sm:$0xff] %v6759_v12 }
 0x281   : > { %2922 = vst [vmem:[#allocation2 + $0x8] sm:$0xff] %v6762_v62 }
 0x282   : > { %v5235_v59 = vpop.f32.mrb[108].mxu0 }
 0x283   : > { %v5211_v10 = vpop.f32.mrb[112].mxu1  ;;  %v3015_v7 = vpop.f32.mrb[109].mxu0 }
 0x284   : > { %v6767_v41 = vadd.f32 %v5211_v10, %v6566_v44  ;;  %v2866_v48 = vpop.f32.mrb[113].mxu1  ;;  %v6770_v34 = vadd.f32 %v3015_v7, %v6611_v54  ;;  %v5236_v27 = vpop.f32.mrb[110].mxu0 }
 0x285   : > { %v6773_v1 = vadd.f32 %v2866_v48, %v6554_v26  ;;  %v5212_v3 = vpop.f32.mrb[114].mxu1  ;;  %v6776_v46 = vadd.f32 %v5236_v27, %v6623_v38  ;;  %v3018_v9 = vpop.f32.mrb[111].mxu0 }
 0x286   : > { %v6779_v58 = vadd.f32 %v5212_v3, %v6575_v8  ;;  %v2869_v40 = vpop.f32.mrb[115].mxu1  ;;  %v6782_v44 = vadd.f32 %v3018_v9, %v6617_v2 }
 0x28a   : > { %v5239_v59 = vpop.f32.mrb[112].mxu0 }
 0x28b   : > { %v5215_v10 = vpop.f32.mrb[116].mxu1  ;;  %v6785_v54 = vadd.f32 %v5239_v59, %v6607_v50  ;;  %v3031_v7 = vpop.f32.mrb[113].mxu0 }
 0x28c   : > { %v6788_v26 = vadd.f32 %v5215_v10, %v6598_v25  ;;  %v2882_v48 = vpop.f32.mrb[117].mxu1  ;;  %v6791_v38 = vadd.f32 %v3031_v7, %v6629_v52  ;;  %v5240_v27 = vpop.f32.mrb[114].mxu0  ;;  %v2154_v7 = vld [vmem:[#allocation2 + $0xd0] sm:$0xff] }
 0x28d   : > { %7016 = vst [vmem:[#allocation37_spill] sm:$0xff] %v6785_v54  ;;  %v5216_v8 = vpop.f32.mrb[118].mxu1  ;;  %v6794_v3 = vadd.f32 %v5240_v27, %v6614_v0  ;;  %v3034_v2 = vpop.f32.mrb[115].mxu0  ;;  %v2172_v0 = vadd.f32 %v2154_v7, %v6638_v20  ;;  %v2158_v20 = vld [vmem:[#allocation2 + $0xf0] sm:$0xff] }
 0x28e   : > { %v2885_v9 = vpop.f32.mrb[119].mxu1  ;;  %v2152_v8 = vld [vmem:[#allocation2 + $0xc0] sm:$0xff]  ;;  %v2155_v2 = vld [vmem:[#allocation2 + $0xd8] sm:$0xff] }
 0x28f   : > { %7017 = vst [vmem:[#allocation38_spill] sm:$0xff] %v6794_v3  ;;  %v6797_v40 = vadd.f32 %v2885_v9, %v6590_v14  ;;  %v2170_v27 = vadd.f32 %v2152_v8, %v6631_v21  ;;  %v2153_v14 = vld [vmem:[#allocation2 + $0xc8] sm:$0xff]  ;;  %v2173_v9 = vadd.f32 %v2155_v2, %v6643_v35  ;;  %v2164_v21 = vld [vmem:[#allocation2 + $0x120] sm:$0xff]  ;;  %v2176_v35 = vadd.f32 %v2158_v20, %v6658_v19 }
 0x290   : > { %v2156_v8 = vld [vmem:[#allocation2 + $0xe0] sm:$0xff]  ;;  %v2165_v2 = vld [vmem:[#allocation2 + $0x128] sm:$0xff] }
 0x292   : > { %v5243_v50 = vpop.f32.mrb[116].mxu0 }
 0x293   : > { %v6800_v59 = vadd.f32 %v5243_v50, %v6626_v56  ;;  %v3047_v25 = vpop.f32.mrb[117].mxu0  ;;  %v2171_v50 = vadd.f32 %v2153_v14, %v6633_v53  ;;  %v2167_v53 = vld [vmem:[#allocation2 + $0x138] sm:$0xff] }
 0x294   : > { %v5244_v10 = vpop.f32.mrb[118].mxu0  ;;  %v2185_v14 = vadd.f32 %v2167_v53, %v6697_v23 }
 0x295   : > { %7018 = vst [vmem:[#allocation39_spill] sm:$0xff] %v6800_v59  ;;  %v3050_v48 = vpop.f32.mrb[119].mxu0  ;;  %v2166_v59 = vld [vmem:[#allocation2 + $0x130] sm:$0xff] }
 0x296   : > { %v6803_v52 = vadd.f32 %v3050_v48, %v6620_v49  ;;  %v2184_v7 = vadd.f32 %v2166_v59, %v6692_v61  ;;  %v2183_v59 = vadd.f32 %v2165_v2, %v6687_v5  ;;  %v2162_v5 = vld [vmem:[#allocation2 + $0x110] sm:$0xff]  ;;  %v2169_v2 = vld [vmem:[#allocation2 + $0x148] sm:$0xff] }
 0x298   : > { %7019 = vst [vmem:[#allocation40_spill] sm:$0xff] %v6803_v52 }
 0x29b   : > { %v5263_v3 = vpop.f32.mrb[120].mxu1 }
 0x29c   : > { %v3307_v54 = vadd.f32 %v5263_v3, %v2172_v0  ;;  %v3246_v56 = vpop.f32.mrb[121].mxu1  ;;  %v2182_v3 = vadd.f32 %v2164_v21, %v6682_v15 }
 0x29d   : > { %v3305_v25 = vadd.f32 %v3246_v56, %v2170_v27  ;;  %v5264_v10 = vpop.f32.mrb[122].mxu1  ;;  %v2159_v27 = vld [vmem:[#allocation2 + $0xf8] sm:$0xff] }
 0x29e   : > { %3319 = vst [vmem:[#allocation2 + $0xd0] sm:$0xff] %v3307_v54  ;;  %v3308_v49 = vadd.f32 %v5264_v10, %v2173_v9  ;;  %v3249_v48 = vpop.f32.mrb[123].mxu1  ;;  %v2174_v54 = vadd.f32 %v2156_v8, %v6648_v30  ;;  %v2177_v61 = vadd.f32 %v2159_v27, %v6663_v42  ;;  %v2163_v27 = vld [vmem:[#allocation2 + $0x118] sm:$0xff] }
 0x29f   : > { %3317 = vst [vmem:[#allocation2 + $0xc0] sm:$0xff] %v3305_v25  ;;  %v3306_v52 = vadd.f32 %v3249_v48, %v2171_v50  ;;  %v2157_v25 = vld [vmem:[#allocation2 + $0xe8] sm:$0xff] }
 0x2a0   : > { %3320 = vst [vmem:[#allocation2 + $0xd8] sm:$0xff] %v3308_v49  ;;  %v2175_v49 = vadd.f32 %v2157_v25, %v6653_v31  ;;  %v2180_v31 = vadd.f32 %v2162_v5, %v6672_v16  ;;  %v2181_v25 = vadd.f32 %v2163_v27, %v6677_v32  ;;  %v7022_v5 = vld [vmem:[#allocation25_spill] sm:$0xff] }
 0x2a1   : > { %3318 = vst [vmem:[#allocation2 + $0xc8] sm:$0xff] %v3306_v52 }
 0x2a2   : > { %v5291_v0 = vpop.f32.mrb[120].mxu0 }
 0x2a3   : > { %v3473_v9 = vadd.f32 %v5291_v0, %v2184_v7  ;;  %v5267_v56 = vpop.f32.mrb[124].mxu1  ;;  %v3411_v50 = vpop.f32.mrb[121].mxu0 }
 0x2a4   : > { %v3311_v52 = vadd.f32 %v5267_v56, %v2176_v35  ;;  %v3471_v19 = vadd.f32 %v3411_v50, %v2182_v3  ;;  %v3262_v10 = vpop.f32.mrb[125].mxu1  ;;  %v5292_v15 = vpop.f32.mrb[122].mxu0  ;;  %v2168_v35 = vld [vmem:[#allocation2 + $0x140] sm:$0xff]  ;;  %v2161_v50 = vld [vmem:[#allocation2 + $0x108] sm:$0xff] }
 0x2a5   : > { %3485 = vst [vmem:[#allocation2 + $0x130] sm:$0xff] %v3473_v9  ;;  %v3309_v30 = vadd.f32 %v3262_v10, %v2174_v54  ;;  %v3474_v48 = vadd.f32 %v5292_v15, %v2185_v14  ;;  %v5268_v20 = vpop.f32.mrb[126].mxu1  ;;  %v3414_v21 = vpop.f32.mrb[123].mxu0  ;;  %v2160_v3 = vld [vmem:[#allocation2 + $0x100] sm:$0xff]  ;;  %v2186_v53 = vadd.f32 %v2168_v35, %v6702_v29  ;;  %v2179_v29 = vadd.f32 %v2161_v50, %v6667_v60 }
 0x2a6   : > { %3323 = vst [vmem:[#allocation2 + $0xf0] sm:$0xff] %v3311_v52  ;;  %3483 = vst [vmem:[#allocation2 + $0x120] sm:$0xff] %v3471_v19  ;;  %v3312_v23 = vadd.f32 %v5268_v20, %v2177_v61  ;;  %v3472_v7 = vadd.f32 %v3414_v21, %v2183_v59  ;;  %v3265_v8 = vpop.f32.mrb[127].mxu1  ;;  %v2178_v54 = vadd.f32 %v2160_v3, %v6665_v4  ;;  %v7020_v21 = vld [vmem:[#allocation24_spill] sm:$0xff] }
 0x2a7   : > { %3321 = vst [vmem:[#allocation2 + $0xe0] sm:$0xff] %v3309_v30  ;;  %3486 = vst [vmem:[#allocation2 + $0x138] sm:$0xff] %v3474_v48  ;;  %v3310_v42 = vadd.f32 %v3265_v8, %v2175_v49  ;;  %v2187_v61 = vadd.f32 %v2169_v2, %v6707_v57  ;;  %v7025_v2 = vld [vmem:[#allocation30_spill] sm:$0xff] }
 0x2a8   : > { %3324 = vst [vmem:[#allocation2 + $0xf8] sm:$0xff] %v3312_v23  ;;  %3484 = vst [vmem:[#allocation2 + $0x128] sm:$0xff] %v3472_v7  ;;  %v7021_v7 = vld [vmem:[#allocation26_spill] sm:$0xff] }
 0x2a9   : > { %3322 = vst [vmem:[#allocation2 + $0xe8] sm:$0xff] %v3310_v42 }
 0x2aa   : > { %v5295_v0 = vpop.f32.mrb[124].mxu0 }
 0x2ab   : > { %v3477_v14 = vadd.f32 %v5295_v0, %v6636_v6  ;;  %v5271_v9 = vpop.f32.mrb[128].mxu1  ;;  %v3427_v56 = vpop.f32.mrb[125].mxu0 }
 0x2ac   : > { %v3315_v59 = vadd.f32 %v5271_v9, %v2180_v31  ;;  %v3475_v52 = vadd.f32 %v3427_v56, %v2186_v53  ;;  %v3278_v19 = vpop.f32.mrb[129].mxu1  ;;  %v5296_v16 = vpop.f32.mrb[126].mxu0  ;;  %v7023_v31 = vld [vmem:[#allocation29_spill] sm:$0xff]  ;;  %v7026_v56 = vld [vmem:[#allocation28_spill] sm:$0xff] }
 0x2ad   : > { %3489 = vst [vmem:[#allocation2 + $0x150] sm:$0xff] %v3477_v14  ;;  %v3313_v10 = vadd.f32 %v3278_v19, %v2178_v54  ;;  %v3478_v4 = vadd.f32 %v5296_v16, %v6641_v39  ;;  %v5272_v15 = vpop.f32.mrb[130].mxu1  ;;  %v3430_v49 = vpop.f32.mrb[127].mxu0  ;;  %v7024_v54 = vld [vmem:[#allocation27_spill] sm:$0xff]  ;;  %v3910_v19 = vld [vmem:[#allocation2 + $0xc2] sm:$0xff]  ;;  %v3911_v16 = vld [vmem:[#allocation2 + $0xca] sm:$0xff] }
 0x2ae   : > { %3327 = vst [vmem:[#allocation2 + $0x110] sm:$0xff] %v3315_v59  ;;  %3487 = vst [vmem:[#allocation2 + $0x140] sm:$0xff] %v3475_v52  ;;  %v3316_v6 = vadd.f32 %v5272_v15, %v2181_v25  ;;  %v3476_v30 = vadd.f32 %v3430_v49, %v2187_v61  ;;  %v3281_v48 = vpop.f32.mrb[131].mxu1  ;;  %v7027_v49 = vld [vmem:[#allocation31_spill] sm:$0xff] }
 0x2af   : > { %3325 = vst [vmem:[#allocation2 + $0x100] sm:$0xff] %v3313_v10  ;;  %3490 = vst [vmem:[#allocation2 + $0x158] sm:$0xff] %v3478_v4  ;;  %v3314_v32 = vadd.f32 %v3281_v48, %v2179_v29 }
 0x2b0   : > { %3328 = vst [vmem:[#allocation2 + $0x118] sm:$0xff] %v3316_v6  ;;  %3488 = vst [vmem:[#allocation2 + $0x148] sm:$0xff] %v3476_v30 }
 0x2b1   : > { %3326 = vst [vmem:[#allocation2 + $0x108] sm:$0xff] %v3314_v32 }
 0x2b2   : > { %v5299_v57 = vpop.f32.mrb[128].mxu0 }
 0x2b3   : > { %v3481_v60 = vadd.f32 %v5299_v57, %v6656_v63  ;;  %v3443_v20 = vpop.f32.mrb[129].mxu0 }
 0x2b4   : > { %v3479_v23 = vadd.f32 %v3443_v20, %v7020_v21  ;;  %v5300_v39 = vpop.f32.mrb[130].mxu0  ;;  %v7029_v21 = vld [vmem:[#allocation32_spill] sm:$0xff] }
 0x2b5   : > { %3493 = vst [vmem:[#allocation2 + $0x170] sm:$0xff] %v3481_v60  ;;  %v3482_v8 = vadd.f32 %v5300_v39, %v7021_v7  ;;  %v3446_v42 = vpop.f32.mrb[131].mxu0 }
 0x2b6   : > { %3491 = vst [vmem:[#allocation2 + $0x160] sm:$0xff] %v3479_v23  ;;  %v3480_v35 = vadd.f32 %v3446_v42, %v7022_v5  ;;  %v3912_v42 = vld [vmem:[#allocation2 + $0xda] sm:$0xff] }
 0x2b7   : > { %3494 = vst [vmem:[#allocation2 + $0x178] sm:$0xff] %v3482_v8 }
 0x2b8   : > { %3492 = vst [vmem:[#allocation2 + $0x168] sm:$0xff] %v3480_v35  ;;  %v3919_v35 = vld [vmem:[#allocation2 + $0x12a] sm:$0xff] }
 0x2bb   : > { %v5319_v3 = vpop.f32.mrb[132].mxu1 }
 0x2bc   : > { %v3703_v53 = vadd.f32 %v5319_v3, %v7023_v31  ;;  %v3642_v0 = vpop.f32.mrb[133].mxu1 }
 0x2bd   : > { %v3701_v27 = vadd.f32 %v3642_v0, %v7024_v54  ;;  %v5320_v63 = vpop.f32.mrb[134].mxu1  ;;  %v3913_v0 = vld [vmem:[#allocation2 + $0xe2] sm:$0xff] }
 0x2be   : > { %3715 = vst [vmem:[#allocation2 + $0x190] sm:$0xff] %v3703_v53  ;;  %v3704_v14 = vadd.f32 %v5320_v63, %v7025_v2  ;;  %v3645_v9 = vpop.f32.mrb[135].mxu1 }
 0x2bf   : > { %3713 = vst [vmem:[#allocation2 + $0x180] sm:$0xff] %v3701_v27  ;;  %v3702_v50 = vadd.f32 %v3645_v9, %v7026_v56 }
 0x2c0   : > { %3716 = vst [vmem:[#allocation2 + $0x198] sm:$0xff] %v3704_v14  ;;  %v3928_v14 = vadd.f32 %v3912_v42, %v6759_v12 }
 0x2c1   : > { %3714 = vst [vmem:[#allocation2 + $0x188] sm:$0xff] %v3702_v50 }
 0x2c2   : > { %v5347_v25 = vpop.f32.mrb[132].mxu0 }
 0x2c3   : > { %v3869_v61 = vadd.f32 %v5347_v25, %v6746_v43  ;;  %v5323_v59 = vpop.f32.mrb[136].mxu1  ;;  %v3807_v52 = vpop.f32.mrb[133].mxu0  ;;  %v7028_v43 = vld [vmem:[#allocation33_spill] sm:$0xff] }
 0x2c4   : > { %v3707_v29 = vadd.f32 %v5323_v59, %v6700_v47  ;;  %v3867_v10 = vadd.f32 %v3807_v52, %v6734_v11  ;;  %v3658_v4 = vpop.f32.mrb[137].mxu1  ;;  %v5348_v15 = vpop.f32.mrb[134].mxu0  ;;  %v3926_v47 = vadd.f32 %v3910_v19, %v6754_v13  ;;  %v3927_v11 = vadd.f32 %v3911_v16, %v6762_v62  ;;  %v3914_v16 = vld [vmem:[#allocation2 + $0xf2] sm:$0xff] }
 0x2c5   : > { %3881 = vst [vmem:[#allocation2 + $0x1f0] sm:$0xff] %v3869_v61  ;;  %v3705_v6 = vadd.f32 %v3658_v4, %v7027_v49  ;;  %v3870_v30 = vadd.f32 %v5348_v15, %v6749_v24  ;;  %v5324_v48 = vpop.f32.mrb[138].mxu1  ;;  %v3810_v32 = vpop.f32.mrb[135].mxu0  ;;  %v3935_v59 = vadd.f32 %v3919_v35, %v6782_v44  ;;  %v3929_v19 = vadd.f32 %v3913_v0, %v6773_v1  ;;  %v3915_v4 = vld [vmem:[#allocation2 + $0xfa] sm:$0xff] }
 0x2c6   : > { %3719 = vst [vmem:[#allocation2 + $0x1b0] sm:$0xff] %v3707_v29  ;;  %3879 = vst [vmem:[#allocation2 + $0x1e0] sm:$0xff] %v3867_v10  ;;  %v3708_v57 = vadd.f32 %v5324_v48, %v7028_v43  ;;  %v3868_v60 = vadd.f32 %v3810_v32, %v6740_v33  ;;  %v3661_v20 = vpop.f32.mrb[139].mxu1  ;;  %v3918_v33 = vld [vmem:[#allocation2 + $0x122] sm:$0xff]  ;;  %v3930_v48 = vadd.f32 %v3914_v16, %v6767_v41  ;;  %v3917_v32 = vld [vmem:[#allocation2 + $0x112] sm:$0xff] }
 0x2c7   : > { %3717 = vst [vmem:[#allocation2 + $0x1a0] sm:$0xff] %v3705_v6  ;;  %3882 = vst [vmem:[#allocation2 + $0x1f8] sm:$0xff] %v3870_v30  ;;  %v3706_v23 = vadd.f32 %v3661_v20, %v7029_v21  ;;  %v3934_v61 = vadd.f32 %v3918_v33, %v6770_v34  ;;  %v3921_v43 = vld [vmem:[#allocation2 + $0x142] sm:$0xff] }
 0x2c8   : > { %v3942_v39 = vld [vmem:[#allocation2 + $0x184] sm:$0xff]  ;;  %v3943_v24 = vld [vmem:[#allocation2 + $0x18c] sm:$0xff]  ;;  %3720 = vst [vmem:[#allocation2 + $0x1b8] sm:$0xff] %v3708_v57  ;;  %3880 = vst [vmem:[#allocation2 + $0x1e8] sm:$0xff] %v3868_v60 }
 0x2c9   : > { %v3958_v7 = vadd.f32 %v3942_v39, %v3926_v47  ;;  %v3959_v8 = vadd.f32 %v3943_v24, %v3927_v11  ;;  %3718 = vst [vmem:[#allocation2 + $0x1a8] sm:$0xff] %v3706_v23  ;;  %v3916_v11 = vld [vmem:[#allocation2 + $0x10a] sm:$0xff] }
 0x2ca   : > { %v5351_v5 = vpop.f32.mrb[136].mxu0  ;;  %v7030_v23 = vld [vmem:[#allocation34_spill] sm:$0xff] }
 0x2cb   : > { %v3974_v3 = vmax.f32 %v3958_v7, 0.0  ;;  %v3975_v13 = vmax.f32 %v3959_v8, 0.0  ;;  %v3873_v62 = vadd.f32 %v5351_v5, %v6713_v55  ;;  %v5327_v31 = vpop.f32.mrb[140].mxu1  ;;  %v3823_v53 = vpop.f32.mrb[137].mxu0  ;;  %v3931_v7 = vadd.f32 %v3915_v4, %v6779_v58  ;;  %v7031_v5 = vld [vmem:[#allocation36_spill] sm:$0xff] }
 0x2cc   : > { %v3711_v54 = vadd.f32 %v5327_v31, %v6722_v22  ;;  %v3871_v27 = vadd.f32 %v3823_v53, %v6752_v51  ;;  %v3674_v63 = vpop.f32.mrb[141].mxu1  ;;  %v5352_v2 = vpop.f32.mrb[138].mxu0  ;;  %v3922_v53 = vld [vmem:[#allocation2 + $0x152] sm:$0xff]  ;;  %v3932_v58 = vadd.f32 %v3916_v11, %v6797_v40 }
 0x2cd   : > { %v4557_v9 = vpack.c.bf16 %v3975_v13, %v3974_v3  ;;  %3885 = vst [vmem:[#allocation2 + $0x210] sm:$0xff] %v3873_v62  ;;  %v3709_v56 = vadd.f32 %v3674_v63, %v6710_v45  ;;  %v3874_v50 = vadd.f32 %v5352_v2, %v6719_v36  ;;  %v5328_v25 = vpop.f32.mrb[142].mxu1  ;;  %v3826_v55 = vpop.f32.mrb[139].mxu0  ;;  %v3937_v3 = vadd.f32 %v3921_v43, %v6791_v38  ;;  %v7032_v62 = vld [vmem:[#allocation35_spill] sm:$0xff] }
 0x2ce   : > { %v3944_v22 = vld [vmem:[#allocation2 + $0x19c] sm:$0xff]  ;;  %3723 = vst [vmem:[#allocation2 + $0x1d0] sm:$0xff] %v3711_v54  ;;  %3883 = vst [vmem:[#allocation2 + $0x200] sm:$0xff] %v3871_v27  ;;  %v3712_v51 = vadd.f32 %v5328_v25, %v6728_v37  ;;  %v3872_v12 = vadd.f32 %v3826_v55, %v6757_v17  ;;  %v3677_v52 = vpop.f32.mrb[143].mxu1  ;;  %v7035_v25 = vld [vmem:[#allocation37_spill] sm:$0xff] }
 0x2cf   : > { %4558 = vst [vmem:[%s6857_s21] sm:$0xff] %v4557_v9   ;;  %v3960_v36 = vadd.f32 %v3944_v22, %v3928_v14  ;;  %v3950_v45 = vld [vmem:[#allocation2 + $0x1e4] sm:$0xff]  ;;  %v3951_v34 = vld [vmem:[#allocation2 + $0x1ec] sm:$0xff]  ;;  %3721 = vst [vmem:[#allocation2 + $0x1c0] sm:$0xff] %v3709_v56  ;;  %v3710_v44 = vadd.f32 %v3677_v52, %v6716_v28  ;;  %v3938_v55 = vadd.f32 %v3922_v53, %v7035_v25 }
 0x2d0   : > { %3886 = vst [vmem:[#allocation2 + $0x218] sm:$0xff] %v3874_v50  ;;  %v3966_v29 = vadd.f32 %v3950_v45, %v3934_v61  ;;  %v3967_v37 = vadd.f32 %v3951_v34, %v3935_v59  ;;  %v3945_v10 = vld [vmem:[#allocation2 + $0x1a4] sm:$0xff]  ;;  %3724 = vst [vmem:[#allocation2 + $0x1d8] sm:$0xff] %v3712_v51  ;;  %v3920_v17 = vld [vmem:[#allocation2 + $0x13a] sm:$0xff] }
 0x2d1   : > { %3884 = vst [vmem:[#allocation2 + $0x208] sm:$0xff] %v3872_v12  ;;  %v3961_v1 = vadd.f32 %v3945_v10, %v3929_v19  ;;  %3722 = vst [vmem:[#allocation2 + $0x1c8] sm:$0xff] %v3710_v44  ;;  %v3946_v15 = vld [vmem:[#allocation2 + $0x1b4] sm:$0xff]  ;;  %v3976_v57 = vmax.f32 %v3960_v36, 0.0  ;;  %v3936_v47 = vadd.f32 %v3920_v17, %v6776_v46  ;;  %v3924_v51 = vld [vmem:[#allocation2 + $0x16a] sm:$0xff] }
 0x2d2   : > { %v3982_v49 = vmax.f32 %v3966_v29, 0.0  ;;  %v3983_v6 = vmax.f32 %v3967_v37, 0.0  ;;  %v5355_v30 = vpop.f32.mrb[140].mxu0  ;;  %v3962_v8 = vadd.f32 %v3946_v15, %v3930_v48  ;;  %v3923_v38 = vld [vmem:[#allocation2 + $0x15a] sm:$0xff]  ;;  %v3925_v40 = vld [vmem:[#allocation2 + $0x172] sm:$0xff] }
 0x2d3   : > { %v3977_v28 = vmax.f32 %v3961_v1, 0.0  ;;  %v3877_v60 = vadd.f32 %v5355_v30, %v6737_v18  ;;  %v3839_v20 = vpop.f32.mrb[141].mxu0  ;;  %v3933_v18 = vadd.f32 %v3917_v32, %v6788_v26  ;;  %v7036_v19 = vld [vmem:[#allocation38_spill] sm:$0xff]  ;;  %v7037_v44 = vld [vmem:[#allocation39_spill] sm:$0xff]  ;;  %v7038_v10 = vld [vmem:[#allocation40_spill] sm:$0xff] }
 0x2d4   : > { %v4577_v21 = vpack.c.bf16 %v3983_v6, %v3982_v49  ;;  %v3875_v39 = vadd.f32 %v3839_v20, %v7030_v23  ;;  %v5356_v24 = vpop.f32.mrb[142].mxu0  ;;  %v3978_v14 = vmax.f32 %v3962_v8, 0.0  ;;  %v3939_v36 = vadd.f32 %v3923_v38, %v7036_v19 }
 0x2d5   : > { %v4562_v41 = vpack.c.bf16 %v3977_v28, %v3976_v57  ;;  %v3952_v42 = vld [vmem:[#allocation2 + $0x1fc] sm:$0xff]  ;;  %3889 = vst [vmem:[#allocation2 + $0x230] sm:$0xff] %v3877_v60  ;;  %v3878_v33 = vadd.f32 %v5356_v24, %v7031_v5  ;;  %v3842_v35 = vpop.f32.mrb[143].mxu0  ;;  %v3941_v16 = vadd.f32 %v3925_v40, %v7037_v44  ;;  %v3940_v17 = vadd.f32 %v3924_v51, %v7038_v10 }
 0x2d6   : > { %4597 = vst [vmem:[%s6857_s21 + $0x20] sm:$0xff] %v4577_v21   ;;  %v3968_v46 = vadd.f32 %v3952_v42, %v3936_v47  ;;  %v3947_v13 = vld [vmem:[#allocation2 + $0x1bc] sm:$0xff]  ;;  %3887 = vst [vmem:[#allocation2 + $0x220] sm:$0xff] %v3875_v39  ;;  %v3876_v31 = vadd.f32 %v3842_v35, %v7032_v62 }
 0x2d7   : > { %4594 = vst [vmem:[%s6857_s21 + $0x8] sm:$0xff] %v4562_v41   ;;  %v3963_v0 = vadd.f32 %v3947_v13, %v3931_v7  ;;  %v3949_v54 = vld [vmem:[#allocation2 + $0x1d4] sm:$0xff]  ;;  %3890 = vst [vmem:[#allocation2 + $0x238] sm:$0xff] %v3878_v33 }
 0x2d8   : > { %v3953_v27 = vld [vmem:[#allocation2 + $0x204] sm:$0xff]  ;;  %v3965_v63 = vadd.f32 %v3949_v54, %v3933_v18  ;;  %v3948_v2 = vld [vmem:[#allocation2 + $0x1cc] sm:$0xff]  ;;  %3888 = vst [vmem:[#allocation2 + $0x228] sm:$0xff] %v3876_v31  ;;  %v3954_v56 = vld [vmem:[#allocation2 + $0x214] sm:$0xff]  ;;  %v3984_v61 = vmax.f32 %v3968_v46, 0.0 }
 0x2d9   : > { %v3969_v26 = vadd.f32 %v3953_v27, %v3937_v3  ;;  %v3979_v9 = vmax.f32 %v3963_v0, 0.0  ;;  %v3964_v50 = vadd.f32 %v3948_v2, %v3932_v58  ;;  %v3970_v45 = vadd.f32 %v3954_v56, %v3938_v55 }
 0x2da   : > { %v3981_v59 = vmax.f32 %v3965_v63, 0.0 }
 0x2db   : > { %v3985_v22 = vmax.f32 %v3969_v26, 0.0  ;;  %v4567_v12 = vpack.c.bf16 %v3979_v9, %v3978_v14  ;;  %v3980_v52 = vmax.f32 %v3964_v50, 0.0  ;;  %v3986_v6 = vmax.f32 %v3970_v45, 0.0 }
 0x2dd   : > { %v4582_v34 = vpack.c.bf16 %v3985_v22, %v3984_v61  ;;  %4595 = vst [vmem:[%s6857_s21 + $0x10] sm:$0xff] %v4567_v12   ;;  %v4572_v29 = vpack.c.bf16 %v3981_v59, %v3980_v52  ;;  %v3955_v37 = vld [vmem:[#allocation2 + $0x21c] sm:$0xff] }
 0x2de   : > { %v3971_v1 = vadd.f32 %v3955_v37, %v3939_v36  ;;  %v3957_v4 = vld [vmem:[#allocation2 + $0x234] sm:$0xff] }
 0x2df   : > { %4598 = vst [vmem:[%s6857_s21 + $0x28] sm:$0xff] %v4582_v34   ;;  %4596 = vst [vmem:[%s6857_s21 + $0x18] sm:$0xff] %v4572_v29   ;;  %v3973_v15 = vadd.f32 %v3957_v4, %v3941_v16  ;;  %v3956_v49 = vld [vmem:[#allocation2 + $0x22c] sm:$0xff] }
 0x2e0   : > { %v3987_v30 = vmax.f32 %v3971_v1, 0.0  ;;  %v3972_v48 = vadd.f32 %v3956_v49, %v3940_v17 }
 0x2e1   : > { %v3989_v32 = vmax.f32 %v3973_v15, 0.0 }
 0x2e2   : > { %v4587_v43 = vpack.c.bf16 %v3987_v30, %v3986_v6  ;;  %v3988_v57 = vmax.f32 %v3972_v48, 0.0 }
 0x2e4   : > { %4599 = vst [vmem:[%s6857_s21 + $0x30] sm:$0xff] %v4587_v43   ;;  %v4592_v28 = vpack.c.bf16 %v3989_v32, %v3988_v57 }
 0x2e6   : > { %4600 = vst [vmem:[%s6857_s21 + $0x38] sm:$0xff] %v4592_v28  }
 0x2e7   : > { %5760 = shalt.err (!%p5757_p3)
}
 0x2e8   : > { %s5761_s26 = scalar_lea.hbm %s6886_s20, 1024  ;;  %s5765_s21 = scalar_lea.hbm %s7040_s2, 4096 }
 0x2e9   : > { %p5762_p13 = scmp.ne.s32.totalorder %s6886_s20, %s5761_s26  ;;  %p5766_p11 = scmp.lt.u32.totalorder %s6886_s20, %s7040_s2 }
 0x2ea   : > { %p5767_p4 = scmp.lt.u32.totalorder %s5765_s21, %s5761_s26  ;;  %p5769_p10 = scmp.lt.u32.totalorder %s5761_s26, %s6886_s20 }
 0x2eb   : > { %p5763_p6 = pnand %p5762_p13, %p7041_p7 }
 0x2ec   : > { %p5768_p2 = por %p5767_p4, %p5766_p11 }
 0x2ed   : > { %p5764_p0 = pneg %p5763_p6 }
 0x2ee   : > { %p5770_p12 = por %p5769_p10, %p5768_p2 }
 0x2f0   : > { %p5771_p8 = pnand %p5770_p12, %p5764_p0 }
 0x2f2   : > { %5774 = shalt.err (!%p5771_p8)
}
 0x2f3   : > { %s5893_s4 = smov 64   ;;  %s5894_s22 = smov 4  }
 0x2f4   : > { %5370 = dma.vmem_to_hbm [thread:$0]  (%p7041_p7), %s6888_s18, 1024, %s6886_s20, %s4071_s10, %s5893_s4, %s5893_s4, %s5894_s22  }
 0x2f5 PF: > { %s7042_s29 = sld [smem:[#allocation14_spill]]  ;;  %s7043_s7 = sld [smem:[#allocation23_spill]] }
 0x2f6   : > { %p5382_p9 = scmp.ge.s32.totalorder %s5879_s25, 2 }
 0x2fb   : > { %s4102_s15 = sand.u32 1, %s7042_s29   ;;  %p7044_p1 = scmp.ne.s32.totalorder %s7043_s7, 0 }
 0x2fc   : > { %s4103_s30 = scalar_lea.sflag [#allocation5], %s4102_s15 }
 0x2fd   : > { %p5377_p5 = pnand %p5382_p9, %p7044_p1 }
 0x2ff   : > { %5832 = dma.done.wait (!%p5377_p5), %s4103_s30, 1024  }
 0x300   : > { %5834 = vsyncadd (!%p5377_p5), %s4103_s30, 4294966272  ;;  %s23_s25 = sadd.s32 1, %s5879_s25   ;;  %s7045_s28 = sld [smem:[#allocation21_spill]] }
 0x301   : > { %p20_p3 = scmp.ge.s32.totalorder %s23_s25, 6   ;;  %s7046_s5 = sld [smem:[#allocation15_spill]] }
 0x302   : > { %s7047_s20 = sld [smem:[#allocation20_spill]]  ;;  %s7048_s13 = sld [smem:[#allocation18_spill]] }
 0x303   : > { %s7049_s10 = sld [smem:[#allocation19_spill]]  ;;  %s7050_s15 = smov %s5843_s16 }
 0x304   : > { %s7051_s16 = smov %s5847_s17  ;;  %s7053_s18 = smov %s5855_s19 }
 0x305   : > { %s7055_s21 = smov %s5871_s23  ;;  %s7056_s22 = smov %s5875_s24 }
 0x306   : > { %s7052_s17 = smov %s7045_s28  ;;  %22 = sbr.rel (!%p20_p3) target bundleno = 14 (0xe), region = 127 }
 0x307   : > { %s7054_s19 = smov %s7046_s5 }
 0x308   : > { %s7057_s23 = smov %s7048_s13 }
 0x309   : > { %s7058_s24 = smov %s7049_s10 }
 0x30d   :  { %4108 = vsyncpa [#allocation4], 1 }
 0x30e   :  { %4110 = vsyncpa [#allocation4 + $0x1], 1 }
 0x30f   :  { %4111 = vsyncpa [#allocation7], 1 }
 0x310   :  { %4113 = vsyncpa [#allocation7 + $0x1], 1 }
 0x311   :  { %4114 = vsyncpa [#allocation5], 1 }
 0x312   :  { %4116 = vsyncpa [#allocation5 + $0x1], 1 }

</bundles_post_ra>
